<compile_context>
chip_gen: v7x
topology: tpu7x:2x2x1
jax: 0.10.0
libtpu: 0.0.40
codegen_flags: <defaults>
</compile_context>

<pallas_src>
import math
from functools import partial

import jax
import jax.numpy as jnp
from jax.experimental import pallas as pl
from jax.experimental.pallas import tpu as pltpu

# ----------------------------- model config (small, synthetic) -----------------------------
B = 2          # batch
T = 4          # decode length (query tokens)
C = 2          # audio channels (per-channel codebooks)
V = 32         # vocab size per channel
D = 64         # d_model
H = 4          # attention heads
DH = 16        # head dim
HDH = H * DH   # 64
HALF = DH // 2
F = 128        # MLP hidden
S = 8          # encoder sequence length
L_PAST = 4     # tokens already in the self-attn KV cache
NUM_LAYERS = 2
EPS = 1e-5

BT = B * T
K_SELF = B * (L_PAST + T)   # fused {cache, new} key length (batch folded into key axis)
K_CROSS = B * S
V_PAD = 128                 # lane-dense padded logits width (C*V=64 -> 128)
NEG = -1e9


# ----------------------------- fused decoder kernel (no grid) -----------------------------
def _fused_decoder_kernel(
    x_ref, wqkv_ref, wo_ref, cwq_ref, cwo_ref, wi_ref, womlp_ref, norms_ref,
    selfk_ref, selfv_ref, crossk_ref, crossv_ref,
    cos_ref, sina_ref, sinb_ref, smask_ref, cmask_ref,
    fnorm_ref, wlog_ref,
    out_ref,
):
    x = x_ref[...]                       # [BT, D] f32, stays in vregs/VMEM the whole kernel
    cos_f = cos_ref[...]                 # [BT, HDH] head-tiled cos
    sin_a = sina_ref[...]                # [BT, HDH] (-sin on first half of each head, 0 else)
    sin_b = sinb_ref[...]                # [BT, HDH] ( sin on second half of each head, 0 else)
    smask = smask_ref[...]               # [BT, K_SELF]  additive (block-batch + causal)
    cmask = cmask_ref[...]               # [BT, K_CROSS] additive (block-batch + cross mask)
    scale = 1.0 / math.sqrt(DH)

    def rmsnorm(v, w_row):               # v [M, D] f32, w_row [1, D] f32
        var = jnp.mean(v * v, axis=-1, keepdims=True)
        return v * jax.lax.rsqrt(var + EPS) * w_row

    def rope(slab):
        # Whole-slab RoPE: out = slab*cos + slab[(j+HALF)%HDH]*sin_a + slab[(j-HALF)%HDH]*sin_b.
        # sin_a / sin_b are zero outside their head-half so the whole-slab rotation never mixes
        # heads.  (pltpu.roll(slab, HDH-HALF/HALF, axis=-1) is the XLU alternative.)
        fwd = jnp.concatenate([slab[:, HALF:], slab[:, :HALF]], axis=-1)     # slab[(j+HALF)%HDH]
        bwd = jnp.concatenate([slab[:, -HALF:], slab[:, :-HALF]], axis=-1)   # slab[(j-HALF)%HDH]
        return slab * cos_f + fwd * sin_a + bwd * sin_b

    def split_heads(slab):               # [BT, H*DH] -> [H, BT, DH]
        return jnp.stack([slab[:, h * DH:(h + 1) * DH] for h in range(H)], axis=0)

    def merge_heads(o3):                 # [H, BT, DH] -> [BT, H*DH]
        return jnp.concatenate([o3[h] for h in range(H)], axis=-1)

    def attention(q3, k3, v3, mask):
        # q3 [H, BT, DH] f32; k3/v3 [H, K, DH] bf16; mask [BT, K] additive f32.
        # One batched score matmul + one batched PV matmul per attention; batch mixing is
        # prevented by the block-diagonal -1e9 mask (exp underflows to exactly 0 in f32).
        s = jnp.einsum("hqd,hkd->hqk", q3.astype(jnp.bfloat16), k3,
                       preferred_element_type=jnp.float32) * scale
        s = s + mask[None, :, :]
        s = s - jnp.max(s, axis=-1, keepdims=True)
        p = jnp.exp(s)
        denom = jnp.sum(p, axis=-1, keepdims=True)
        o = jnp.einsum("hqk,hkd->hqd", p.astype(jnp.bfloat16), v3,
                       preferred_element_type=jnp.float32)
        return o * pl.reciprocal(denom, approx=True)

    for l in range(NUM_LAYERS):          # statically unrolled; weights indexed by layer
        nm = norms_ref[l]                # [3, D] (pre_sa, pre_ca, pre_mlp)

        # ---------------- self attention ----------------
        h_sa = rmsnorm(x, nm[0:1, :])
        qkv = jnp.dot(h_sa.astype(jnp.bfloat16), wqkv_ref[l],
                      preferred_element_type=jnp.float32)                    # [BT, 3*HDH]
        q3 = split_heads(rope(qkv[:, :HDH]))                                 # [H, BT, DH]
        k3n = split_heads(rope(qkv[:, HDH:2 * HDH]))                         # new keys
        v3n = split_heads(qkv[:, 2 * HDH:])                                  # new values
        # Fuse cached + new keys/values into a single key set (sublane concat, f32-tile aligned).
        k3 = jnp.concatenate([selfk_ref[l], k3n], axis=1).astype(jnp.bfloat16)   # [H, K_SELF, DH]
        v3 = jnp.concatenate([selfv_ref[l], v3n], axis=1).astype(jnp.bfloat16)
        o_sa = merge_heads(attention(q3, k3, v3, smask))                     # [BT, HDH]
        x = x + jnp.dot(o_sa.astype(jnp.bfloat16), wo_ref[l],
                        preferred_element_type=jnp.float32)

        # ---------------- cross attention (precomputed encoder KV cache) ----------------
        h_ca = rmsnorm(x, nm[1:2, :])
        cq = jnp.dot(h_ca.astype(jnp.bfloat16), cwq_ref[l],
                     preferred_element_type=jnp.float32)                     # [BT, HDH]
        cq3 = split_heads(rope(cq))
        o_ca = merge_heads(attention(cq3, crossk_ref[l], crossv_ref[l], cmask))
        x = x + jnp.dot(o_ca.astype(jnp.bfloat16), cwo_ref[l],
                        preferred_element_type=jnp.float32)

        # ---------------- gated-SiLU MLP ----------------
        h_mlp = rmsnorm(x, nm[2:3, :])
        hh = jnp.dot(h_mlp.astype(jnp.bfloat16), wi_ref[l],
                     preferred_element_type=jnp.float32)                     # [BT, 2F]
        act = jax.nn.silu(hh[:, :F]) * hh[:, F:]
        x = x + jnp.dot(act.astype(jnp.bfloat16), womlp_ref[l],
                        preferred_element_type=jnp.float32)

    # ---------------- final norm + lane-dense (padded) logits ----------------
    xf = rmsnorm(x, fnorm_ref[...])
    out_ref[...] = jnp.dot(xf.astype(jnp.bfloat16), wlog_ref[...],
                           preferred_element_type=jnp.float32)               # [BT, V_PAD]


def fused_decoder_call(x2d, packed, self_k, self_v, cross_k, cross_v,
                       cos_f, sin_a, sin_b, self_mask, cross_mask):
    # Grid-less call: every array is a whole-array VMEM-resident ref (total ~0.3 MB).
    return pl.pallas_call(
        _fused_decoder_kernel,
        out_shape=jax.ShapeDtypeStruct((BT, V_PAD), jnp.float32),
        compiler_params=pltpu.CompilerParams(vmem_limit_bytes=32 * 1024 * 1024),
    )(x2d,
      packed["wqkv"], packed["wo"], packed["cwq"], packed["cwo"],
      packed["wi"], packed["wo_mlp"], packed["norms"],
      self_k, self_v, cross_k, cross_v,
      cos_f, sin_a, sin_b, self_mask, cross_mask,
      packed["final_norm"], packed["W_logits_pad"])


# ----------------------------- JAX glue -----------------------------
def decoder_forward(packed, tgt_ids_BxTxC, enc_out, enc_positions, dec_positions,
                    dec_cross_attn_mask, *kv_caches):
    del enc_out, enc_positions  # cross KV cache already contains projected encoder states
    num_layers = len(kv_caches) // 4
    assert num_layers == NUM_LAYERS

    # --- per-channel embeddings, summed over the channel axis (plain XLA gathers, done once) ---
    emb = packed["embeddings"]                               # [C, V, D]
    x = jnp.zeros((B, T, D), jnp.float32)
    for c in range(C):
        x = x + jnp.take(emb[c], tgt_ids_BxTxC[..., c], axis=0)
    x2d = x.reshape(BT, D)

    # --- KV caches: head-major, batch folded into the key-length axis ---
    def relayout(cache):                                     # [B, H, len, DH] -> [H, B*len, DH]
        ln = cache.shape[2]
        return jnp.transpose(cache, (1, 0, 2, 3)).reshape(H, B * ln, DH)

    self_k = jnp.stack([relayout(kv_caches[4 * i]) for i in range(num_layers)])       # f32
    self_v = jnp.stack([relayout(kv_caches[4 * i + 1]) for i in range(num_layers)])   # f32
    cross_k = jnp.stack([relayout(kv_caches[4 * i + 2])
                         for i in range(num_layers)]).astype(jnp.bfloat16)
    cross_v = jnp.stack([relayout(kv_caches[4 * i + 3])
                         for i in range(num_layers)]).astype(jnp.bfloat16)

    # --- RoPE tables, head-tiled so the kernel applies RoPE to whole [BT, H*DH] slabs ---
    inv_freq = 1.0 / (10000.0 ** (jnp.arange(HALF, dtype=jnp.float32) / HALF))
    ang = dec_positions.astype(jnp.float32).reshape(BT, 1) * inv_freq[None, :]         # [BT, HALF]
    cos = jnp.cos(ang)
    sin = jnp.sin(ang)
    zeros = jnp.zeros_like(sin)
    cos_f = jnp.tile(jnp.concatenate([cos, cos], axis=-1), (1, H))                     # [BT, HDH]
    sin_a = jnp.tile(jnp.concatenate([-sin, zeros], axis=-1), (1, H))
    sin_b = jnp.tile(jnp.concatenate([zeros, sin], axis=-1), (1, H))

    # --- additive masks with batch folded into the key axis (block-diagonal batch mask) ---
    q_b = jnp.arange(BT) // T
    q_t = jnp.arange(BT) % T
    kc_b = jnp.arange(B * L_PAST) // L_PAST                   # cached keys: [b0 cache, b1 cache]
    kn_b = jnp.arange(BT) // T                                # new keys:    [b0 new,   b1 new  ]
    kn_t = jnp.arange(BT) % T
    allow_cache = q_b[:, None] == kc_b[None, :]
    allow_new = (q_b[:, None] == kn_b[None, :]) & (q_t[:, None] >= kn_t[None, :])
    self_mask = jnp.where(jnp.concatenate([allow_cache, allow_new], axis=1),
                          0.0, NEG).astype(jnp.float32)       # [BT, K_SELF]

    ks_b = jnp.arange(B * S) // S
    cm = dec_cross_attn_mask.reshape(B, T, S).reshape(BT, S)
    allow_cross = (q_b[:, None] == ks_b[None, :]) & jnp.tile(cm, (1, B))
    cross_mask = jnp.where(allow_cross, 0.0, NEG).astype(jnp.float32)   # [BT, K_CROSS]

    logits_pad = fused_decoder_call(x2d, packed, self_k, self_v, cross_k, cross_v,
                                    cos_f, sin_a, sin_b, self_mask, cross_mask)
    return logits_pad[:, :C * V].reshape(B, T, C, V)


# ----------------------------- deterministic parameter init & packing -----------------------------
def init_params(key):
    def nrm(k, shape, scale=0.02):
        return scale * jax.random.normal(k, shape, jnp.float32)

    keys = jax.random.split(key, 4 + NUM_LAYERS)
    params = {
        "embeddings": nrm(keys[0], (C, V, D)),
        "final_norm": jnp.ones((D,), jnp.float32),
        "W_logits": nrm(keys[1], (D, C * V)),
        "layers": [],
    }
    for i in range(NUM_LAYERS):
        lk = jax.random.split(keys[4 + i], 10)
        params["layers"].append({
            "pre_sa_norm": jnp.ones((D,), jnp.float32),
            "pre_ca_norm": jnp.ones((D,), jnp.float32),
            "pre_mlp_norm": jnp.ones((D,), jnp.float32),
            "Wq": nrm(lk[0], (D, HDH)),
            "Wk": nrm(lk[1], (D, HDH)),
            "Wv": nrm(lk[2], (D, HDH)),
            "Wo": nrm(lk[3], (HDH, D)),
            "cWq": nrm(lk[4], (D, HDH)),
            "cWo": nrm(lk[5], (HDH, D)),
            "wi_fused": nrm(lk[6], (D, 2 * F)),
            "wo": nrm(lk[7], (F, D)),
        })
    return params


def pack_params(params):
    """Stack per-layer weights into [NUM_LAYERS, ...] bf16 arrays, fuse Q/K/V, pad logits to 128 lanes."""
    ls = params["layers"]
    bf = jnp.bfloat16
    wlog_pad = jnp.zeros((D, V_PAD), jnp.float32).at[:, :C * V].set(params["W_logits"])
    return {
        "embeddings": params["embeddings"],
        "final_norm": params["final_norm"].reshape(1, D),                       # f32
        "W_logits_pad": wlog_pad.astype(bf),
        "wqkv": jnp.stack([jnp.concatenate([l["Wq"], l["Wk"], l["Wv"]], axis=1)
                           for l in ls]).astype(bf),
        "wo": jnp.stack([l["Wo"] for l in ls]).astype(bf),
        "cwq": jnp.stack([l["cWq"] for l in ls]).astype(bf),
        "cwo": jnp.stack([l["cWo"] for l in ls]).astype(bf),
        "wi": jnp.stack([l["wi_fused"] for l in ls]).astype(bf),
        "wo_mlp": jnp.stack([l["wo"] for l in ls]).astype(bf),
        "norms": jnp.stack([jnp.stack([l["pre_sa_norm"], l["pre_ca_norm"], l["pre_mlp_norm"]])
                            for l in ls]),                                      # f32 [L, 3, D]
    }


# ----------------------------- main -----------------------------
if __name__ == "__main__":
    root = jax.random.PRNGKey(0)
    k_param, k_ids, k_enc, k_cache = jax.random.split(root, 4)
    params = init_params(k_param)
    packed = pack_params(params)

    tgt_ids = jax.random.randint(k_ids, (B, T, C), 0, V, dtype=jnp.int32)
    enc_out = jax.random.normal(k_enc, (B, S, D), jnp.float32)
    enc_positions = jnp.broadcast_to(jnp.arange(S, dtype=jnp.int32)[None], (B, S))
    dec_positions = jnp.broadcast_to(
        (L_PAST + jnp.arange(T, dtype=jnp.int32))[None], (B, T))
    dec_cross_attn_mask = jnp.ones((B, 1, T, S), dtype=bool)

    cache_keys = jax.random.split(k_cache, 4 * NUM_LAYERS)
    kv_caches = []
    for i in range(NUM_LAYERS):
        kv_caches.append(0.1 * jax.random.normal(cache_keys[4 * i], (B, H, L_PAST, DH)))
        kv_caches.append(0.1 * jax.random.normal(cache_keys[4 * i + 1], (B, H, L_PAST, DH)))
        kv_caches.append(0.1 * jax.random.normal(cache_keys[4 * i + 2], (B, H, S, DH)))
        kv_caches.append(0.1 * jax.random.normal(cache_keys[4 * i + 3], (B, H, S, DH)))

    fwd = jax.jit(partial(decoder_forward, packed))
    logits = fwd(tgt_ids, enc_out, enc_positions, dec_positions,
                 dec_cross_attn_mask, *kv_caches)
    jax.block_until_ready(logits)
    assert logits.shape == (B, T, C, V), logits.shape
    assert bool(jnp.all(jnp.isfinite(logits)))
    print("KERNEL_OK")
</pallas_src>

<mosaic_0001>
module attributes {stable_mosaic.version = 11 : i64} {
  func.func @_fused_decoder_kernel(%arg0: memref<8x64xf32, #tpu.memory_space<vmem>>, %arg1: memref<2x64x192xbf16, #tpu.memory_space<vmem>>, %arg2: memref<2x64x64xbf16, #tpu.memory_space<vmem>>, %arg3: memref<2x64x64xbf16, #tpu.memory_space<vmem>>, %arg4: memref<2x64x64xbf16, #tpu.memory_space<vmem>>, %arg5: memref<2x64x256xbf16, #tpu.memory_space<vmem>>, %arg6: memref<2x128x64xbf16, #tpu.memory_space<vmem>>, %arg7: memref<2x3x64xf32, #tpu.memory_space<vmem>>, %arg8: memref<2x4x8x16xf32, #tpu.memory_space<vmem>>, %arg9: memref<2x4x8x16xf32, #tpu.memory_space<vmem>>, %arg10: memref<2x4x16x16xbf16, #tpu.memory_space<vmem>>, %arg11: memref<2x4x16x16xbf16, #tpu.memory_space<vmem>>, %arg12: memref<8x64xf32, #tpu.memory_space<vmem>>, %arg13: memref<8x64xf32, #tpu.memory_space<vmem>>, %arg14: memref<8x64xf32, #tpu.memory_space<vmem>>, %arg15: memref<8x16xf32, #tpu.memory_space<vmem>>, %arg16: memref<8x16xf32, #tpu.memory_space<vmem>>, %arg17: memref<1x64xf32, #tpu.memory_space<vmem>>, %arg18: memref<64x128xbf16, #tpu.memory_space<vmem>>, %arg19: memref<8x128xf32, #tpu.memory_space<vmem>>) attributes {dimension_semantics = [], scalar_prefetch = 0 : i64, scratch_operands = 0 : i64, tpu.core_type = #tpu.core_type<tc>} {
    %c0 = arith.constant 0 : index
    %c0_0 = arith.constant 0 : index
    %0 = vector.load %arg0[%c0, %c0_0] : memref<8x64xf32, #tpu.memory_space<vmem>>, vector<8x64xf32>
    %c0_1 = arith.constant 0 : index
    %c0_2 = arith.constant 0 : index
    %1 = vector.load %arg12[%c0_1, %c0_2] : memref<8x64xf32, #tpu.memory_space<vmem>>, vector<8x64xf32>
    %c0_3 = arith.constant 0 : index
    %c0_4 = arith.constant 0 : index
    %2 = vector.load %arg13[%c0_3, %c0_4] : memref<8x64xf32, #tpu.memory_space<vmem>>, vector<8x64xf32>
    %c0_5 = arith.constant 0 : index
    %c0_6 = arith.constant 0 : index
    %3 = vector.load %arg14[%c0_5, %c0_6] : memref<8x64xf32, #tpu.memory_space<vmem>>, vector<8x64xf32>
    %c0_7 = arith.constant 0 : index
    %c0_8 = arith.constant 0 : index
    %4 = vector.load %arg15[%c0_7, %c0_8] : memref<8x16xf32, #tpu.memory_space<vmem>>, vector<8x16xf32>
    %c0_9 = arith.constant 0 : index
    %c0_10 = arith.constant 0 : index
    %5 = vector.load %arg16[%c0_9, %c0_10] : memref<8x16xf32, #tpu.memory_space<vmem>>, vector<8x16xf32>
    %c0_11 = arith.constant 0 : index
    %c0_12 = arith.constant 0 : index
    %c0_13 = arith.constant 0 : index
    %6 = vector.load %arg7[%c0_11, %c0_12, %c0_13] : memref<2x3x64xf32, #tpu.memory_space<vmem>>, vector<1x3x64xf32>
    %7 = vector.shape_cast %6 : vector<1x3x64xf32> to vector<3x64xf32>
    %8 = vector.extract_strided_slice %7 {offsets = [0, 0], sizes = [1, 64], strides = [1, 1]} : vector<3x64xf32> to vector<1x64xf32>
    %9 = arith.mulf %0, %0 : vector<8x64xf32>
    %cst = arith.constant dense<0.000000e+00> : vector<8xf32>
    %10 = vector.multi_reduction <add>, %9, %cst [1] : vector<8x64xf32> to vector<8xf32>
    %11 = vector.shape_cast %10 : vector<8xf32> to vector<8x1xf32>
    %cst_14 = arith.constant 6.400000e+01 : f32
    %12 = vector.broadcast %cst_14 : f32 to vector<8x1xf32>
    %13 = arith.divf %11, %12 : vector<8x1xf32>
    %cst_15 = arith.constant 9.99999974E-6 : f32
    %14 = vector.broadcast %cst_15 : f32 to vector<8x1xf32>
    %15 = arith.addf %13, %14 : vector<8x1xf32>
    %16 = math.rsqrt %15 : vector<8x1xf32>
    %17 = vector.broadcast %16 : vector<8x1xf32> to vector<8x64xf32>
    %18 = arith.mulf %0, %17 : vector<8x64xf32>
    %19 = vector.broadcast %8 : vector<1x64xf32> to vector<8x64xf32>
    %20 = arith.mulf %18, %19 : vector<8x64xf32>
    %21 = arith.truncf %20 : vector<8x64xf32> to vector<8x64xbf16>
    %c0_16 = arith.constant 0 : index
    %c0_17 = arith.constant 0 : index
    %c0_18 = arith.constant 0 : index
    %22 = vector.load %arg1[%c0_16, %c0_17, %c0_18] : memref<2x64x192xbf16, #tpu.memory_space<vmem>>, vector<1x64x192xbf16>
    %23 = vector.shape_cast %22 : vector<1x64x192xbf16> to vector<64x192xbf16>
    %cst_19 = arith.constant dense<0.000000e+00> : vector<8x192xf32>
    %24 = tpu.matmul %21, %23, %cst_19 {dimension_numbers = #tpu.dot_dimension_numbers<[1], [0], [0], [1], [0, 0, 1, 1], [], []>} : vector<8x64xbf16>, vector<64x192xbf16>, vector<8x192xf32> -> vector<8x192xf32>
    %25 = vector.extract_strided_slice %24 {offsets = [0, 0], sizes = [8, 64], strides = [1, 1]} : vector<8x192xf32> to vector<8x64xf32>
    %26 = vector.extract_strided_slice %25 {offsets = [0, 8], sizes = [8, 56], strides = [1, 1]} : vector<8x64xf32> to vector<8x56xf32>
    %27 = vector.extract_strided_slice %25 {offsets = [0, 0], sizes = [8, 8], strides = [1, 1]} : vector<8x64xf32> to vector<8x8xf32>
    %28 = tpu.concatenate %26, %27 in 1 : vector<8x56xf32>, vector<8x8xf32> -> vector<8x64xf32>
    %29 = vector.extract_strided_slice %25 {offsets = [0, 56], sizes = [8, 8], strides = [1, 1]} : vector<8x64xf32> to vector<8x8xf32>
    %30 = vector.extract_strided_slice %25 {offsets = [0, 0], sizes = [8, 56], strides = [1, 1]} : vector<8x64xf32> to vector<8x56xf32>
    %31 = tpu.concatenate %29, %30 in 1 : vector<8x8xf32>, vector<8x56xf32> -> vector<8x64xf32>
    %32 = arith.mulf %25, %1 : vector<8x64xf32>
    %33 = arith.mulf %28, %2 : vector<8x64xf32>
    %34 = arith.addf %32, %33 : vector<8x64xf32>
    %35 = arith.mulf %31, %3 : vector<8x64xf32>
    %36 = arith.addf %34, %35 : vector<8x64xf32>
    %37 = vector.extract_strided_slice %36 {offsets = [0, 0], sizes = [8, 16], strides = [1, 1]} : vector<8x64xf32> to vector<8x16xf32>
    %38 = vector.extract_strided_slice %36 {offsets = [0, 16], sizes = [8, 16], strides = [1, 1]} : vector<8x64xf32> to vector<8x16xf32>
    %39 = vector.extract_strided_slice %36 {offsets = [0, 32], sizes = [8, 16], strides = [1, 1]} : vector<8x64xf32> to vector<8x16xf32>
    %40 = vector.extract_strided_slice %36 {offsets = [0, 48], sizes = [8, 16], strides = [1, 1]} : vector<8x64xf32> to vector<8x16xf32>
    %41 = vector.shape_cast %37 : vector<8x16xf32> to vector<1x8x16xf32>
    %42 = vector.shape_cast %38 : vector<8x16xf32> to vector<1x8x16xf32>
    %43 = vector.shape_cast %39 : vector<8x16xf32> to vector<1x8x16xf32>
    %44 = vector.shape_cast %40 : vector<8x16xf32> to vector<1x8x16xf32>
    %45 = tpu.concatenate %41, %42, %43, %44 in 0 : vector<1x8x16xf32>, vector<1x8x16xf32>, vector<1x8x16xf32>, vector<1x8x16xf32> -> vector<4x8x16xf32>
    %46 = vector.extract_strided_slice %24 {offsets = [0, 64], sizes = [8, 64], strides = [1, 1]} : vector<8x192xf32> to vector<8x64xf32>
    %47 = vector.extract_strided_slice %46 {offsets = [0, 8], sizes = [8, 56], strides = [1, 1]} : vector<8x64xf32> to vector<8x56xf32>
    %48 = vector.extract_strided_slice %46 {offsets = [0, 0], sizes = [8, 8], strides = [1, 1]} : vector<8x64xf32> to vector<8x8xf32>
    %49 = tpu.concatenate %47, %48 in 1 : vector<8x56xf32>, vector<8x8xf32> -> vector<8x64xf32>
    %50 = vector.extract_strided_slice %46 {offsets = [0, 56], sizes = [8, 8], strides = [1, 1]} : vector<8x64xf32> to vector<8x8xf32>
    %51 = vector.extract_strided_slice %46 {offsets = [0, 0], sizes = [8, 56], strides = [1, 1]} : vector<8x64xf32> to vector<8x56xf32>
    %52 = tpu.concatenate %50, %51 in 1 : vector<8x8xf32>, vector<8x56xf32> -> vector<8x64xf32>
    %53 = arith.mulf %46, %1 : vector<8x64xf32>
    %54 = arith.mulf %49, %2 : vector<8x64xf32>
    %55 = arith.addf %53, %54 : vector<8x64xf32>
    %56 = arith.mulf %52, %3 : vector<8x64xf32>
    %57 = arith.addf %55, %56 : vector<8x64xf32>
    %58 = vector.extract_strided_slice %57 {offsets = [0, 0], sizes = [8, 16], strides = [1, 1]} : vector<8x64xf32> to vector<8x16xf32>
    %59 = vector.extract_strided_slice %57 {offsets = [0, 16], sizes = [8, 16], strides = [1, 1]} : vector<8x64xf32> to vector<8x16xf32>
    %60 = vector.extract_strided_slice %57 {offsets = [0, 32], sizes = [8, 16], strides = [1, 1]} : vector<8x64xf32> to vector<8x16xf32>
    %61 = vector.extract_strided_slice %57 {offsets = [0, 48], sizes = [8, 16], strides = [1, 1]} : vector<8x64xf32> to vector<8x16xf32>
    %62 = vector.shape_cast %58 : vector<8x16xf32> to vector<1x8x16xf32>
    %63 = vector.shape_cast %59 : vector<8x16xf32> to vector<1x8x16xf32>
    %64 = vector.shape_cast %60 : vector<8x16xf32> to vector<1x8x16xf32>
    %65 = vector.shape_cast %61 : vector<8x16xf32> to vector<1x8x16xf32>
    %66 = tpu.concatenate %62, %63, %64, %65 in 0 : vector<1x8x16xf32>, vector<1x8x16xf32>, vector<1x8x16xf32>, vector<1x8x16xf32> -> vector<4x8x16xf32>
    %67 = vector.extract_strided_slice %24 {offsets = [0, 128], sizes = [8, 64], strides = [1, 1]} : vector<8x192xf32> to vector<8x64xf32>
    %68 = vector.extract_strided_slice %67 {offsets = [0, 0], sizes = [8, 16], strides = [1, 1]} : vector<8x64xf32> to vector<8x16xf32>
    %69 = vector.extract_strided_slice %67 {offsets = [0, 16], sizes = [8, 16], strides = [1, 1]} : vector<8x64xf32> to vector<8x16xf32>
    %70 = vector.extract_strided_slice %67 {offsets = [0, 32], sizes = [8, 16], strides = [1, 1]} : vector<8x64xf32> to vector<8x16xf32>
    %71 = vector.extract_strided_slice %67 {offsets = [0, 48], sizes = [8, 16], strides = [1, 1]} : vector<8x64xf32> to vector<8x16xf32>
    %72 = vector.shape_cast %68 : vector<8x16xf32> to vector<1x8x16xf32>
    %73 = vector.shape_cast %69 : vector<8x16xf32> to vector<1x8x16xf32>
    %74 = vector.shape_cast %70 : vector<8x16xf32> to vector<1x8x16xf32>
    %75 = vector.shape_cast %71 : vector<8x16xf32> to vector<1x8x16xf32>
    %76 = tpu.concatenate %72, %73, %74, %75 in 0 : vector<1x8x16xf32>, vector<1x8x16xf32>, vector<1x8x16xf32>, vector<1x8x16xf32> -> vector<4x8x16xf32>
    %c0_20 = arith.constant 0 : index
    %c0_21 = arith.constant 0 : index
    %c0_22 = arith.constant 0 : index
    %c0_23 = arith.constant 0 : index
    %77 = vector.load %arg8[%c0_20, %c0_21, %c0_22, %c0_23] : memref<2x4x8x16xf32, #tpu.memory_space<vmem>>, vector<1x4x8x16xf32>
    %78 = vector.shape_cast %77 : vector<1x4x8x16xf32> to vector<4x8x16xf32>
    %79 = tpu.concatenate %78, %66 in 1 : vector<4x8x16xf32>, vector<4x8x16xf32> -> vector<4x16x16xf32>
    %80 = arith.truncf %79 : vector<4x16x16xf32> to vector<4x16x16xbf16>
    %c0_24 = arith.constant 0 : index
    %c0_25 = arith.constant 0 : index
    %c0_26 = arith.constant 0 : index
    %c0_27 = arith.constant 0 : index
    %81 = vector.load %arg9[%c0_24, %c0_25, %c0_26, %c0_27] : memref<2x4x8x16xf32, #tpu.memory_space<vmem>>, vector<1x4x8x16xf32>
    %82 = vector.shape_cast %81 : vector<1x4x8x16xf32> to vector<4x8x16xf32>
    %83 = tpu.concatenate %82, %76 in 1 : vector<4x8x16xf32>, vector<4x8x16xf32> -> vector<4x16x16xf32>
    %84 = arith.truncf %83 : vector<4x16x16xf32> to vector<4x16x16xbf16>
    %85 = arith.truncf %45 : vector<4x8x16xf32> to vector<4x8x16xbf16>
    "tpu.trace_start"() <{level = 10 : i32, message = "hqd,hkd->hqk"}> : () -> ()
    %cst_28 = arith.constant dense<0.000000e+00> : vector<4x8x16xf32>
    %86 = tpu.matmul %85, %80, %cst_28 {dimension_numbers = #tpu.dot_dimension_numbers<[2], [2], [1], [1], [0, 0, 0, 1, 1, 1], [0], [0]>} : vector<4x8x16xbf16>, vector<4x16x16xbf16>, vector<4x8x16xf32> -> vector<4x8x16xf32>
    "tpu.trace_stop"() : () -> ()
    %cst_29 = arith.constant 2.500000e-01 : f32
    %87 = vector.broadcast %cst_29 : f32 to vector<4x8x16xf32>
    %88 = arith.mulf %86, %87 : vector<4x8x16xf32>
    %89 = vector.shape_cast %4 : vector<8x16xf32> to vector<1x8x16xf32>
    %90 = vector.broadcast %89 : vector<1x8x16xf32> to vector<4x8x16xf32>
    %91 = arith.addf %88, %90 : vector<4x8x16xf32>
    %cst_30 = arith.constant dense<0xFF800000> : vector<4x8xf32>
    %92 = vector.multi_reduction <maximumf>, %91, %cst_30 [2] : vector<4x8x16xf32> to vector<4x8xf32>
    %93 = vector.shape_cast %92 : vector<4x8xf32> to vector<4x8x1xf32>
    %94 = vector.broadcast %93 : vector<4x8x1xf32> to vector<4x8x16xf32>
    %95 = arith.subf %91, %94 : vector<4x8x16xf32>
    %96 = math.exp %95 : vector<4x8x16xf32>
    %cst_31 = arith.constant dense<0.000000e+00> : vector<4x8xf32>
    %97 = vector.multi_reduction <add>, %96, %cst_31 [2] : vector<4x8x16xf32> to vector<4x8xf32>
    %98 = vector.shape_cast %97 : vector<4x8xf32> to vector<4x8x1xf32>
    %99 = arith.truncf %96 : vector<4x8x16xf32> to vector<4x8x16xbf16>
    "tpu.trace_start"() <{level = 10 : i32, message = "hqk,hkd->hqd"}> : () -> ()
    %cst_32 = arith.constant dense<0.000000e+00> : vector<4x8x16xf32>
    %100 = tpu.matmul %99, %84, %cst_32 {dimension_numbers = #tpu.dot_dimension_numbers<[2], [1], [1], [2], [0, 0, 0, 1, 1, 2], [0], [0]>} : vector<4x8x16xbf16>, vector<4x16x16xbf16>, vector<4x8x16xf32> -> vector<4x8x16xf32>
    "tpu.trace_stop"() : () -> ()
    %101 = tpu.reciprocal %98 {approx = true} : vector<4x8x1xf32> -> vector<4x8x1xf32>
    %102 = vector.broadcast %101 : vector<4x8x1xf32> to vector<4x8x16xf32>
    %103 = arith.mulf %100, %102 : vector<4x8x16xf32>
    %104 = vector.extract_strided_slice %103 {offsets = [0, 0, 0], sizes = [1, 8, 16], strides = [1, 1, 1]} : vector<4x8x16xf32> to vector<1x8x16xf32>
    %105 = vector.shape_cast %104 : vector<1x8x16xf32> to vector<8x16xf32>
    %106 = vector.extract_strided_slice %103 {offsets = [1, 0, 0], sizes = [1, 8, 16], strides = [1, 1, 1]} : vector<4x8x16xf32> to vector<1x8x16xf32>
    %107 = vector.shape_cast %106 : vector<1x8x16xf32> to vector<8x16xf32>
    %108 = vector.extract_strided_slice %103 {offsets = [2, 0, 0], sizes = [1, 8, 16], strides = [1, 1, 1]} : vector<4x8x16xf32> to vector<1x8x16xf32>
    %109 = vector.shape_cast %108 : vector<1x8x16xf32> to vector<8x16xf32>
    %110 = vector.extract_strided_slice %103 {offsets = [3, 0, 0], sizes = [1, 8, 16], strides = [1, 1, 1]} : vector<4x8x16xf32> to vector<1x8x16xf32>
    %111 = vector.shape_cast %110 : vector<1x8x16xf32> to vector<8x16xf32>
    %112 = tpu.concatenate %105, %107, %109, %111 in 1 : vector<8x16xf32>, vector<8x16xf32>, vector<8x16xf32>, vector<8x16xf32> -> vector<8x64xf32>
    %113 = arith.truncf %112 : vector<8x64xf32> to vector<8x64xbf16>
    %c0_33 = arith.constant 0 : index
    %c0_34 = arith.constant 0 : index
    %c0_35 = arith.constant 0 : index
    %114 = vector.load %arg2[%c0_33, %c0_34, %c0_35] : memref<2x64x64xbf16, #tpu.memory_space<vmem>>, vector<1x64x64xbf16>
    %115 = vector.shape_cast %114 : vector<1x64x64xbf16> to vector<64x64xbf16>
    %cst_36 = arith.constant dense<0.000000e+00> : vector<8x64xf32>
    %116 = tpu.matmul %113, %115, %cst_36 {dimension_numbers = #tpu.dot_dimension_numbers<[1], [0], [0], [1], [0, 0, 1, 1], [], []>} : vector<8x64xbf16>, vector<64x64xbf16>, vector<8x64xf32> -> vector<8x64xf32>
    %117 = arith.addf %0, %116 : vector<8x64xf32>
    %118 = vector.extract_strided_slice %7 {offsets = [1, 0], sizes = [1, 64], strides = [1, 1]} : vector<3x64xf32> to vector<1x64xf32>
    %119 = arith.mulf %117, %117 : vector<8x64xf32>
    %cst_37 = arith.constant dense<0.000000e+00> : vector<8xf32>
    %120 = vector.multi_reduction <add>, %119, %cst_37 [1] : vector<8x64xf32> to vector<8xf32>
    %121 = vector.shape_cast %120 : vector<8xf32> to vector<8x1xf32>
    %cst_38 = arith.constant 6.400000e+01 : f32
    %122 = vector.broadcast %cst_38 : f32 to vector<8x1xf32>
    %123 = arith.divf %121, %122 : vector<8x1xf32>
    %cst_39 = arith.constant 9.99999974E-6 : f32
    %124 = vector.broadcast %cst_39 : f32 to vector<8x1xf32>
    %125 = arith.addf %123, %124 : vector<8x1xf32>
    %126 = math.rsqrt %125 : vector<8x1xf32>
    %127 = vector.broadcast %126 : vector<8x1xf32> to vector<8x64xf32>
    %128 = arith.mulf %117, %127 : vector<8x64xf32>
    %129 = vector.broadcast %118 : vector<1x64xf32> to vector<8x64xf32>
    %130 = arith.mulf %128, %129 : vector<8x64xf32>
    %131 = arith.truncf %130 : vector<8x64xf32> to vector<8x64xbf16>
    %c0_40 = arith.constant 0 : index
    %c0_41 = arith.constant 0 : index
    %c0_42 = arith.constant 0 : index
    %132 = vector.load %arg3[%c0_40, %c0_41, %c0_42] : memref<2x64x64xbf16, #tpu.memory_space<vmem>>, vector<1x64x64xbf16>
    %133 = vector.shape_cast %132 : vector<1x64x64xbf16> to vector<64x64xbf16>
    %cst_43 = arith.constant dense<0.000000e+00> : vector<8x64xf32>
    %134 = tpu.matmul %131, %133, %cst_43 {dimension_numbers = #tpu.dot_dimension_numbers<[1], [0], [0], [1], [0, 0, 1, 1], [], []>} : vector<8x64xbf16>, vector<64x64xbf16>, vector<8x64xf32> -> vector<8x64xf32>
    %135 = vector.extract_strided_slice %134 {offsets = [0, 8], sizes = [8, 56], strides = [1, 1]} : vector<8x64xf32> to vector<8x56xf32>
    %136 = vector.extract_strided_slice %134 {offsets = [0, 0], sizes = [8, 8], strides = [1, 1]} : vector<8x64xf32> to vector<8x8xf32>
    %137 = tpu.concatenate %135, %136 in 1 : vector<8x56xf32>, vector<8x8xf32> -> vector<8x64xf32>
    %138 = vector.extract_strided_slice %134 {offsets = [0, 56], sizes = [8, 8], strides = [1, 1]} : vector<8x64xf32> to vector<8x8xf32>
    %139 = vector.extract_strided_slice %134 {offsets = [0, 0], sizes = [8, 56], strides = [1, 1]} : vector<8x64xf32> to vector<8x56xf32>
    %140 = tpu.concatenate %138, %139 in 1 : vector<8x8xf32>, vector<8x56xf32> -> vector<8x64xf32>
    %141 = arith.mulf %134, %1 : vector<8x64xf32>
    %142 = arith.mulf %137, %2 : vector<8x64xf32>
    %143 = arith.addf %141, %142 : vector<8x64xf32>
    %144 = arith.mulf %140, %3 : vector<8x64xf32>
    %145 = arith.addf %143, %144 : vector<8x64xf32>
    %146 = vector.extract_strided_slice %145 {offsets = [0, 0], sizes = [8, 16], strides = [1, 1]} : vector<8x64xf32> to vector<8x16xf32>
    %147 = vector.extract_strided_slice %145 {offsets = [0, 16], sizes = [8, 16], strides = [1, 1]} : vector<8x64xf32> to vector<8x16xf32>
    %148 = vector.extract_strided_slice %145 {offsets = [0, 32], sizes = [8, 16], strides = [1, 1]} : vector<8x64xf32> to vector<8x16xf32>
    %149 = vector.extract_strided_slice %145 {offsets = [0, 48], sizes = [8, 16], strides = [1, 1]} : vector<8x64xf32> to vector<8x16xf32>
    %150 = vector.shape_cast %146 : vector<8x16xf32> to vector<1x8x16xf32>
    %151 = vector.shape_cast %147 : vector<8x16xf32> to vector<1x8x16xf32>
    %152 = vector.shape_cast %148 : vector<8x16xf32> to vector<1x8x16xf32>
    %153 = vector.shape_cast %149 : vector<8x16xf32> to vector<1x8x16xf32>
    %154 = tpu.concatenate %150, %151, %152, %153 in 0 : vector<1x8x16xf32>, vector<1x8x16xf32>, vector<1x8x16xf32>, vector<1x8x16xf32> -> vector<4x8x16xf32>
    %c0_44 = arith.constant 0 : index
    %c0_45 = arith.constant 0 : index
    %c0_46 = arith.constant 0 : index
    %c0_47 = arith.constant 0 : index
    %155 = vector.load %arg10[%c0_44, %c0_45, %c0_46, %c0_47] : memref<2x4x16x16xbf16, #tpu.memory_space<vmem>>, vector<1x4x16x16xbf16>
    %156 = vector.shape_cast %155 : vector<1x4x16x16xbf16> to vector<4x16x16xbf16>
    %c0_48 = arith.constant 0 : index
    %c0_49 = arith.constant 0 : index
    %c0_50 = arith.constant 0 : index
    %c0_51 = arith.constant 0 : index
    %157 = vector.load %arg11[%c0_48, %c0_49, %c0_50, %c0_51] : memref<2x4x16x16xbf16, #tpu.memory_space<vmem>>, vector<1x4x16x16xbf16>
    %158 = vector.shape_cast %157 : vector<1x4x16x16xbf16> to vector<4x16x16xbf16>
    %159 = arith.truncf %154 : vector<4x8x16xf32> to vector<4x8x16xbf16>
    "tpu.trace_start"() <{level = 10 : i32, message = "hqd,hkd->hqk"}> : () -> ()
    %cst_52 = arith.constant dense<0.000000e+00> : vector<4x8x16xf32>
    %160 = tpu.matmul %159, %156, %cst_52 {dimension_numbers = #tpu.dot_dimension_numbers<[2], [2], [1], [1], [0, 0, 0, 1, 1, 1], [0], [0]>} : vector<4x8x16xbf16>, vector<4x16x16xbf16>, vector<4x8x16xf32> -> vector<4x8x16xf32>
    "tpu.trace_stop"() : () -> ()
    %cst_53 = arith.constant 2.500000e-01 : f32
    %161 = vector.broadcast %cst_53 : f32 to vector<4x8x16xf32>
    %162 = arith.mulf %160, %161 : vector<4x8x16xf32>
    %163 = vector.shape_cast %5 : vector<8x16xf32> to vector<1x8x16xf32>
    %164 = vector.broadcast %163 : vector<1x8x16xf32> to vector<4x8x16xf32>
    %165 = arith.addf %162, %164 : vector<4x8x16xf32>
    %cst_54 = arith.constant dense<0xFF800000> : vector<4x8xf32>
    %166 = vector.multi_reduction <maximumf>, %165, %cst_54 [2] : vector<4x8x16xf32> to vector<4x8xf32>
    %167 = vector.shape_cast %166 : vector<4x8xf32> to vector<4x8x1xf32>
    %168 = vector.broadcast %167 : vector<4x8x1xf32> to vector<4x8x16xf32>
    %169 = arith.subf %165, %168 : vector<4x8x16xf32>
    %170 = math.exp %169 : vector<4x8x16xf32>
    %cst_55 = arith.constant dense<0.000000e+00> : vector<4x8xf32>
    %171 = vector.multi_reduction <add>, %170, %cst_55 [2] : vector<4x8x16xf32> to vector<4x8xf32>
    %172 = vector.shape_cast %171 : vector<4x8xf32> to vector<4x8x1xf32>
    %173 = arith.truncf %170 : vector<4x8x16xf32> to vector<4x8x16xbf16>
    "tpu.trace_start"() <{level = 10 : i32, message = "hqk,hkd->hqd"}> : () -> ()
    %cst_56 = arith.constant dense<0.000000e+00> : vector<4x8x16xf32>
    %174 = tpu.matmul %173, %158, %cst_56 {dimension_numbers = #tpu.dot_dimension_numbers<[2], [1], [1], [2], [0, 0, 0, 1, 1, 2], [0], [0]>} : vector<4x8x16xbf16>, vector<4x16x16xbf16>, vector<4x8x16xf32> -> vector<4x8x16xf32>
    "tpu.trace_stop"() : () -> ()
    %175 = tpu.reciprocal %172 {approx = true} : vector<4x8x1xf32> -> vector<4x8x1xf32>
    %176 = vector.broadcast %175 : vector<4x8x1xf32> to vector<4x8x16xf32>
    %177 = arith.mulf %174, %176 : vector<4x8x16xf32>
    %178 = vector.extract_strided_slice %177 {offsets = [0, 0, 0], sizes = [1, 8, 16], strides = [1, 1, 1]} : vector<4x8x16xf32> to vector<1x8x16xf32>
    %179 = vector.shape_cast %178 : vector<1x8x16xf32> to vector<8x16xf32>
    %180 = vector.extract_strided_slice %177 {offsets = [1, 0, 0], sizes = [1, 8, 16], strides = [1, 1, 1]} : vector<4x8x16xf32> to vector<1x8x16xf32>
    %181 = vector.shape_cast %180 : vector<1x8x16xf32> to vector<8x16xf32>
    %182 = vector.extract_strided_slice %177 {offsets = [2, 0, 0], sizes = [1, 8, 16], strides = [1, 1, 1]} : vector<4x8x16xf32> to vector<1x8x16xf32>
    %183 = vector.shape_cast %182 : vector<1x8x16xf32> to vector<8x16xf32>
    %184 = vector.extract_strided_slice %177 {offsets = [3, 0, 0], sizes = [1, 8, 16], strides = [1, 1, 1]} : vector<4x8x16xf32> to vector<1x8x16xf32>
    %185 = vector.shape_cast %184 : vector<1x8x16xf32> to vector<8x16xf32>
    %186 = tpu.concatenate %179, %181, %183, %185 in 1 : vector<8x16xf32>, vector<8x16xf32>, vector<8x16xf32>, vector<8x16xf32> -> vector<8x64xf32>
    %187 = arith.truncf %186 : vector<8x64xf32> to vector<8x64xbf16>
    %c0_57 = arith.constant 0 : index
    %c0_58 = arith.constant 0 : index
    %c0_59 = arith.constant 0 : index
    %188 = vector.load %arg4[%c0_57, %c0_58, %c0_59] : memref<2x64x64xbf16, #tpu.memory_space<vmem>>, vector<1x64x64xbf16>
    %189 = vector.shape_cast %188 : vector<1x64x64xbf16> to vector<64x64xbf16>
    %cst_60 = arith.constant dense<0.000000e+00> : vector<8x64xf32>
    %190 = tpu.matmul %187, %189, %cst_60 {dimension_numbers = #tpu.dot_dimension_numbers<[1], [0], [0], [1], [0, 0, 1, 1], [], []>} : vector<8x64xbf16>, vector<64x64xbf16>, vector<8x64xf32> -> vector<8x64xf32>
    %191 = arith.addf %117, %190 : vector<8x64xf32>
    %192 = vector.extract_strided_slice %7 {offsets = [2, 0], sizes = [1, 64], strides = [1, 1]} : vector<3x64xf32> to vector<1x64xf32>
    %193 = arith.mulf %191, %191 : vector<8x64xf32>
    %cst_61 = arith.constant dense<0.000000e+00> : vector<8xf32>
    %194 = vector.multi_reduction <add>, %193, %cst_61 [1] : vector<8x64xf32> to vector<8xf32>
    %195 = vector.shape_cast %194 : vector<8xf32> to vector<8x1xf32>
    %cst_62 = arith.constant 6.400000e+01 : f32
    %196 = vector.broadcast %cst_62 : f32 to vector<8x1xf32>
    %197 = arith.divf %195, %196 : vector<8x1xf32>
    %cst_63 = arith.constant 9.99999974E-6 : f32
    %198 = vector.broadcast %cst_63 : f32 to vector<8x1xf32>
    %199 = arith.addf %197, %198 : vector<8x1xf32>
    %200 = math.rsqrt %199 : vector<8x1xf32>
    %201 = vector.broadcast %200 : vector<8x1xf32> to vector<8x64xf32>
    %202 = arith.mulf %191, %201 : vector<8x64xf32>
    %203 = vector.broadcast %192 : vector<1x64xf32> to vector<8x64xf32>
    %204 = arith.mulf %202, %203 : vector<8x64xf32>
    %205 = arith.truncf %204 : vector<8x64xf32> to vector<8x64xbf16>
    %c0_64 = arith.constant 0 : index
    %c0_65 = arith.constant 0 : index
    %c0_66 = arith.constant 0 : index
    %206 = vector.load %arg5[%c0_64, %c0_65, %c0_66] : memref<2x64x256xbf16, #tpu.memory_space<vmem>>, vector<1x64x256xbf16>
    %207 = vector.shape_cast %206 : vector<1x64x256xbf16> to vector<64x256xbf16>
    %cst_67 = arith.constant dense<0.000000e+00> : vector<8x256xf32>
    %208 = tpu.matmul %205, %207, %cst_67 {dimension_numbers = #tpu.dot_dimension_numbers<[1], [0], [0], [1], [0, 0, 1, 1], [], []>} : vector<8x64xbf16>, vector<64x256xbf16>, vector<8x256xf32> -> vector<8x256xf32>
    %209 = vector.extract_strided_slice %208 {offsets = [0, 0], sizes = [8, 128], strides = [1, 1]} : vector<8x256xf32> to vector<8x128xf32>
    %210 = arith.negf %209 : vector<8x128xf32>
    %211 = math.exp %210 : vector<8x128xf32>
    %cst_68 = arith.constant 1.000000e+00 : f32
    %212 = vector.broadcast %cst_68 : f32 to vector<8x128xf32>
    %213 = arith.addf %212, %211 : vector<8x128xf32>
    %214 = arith.divf %212, %213 : vector<8x128xf32>
    %215 = arith.mulf %209, %214 : vector<8x128xf32>
    %216 = vector.extract_strided_slice %208 {offsets = [0, 128], sizes = [8, 128], strides = [1, 1]} : vector<8x256xf32> to vector<8x128xf32>
    %217 = arith.mulf %215, %216 : vector<8x128xf32>
    %218 = arith.truncf %217 : vector<8x128xf32> to vector<8x128xbf16>
    %c0_69 = arith.constant 0 : index
    %c0_70 = arith.constant 0 : index
    %c0_71 = arith.constant 0 : index
    %219 = vector.load %arg6[%c0_69, %c0_70, %c0_71] : memref<2x128x64xbf16, #tpu.memory_space<vmem>>, vector<1x128x64xbf16>
    %220 = vector.shape_cast %219 : vector<1x128x64xbf16> to vector<128x64xbf16>
    %cst_72 = arith.constant dense<0.000000e+00> : vector<8x64xf32>
    %221 = tpu.matmul %218, %220, %cst_72 {dimension_numbers = #tpu.dot_dimension_numbers<[1], [0], [0], [1], [0, 0, 1, 1], [], []>} : vector<8x128xbf16>, vector<128x64xbf16>, vector<8x64xf32> -> vector<8x64xf32>
    %222 = arith.addf %191, %221 : vector<8x64xf32>
    %c1 = arith.constant 1 : index
    %c0_73 = arith.constant 0 : index
    %c0_74 = arith.constant 0 : index
    %223 = vector.load %arg7[%c1, %c0_73, %c0_74] : memref<2x3x64xf32, #tpu.memory_space<vmem>>, vector<1x3x64xf32>
    %224 = vector.shape_cast %223 : vector<1x3x64xf32> to vector<3x64xf32>
    %225 = vector.extract_strided_slice %224 {offsets = [0, 0], sizes = [1, 64], strides = [1, 1]} : vector<3x64xf32> to vector<1x64xf32>
    %226 = arith.mulf %222, %222 : vector<8x64xf32>
    %cst_75 = arith.constant dense<0.000000e+00> : vector<8xf32>
    %227 = vector.multi_reduction <add>, %226, %cst_75 [1] : vector<8x64xf32> to vector<8xf32>
    %228 = vector.shape_cast %227 : vector<8xf32> to vector<8x1xf32>
    %cst_76 = arith.constant 6.400000e+01 : f32
    %229 = vector.broadcast %cst_76 : f32 to vector<8x1xf32>
    %230 = arith.divf %228, %229 : vector<8x1xf32>
    %cst_77 = arith.constant 9.99999974E-6 : f32
    %231 = vector.broadcast %cst_77 : f32 to vector<8x1xf32>
    %232 = arith.addf %230, %231 : vector<8x1xf32>
    %233 = math.rsqrt %232 : vector<8x1xf32>
    %234 = vector.broadcast %233 : vector<8x1xf32> to vector<8x64xf32>
    %235 = arith.mulf %222, %234 : vector<8x64xf32>
    %236 = vector.broadcast %225 : vector<1x64xf32> to vector<8x64xf32>
    %237 = arith.mulf %235, %236 : vector<8x64xf32>
    %238 = arith.truncf %237 : vector<8x64xf32> to vector<8x64xbf16>
    %c1_78 = arith.constant 1 : index
    %c0_79 = arith.constant 0 : index
    %c0_80 = arith.constant 0 : index
    %239 = vector.load %arg1[%c1_78, %c0_79, %c0_80] : memref<2x64x192xbf16, #tpu.memory_space<vmem>>, vector<1x64x192xbf16>
    %240 = vector.shape_cast %239 : vector<1x64x192xbf16> to vector<64x192xbf16>
    %cst_81 = arith.constant dense<0.000000e+00> : vector<8x192xf32>
    %241 = tpu.matmul %238, %240, %cst_81 {dimension_numbers = #tpu.dot_dimension_numbers<[1], [0], [0], [1], [0, 0, 1, 1], [], []>} : vector<8x64xbf16>, vector<64x192xbf16>, vector<8x192xf32> -> vector<8x192xf32>
    %242 = vector.extract_strided_slice %241 {offsets = [0, 0], sizes = [8, 64], strides = [1, 1]} : vector<8x192xf32> to vector<8x64xf32>
    %243 = vector.extract_strided_slice %242 {offsets = [0, 8], sizes = [8, 56], strides = [1, 1]} : vector<8x64xf32> to vector<8x56xf32>
    %244 = vector.extract_strided_slice %242 {offsets = [0, 0], sizes = [8, 8], strides = [1, 1]} : vector<8x64xf32> to vector<8x8xf32>
    %245 = tpu.concatenate %243, %244 in 1 : vector<8x56xf32>, vector<8x8xf32> -> vector<8x64xf32>
    %246 = vector.extract_strided_slice %242 {offsets = [0, 56], sizes = [8, 8], strides = [1, 1]} : vector<8x64xf32> to vector<8x8xf32>
    %247 = vector.extract_strided_slice %242 {offsets = [0, 0], sizes = [8, 56], strides = [1, 1]} : vector<8x64xf32> to vector<8x56xf32>
    %248 = tpu.concatenate %246, %247 in 1 : vector<8x8xf32>, vector<8x56xf32> -> vector<8x64xf32>
    %249 = arith.mulf %242, %1 : vector<8x64xf32>
    %250 = arith.mulf %245, %2 : vector<8x64xf32>
    %251 = arith.addf %249, %250 : vector<8x64xf32>
    %252 = arith.mulf %248, %3 : vector<8x64xf32>
    %253 = arith.addf %251, %252 : vector<8x64xf32>
    %254 = vector.extract_strided_slice %253 {offsets = [0, 0], sizes = [8, 16], strides = [1, 1]} : vector<8x64xf32> to vector<8x16xf32>
    %255 = vector.extract_strided_slice %253 {offsets = [0, 16], sizes = [8, 16], strides = [1, 1]} : vector<8x64xf32> to vector<8x16xf32>
    %256 = vector.extract_strided_slice %253 {offsets = [0, 32], sizes = [8, 16], strides = [1, 1]} : vector<8x64xf32> to vector<8x16xf32>
    %257 = vector.extract_strided_slice %253 {offsets = [0, 48], sizes = [8, 16], strides = [1, 1]} : vector<8x64xf32> to vector<8x16xf32>
    %258 = vector.shape_cast %254 : vector<8x16xf32> to vector<1x8x16xf32>
    %259 = vector.shape_cast %255 : vector<8x16xf32> to vector<1x8x16xf32>
    %260 = vector.shape_cast %256 : vector<8x16xf32> to vector<1x8x16xf32>
    %261 = vector.shape_cast %257 : vector<8x16xf32> to vector<1x8x16xf32>
    %262 = tpu.concatenate %258, %259, %260, %261 in 0 : vector<1x8x16xf32>, vector<1x8x16xf32>, vector<1x8x16xf32>, vector<1x8x16xf32> -> vector<4x8x16xf32>
    %263 = vector.extract_strided_slice %241 {offsets = [0, 64], sizes = [8, 64], strides = [1, 1]} : vector<8x192xf32> to vector<8x64xf32>
    %264 = vector.extract_strided_slice %263 {offsets = [0, 8], sizes = [8, 56], strides = [1, 1]} : vector<8x64xf32> to vector<8x56xf32>
    %265 = vector.extract_strided_slice %263 {offsets = [0, 0], sizes = [8, 8], strides = [1, 1]} : vector<8x64xf32> to vector<8x8xf32>
    %266 = tpu.concatenate %264, %265 in 1 : vector<8x56xf32>, vector<8x8xf32> -> vector<8x64xf32>
    %267 = vector.extract_strided_slice %263 {offsets = [0, 56], sizes = [8, 8], strides = [1, 1]} : vector<8x64xf32> to vector<8x8xf32>
    %268 = vector.extract_strided_slice %263 {offsets = [0, 0], sizes = [8, 56], strides = [1, 1]} : vector<8x64xf32> to vector<8x56xf32>
    %269 = tpu.concatenate %267, %268 in 1 : vector<8x8xf32>, vector<8x56xf32> -> vector<8x64xf32>
    %270 = arith.mulf %263, %1 : vector<8x64xf32>
    %271 = arith.mulf %266, %2 : vector<8x64xf32>
    %272 = arith.addf %270, %271 : vector<8x64xf32>
    %273 = arith.mulf %269, %3 : vector<8x64xf32>
    %274 = arith.addf %272, %273 : vector<8x64xf32>
    %275 = vector.extract_strided_slice %274 {offsets = [0, 0], sizes = [8, 16], strides = [1, 1]} : vector<8x64xf32> to vector<8x16xf32>
    %276 = vector.extract_strided_slice %274 {offsets = [0, 16], sizes = [8, 16], strides = [1, 1]} : vector<8x64xf32> to vector<8x16xf32>
    %277 = vector.extract_strided_slice %274 {offsets = [0, 32], sizes = [8, 16], strides = [1, 1]} : vector<8x64xf32> to vector<8x16xf32>
    %278 = vector.extract_strided_slice %274 {offsets = [0, 48], sizes = [8, 16], strides = [1, 1]} : vector<8x64xf32> to vector<8x16xf32>
    %279 = vector.shape_cast %275 : vector<8x16xf32> to vector<1x8x16xf32>
    %280 = vector.shape_cast %276 : vector<8x16xf32> to vector<1x8x16xf32>
    %281 = vector.shape_cast %277 : vector<8x16xf32> to vector<1x8x16xf32>
    %282 = vector.shape_cast %278 : vector<8x16xf32> to vector<1x8x16xf32>
    %283 = tpu.concatenate %279, %280, %281, %282 in 0 : vector<1x8x16xf32>, vector<1x8x16xf32>, vector<1x8x16xf32>, vector<1x8x16xf32> -> vector<4x8x16xf32>
    %284 = vector.extract_strided_slice %241 {offsets = [0, 128], sizes = [8, 64], strides = [1, 1]} : vector<8x192xf32> to vector<8x64xf32>
    %285 = vector.extract_strided_slice %284 {offsets = [0, 0], sizes = [8, 16], strides = [1, 1]} : vector<8x64xf32> to vector<8x16xf32>
    %286 = vector.extract_strided_slice %284 {offsets = [0, 16], sizes = [8, 16], strides = [1, 1]} : vector<8x64xf32> to vector<8x16xf32>
    %287 = vector.extract_strided_slice %284 {offsets = [0, 32], sizes = [8, 16], strides = [1, 1]} : vector<8x64xf32> to vector<8x16xf32>
    %288 = vector.extract_strided_slice %284 {offsets = [0, 48], sizes = [8, 16], strides = [1, 1]} : vector<8x64xf32> to vector<8x16xf32>
    %289 = vector.shape_cast %285 : vector<8x16xf32> to vector<1x8x16xf32>
    %290 = vector.shape_cast %286 : vector<8x16xf32> to vector<1x8x16xf32>
    %291 = vector.shape_cast %287 : vector<8x16xf32> to vector<1x8x16xf32>
    %292 = vector.shape_cast %288 : vector<8x16xf32> to vector<1x8x16xf32>
    %293 = tpu.concatenate %289, %290, %291, %292 in 0 : vector<1x8x16xf32>, vector<1x8x16xf32>, vector<1x8x16xf32>, vector<1x8x16xf32> -> vector<4x8x16xf32>
    %c1_82 = arith.constant 1 : index
    %c0_83 = arith.constant 0 : index
    %c0_84 = arith.constant 0 : index
    %c0_85 = arith.constant 0 : index
    %294 = vector.load %arg8[%c1_82, %c0_83, %c0_84, %c0_85] : memref<2x4x8x16xf32, #tpu.memory_space<vmem>>, vector<1x4x8x16xf32>
    %295 = vector.shape_cast %294 : vector<1x4x8x16xf32> to vector<4x8x16xf32>
    %296 = tpu.concatenate %295, %283 in 1 : vector<4x8x16xf32>, vector<4x8x16xf32> -> vector<4x16x16xf32>
    %297 = arith.truncf %296 : vector<4x16x16xf32> to vector<4x16x16xbf16>
    %c1_86 = arith.constant 1 : index
    %c0_87 = arith.constant 0 : index
    %c0_88 = arith.constant 0 : index
    %c0_89 = arith.constant 0 : index
    %298 = vector.load %arg9[%c1_86, %c0_87, %c0_88, %c0_89] : memref<2x4x8x16xf32, #tpu.memory_space<vmem>>, vector<1x4x8x16xf32>
    %299 = vector.shape_cast %298 : vector<1x4x8x16xf32> to vector<4x8x16xf32>
    %300 = tpu.concatenate %299, %293 in 1 : vector<4x8x16xf32>, vector<4x8x16xf32> -> vector<4x16x16xf32>
    %301 = arith.truncf %300 : vector<4x16x16xf32> to vector<4x16x16xbf16>
    %302 = arith.truncf %262 : vector<4x8x16xf32> to vector<4x8x16xbf16>
    "tpu.trace_start"() <{level = 10 : i32, message = "hqd,hkd->hqk"}> : () -> ()
    %cst_90 = arith.constant dense<0.000000e+00> : vector<4x8x16xf32>
    %303 = tpu.matmul %302, %297, %cst_90 {dimension_numbers = #tpu.dot_dimension_numbers<[2], [2], [1], [1], [0, 0, 0, 1, 1, 1], [0], [0]>} : vector<4x8x16xbf16>, vector<4x16x16xbf16>, vector<4x8x16xf32> -> vector<4x8x16xf32>
    "tpu.trace_stop"() : () -> ()
    %cst_91 = arith.constant 2.500000e-01 : f32
    %304 = vector.broadcast %cst_91 : f32 to vector<4x8x16xf32>
    %305 = arith.mulf %303, %304 : vector<4x8x16xf32>
    %306 = vector.shape_cast %4 : vector<8x16xf32> to vector<1x8x16xf32>
    %307 = vector.broadcast %306 : vector<1x8x16xf32> to vector<4x8x16xf32>
    %308 = arith.addf %305, %307 : vector<4x8x16xf32>
    %cst_92 = arith.constant dense<0xFF800000> : vector<4x8xf32>
    %309 = vector.multi_reduction <maximumf>, %308, %cst_92 [2] : vector<4x8x16xf32> to vector<4x8xf32>
    %310 = vector.shape_cast %309 : vector<4x8xf32> to vector<4x8x1xf32>
    %311 = vector.broadcast %310 : vector<4x8x1xf32> to vector<4x8x16xf32>
    %312 = arith.subf %308, %311 : vector<4x8x16xf32>
    %313 = math.exp %312 : vector<4x8x16xf32>
    %cst_93 = arith.constant dense<0.000000e+00> : vector<4x8xf32>
    %314 = vector.multi_reduction <add>, %313, %cst_93 [2] : vector<4x8x16xf32> to vector<4x8xf32>
    %315 = vector.shape_cast %314 : vector<4x8xf32> to vector<4x8x1xf32>
    %316 = arith.truncf %313 : vector<4x8x16xf32> to vector<4x8x16xbf16>
    "tpu.trace_start"() <{level = 10 : i32, message = "hqk,hkd->hqd"}> : () -> ()
    %cst_94 = arith.constant dense<0.000000e+00> : vector<4x8x16xf32>
    %317 = tpu.matmul %316, %301, %cst_94 {dimension_numbers = #tpu.dot_dimension_numbers<[2], [1], [1], [2], [0, 0, 0, 1, 1, 2], [0], [0]>} : vector<4x8x16xbf16>, vector<4x16x16xbf16>, vector<4x8x16xf32> -> vector<4x8x16xf32>
    "tpu.trace_stop"() : () -> ()
    %318 = tpu.reciprocal %315 {approx = true} : vector<4x8x1xf32> -> vector<4x8x1xf32>
    %319 = vector.broadcast %318 : vector<4x8x1xf32> to vector<4x8x16xf32>
    %320 = arith.mulf %317, %319 : vector<4x8x16xf32>
    %321 = vector.extract_strided_slice %320 {offsets = [0, 0, 0], sizes = [1, 8, 16], strides = [1, 1, 1]} : vector<4x8x16xf32> to vector<1x8x16xf32>
    %322 = vector.shape_cast %321 : vector<1x8x16xf32> to vector<8x16xf32>
    %323 = vector.extract_strided_slice %320 {offsets = [1, 0, 0], sizes = [1, 8, 16], strides = [1, 1, 1]} : vector<4x8x16xf32> to vector<1x8x16xf32>
    %324 = vector.shape_cast %323 : vector<1x8x16xf32> to vector<8x16xf32>
    %325 = vector.extract_strided_slice %320 {offsets = [2, 0, 0], sizes = [1, 8, 16], strides = [1, 1, 1]} : vector<4x8x16xf32> to vector<1x8x16xf32>
    %326 = vector.shape_cast %325 : vector<1x8x16xf32> to vector<8x16xf32>
    %327 = vector.extract_strided_slice %320 {offsets = [3, 0, 0], sizes = [1, 8, 16], strides = [1, 1, 1]} : vector<4x8x16xf32> to vector<1x8x16xf32>
    %328 = vector.shape_cast %327 : vector<1x8x16xf32> to vector<8x16xf32>
    %329 = tpu.concatenate %322, %324, %326, %328 in 1 : vector<8x16xf32>, vector<8x16xf32>, vector<8x16xf32>, vector<8x16xf32> -> vector<8x64xf32>
    %330 = arith.truncf %329 : vector<8x64xf32> to vector<8x64xbf16>
    %c1_95 = arith.constant 1 : index
    %c0_96 = arith.constant 0 : index
    %c0_97 = arith.constant 0 : index
    %331 = vector.load %arg2[%c1_95, %c0_96, %c0_97] : memref<2x64x64xbf16, #tpu.memory_space<vmem>>, vector<1x64x64xbf16>
    %332 = vector.shape_cast %331 : vector<1x64x64xbf16> to vector<64x64xbf16>
    %cst_98 = arith.constant dense<0.000000e+00> : vector<8x64xf32>
    %333 = tpu.matmul %330, %332, %cst_98 {dimension_numbers = #tpu.dot_dimension_numbers<[1], [0], [0], [1], [0, 0, 1, 1], [], []>} : vector<8x64xbf16>, vector<64x64xbf16>, vector<8x64xf32> -> vector<8x64xf32>
    %334 = arith.addf %222, %333 : vector<8x64xf32>
    %335 = vector.extract_strided_slice %224 {offsets = [1, 0], sizes = [1, 64], strides = [1, 1]} : vector<3x64xf32> to vector<1x64xf32>
    %336 = arith.mulf %334, %334 : vector<8x64xf32>
    %cst_99 = arith.constant dense<0.000000e+00> : vector<8xf32>
    %337 = vector.multi_reduction <add>, %336, %cst_99 [1] : vector<8x64xf32> to vector<8xf32>
    %338 = vector.shape_cast %337 : vector<8xf32> to vector<8x1xf32>
    %cst_100 = arith.constant 6.400000e+01 : f32
    %339 = vector.broadcast %cst_100 : f32 to vector<8x1xf32>
    %340 = arith.divf %338, %339 : vector<8x1xf32>
    %cst_101 = arith.constant 9.99999974E-6 : f32
    %341 = vector.broadcast %cst_101 : f32 to vector<8x1xf32>
    %342 = arith.addf %340, %341 : vector<8x1xf32>
    %343 = math.rsqrt %342 : vector<8x1xf32>
    %344 = vector.broadcast %343 : vector<8x1xf32> to vector<8x64xf32>
    %345 = arith.mulf %334, %344 : vector<8x64xf32>
    %346 = vector.broadcast %335 : vector<1x64xf32> to vector<8x64xf32>
    %347 = arith.mulf %345, %346 : vector<8x64xf32>
    %348 = arith.truncf %347 : vector<8x64xf32> to vector<8x64xbf16>
    %c1_102 = arith.constant 1 : index
    %c0_103 = arith.constant 0 : index
    %c0_104 = arith.constant 0 : index
    %349 = vector.load %arg3[%c1_102, %c0_103, %c0_104] : memref<2x64x64xbf16, #tpu.memory_space<vmem>>, vector<1x64x64xbf16>
    %350 = vector.shape_cast %349 : vector<1x64x64xbf16> to vector<64x64xbf16>
    %cst_105 = arith.constant dense<0.000000e+00> : vector<8x64xf32>
    %351 = tpu.matmul %348, %350, %cst_105 {dimension_numbers = #tpu.dot_dimension_numbers<[1], [0], [0], [1], [0, 0, 1, 1], [], []>} : vector<8x64xbf16>, vector<64x64xbf16>, vector<8x64xf32> -> vector<8x64xf32>
    %352 = vector.extract_strided_slice %351 {offsets = [0, 8], sizes = [8, 56], strides = [1, 1]} : vector<8x64xf32> to vector<8x56xf32>
    %353 = vector.extract_strided_slice %351 {offsets = [0, 0], sizes = [8, 8], strides = [1, 1]} : vector<8x64xf32> to vector<8x8xf32>
    %354 = tpu.concatenate %352, %353 in 1 : vector<8x56xf32>, vector<8x8xf32> -> vector<8x64xf32>
    %355 = vector.extract_strided_slice %351 {offsets = [0, 56], sizes = [8, 8], strides = [1, 1]} : vector<8x64xf32> to vector<8x8xf32>
    %356 = vector.extract_strided_slice %351 {offsets = [0, 0], sizes = [8, 56], strides = [1, 1]} : vector<8x64xf32> to vector<8x56xf32>
    %357 = tpu.concatenate %355, %356 in 1 : vector<8x8xf32>, vector<8x56xf32> -> vector<8x64xf32>
    %358 = arith.mulf %351, %1 : vector<8x64xf32>
    %359 = arith.mulf %354, %2 : vector<8x64xf32>
    %360 = arith.addf %358, %359 : vector<8x64xf32>
    %361 = arith.mulf %357, %3 : vector<8x64xf32>
    %362 = arith.addf %360, %361 : vector<8x64xf32>
    %363 = vector.extract_strided_slice %362 {offsets = [0, 0], sizes = [8, 16], strides = [1, 1]} : vector<8x64xf32> to vector<8x16xf32>
    %364 = vector.extract_strided_slice %362 {offsets = [0, 16], sizes = [8, 16], strides = [1, 1]} : vector<8x64xf32> to vector<8x16xf32>
    %365 = vector.extract_strided_slice %362 {offsets = [0, 32], sizes = [8, 16], strides = [1, 1]} : vector<8x64xf32> to vector<8x16xf32>
    %366 = vector.extract_strided_slice %362 {offsets = [0, 48], sizes = [8, 16], strides = [1, 1]} : vector<8x64xf32> to vector<8x16xf32>
    %367 = vector.shape_cast %363 : vector<8x16xf32> to vector<1x8x16xf32>
    %368 = vector.shape_cast %364 : vector<8x16xf32> to vector<1x8x16xf32>
    %369 = vector.shape_cast %365 : vector<8x16xf32> to vector<1x8x16xf32>
    %370 = vector.shape_cast %366 : vector<8x16xf32> to vector<1x8x16xf32>
    %371 = tpu.concatenate %367, %368, %369, %370 in 0 : vector<1x8x16xf32>, vector<1x8x16xf32>, vector<1x8x16xf32>, vector<1x8x16xf32> -> vector<4x8x16xf32>
    %c1_106 = arith.constant 1 : index
    %c0_107 = arith.constant 0 : index
    %c0_108 = arith.constant 0 : index
    %c0_109 = arith.constant 0 : index
    %372 = vector.load %arg10[%c1_106, %c0_107, %c0_108, %c0_109] : memref<2x4x16x16xbf16, #tpu.memory_space<vmem>>, vector<1x4x16x16xbf16>
    %373 = vector.shape_cast %372 : vector<1x4x16x16xbf16> to vector<4x16x16xbf16>
    %c1_110 = arith.constant 1 : index
    %c0_111 = arith.constant 0 : index
    %c0_112 = arith.constant 0 : index
    %c0_113 = arith.constant 0 : index
    %374 = vector.load %arg11[%c1_110, %c0_111, %c0_112, %c0_113] : memref<2x4x16x16xbf16, #tpu.memory_space<vmem>>, vector<1x4x16x16xbf16>
    %375 = vector.shape_cast %374 : vector<1x4x16x16xbf16> to vector<4x16x16xbf16>
    %376 = arith.truncf %371 : vector<4x8x16xf32> to vector<4x8x16xbf16>
    "tpu.trace_start"() <{level = 10 : i32, message = "hqd,hkd->hqk"}> : () -> ()
    %cst_114 = arith.constant dense<0.000000e+00> : vector<4x8x16xf32>
    %377 = tpu.matmul %376, %373, %cst_114 {dimension_numbers = #tpu.dot_dimension_numbers<[2], [2], [1], [1], [0, 0, 0, 1, 1, 1], [0], [0]>} : vector<4x8x16xbf16>, vector<4x16x16xbf16>, vector<4x8x16xf32> -> vector<4x8x16xf32>
    "tpu.trace_stop"() : () -> ()
    %cst_115 = arith.constant 2.500000e-01 : f32
    %378 = vector.broadcast %cst_115 : f32 to vector<4x8x16xf32>
    %379 = arith.mulf %377, %378 : vector<4x8x16xf32>
    %380 = vector.shape_cast %5 : vector<8x16xf32> to vector<1x8x16xf32>
    %381 = vector.broadcast %380 : vector<1x8x16xf32> to vector<4x8x16xf32>
    %382 = arith.addf %379, %381 : vector<4x8x16xf32>
    %cst_116 = arith.constant dense<0xFF800000> : vector<4x8xf32>
    %383 = vector.multi_reduction <maximumf>, %382, %cst_116 [2] : vector<4x8x16xf32> to vector<4x8xf32>
    %384 = vector.shape_cast %383 : vector<4x8xf32> to vector<4x8x1xf32>
    %385 = vector.broadcast %384 : vector<4x8x1xf32> to vector<4x8x16xf32>
    %386 = arith.subf %382, %385 : vector<4x8x16xf32>
    %387 = math.exp %386 : vector<4x8x16xf32>
    %cst_117 = arith.constant dense<0.000000e+00> : vector<4x8xf32>
    %388 = vector.multi_reduction <add>, %387, %cst_117 [2] : vector<4x8x16xf32> to vector<4x8xf32>
    %389 = vector.shape_cast %388 : vector<4x8xf32> to vector<4x8x1xf32>
    %390 = arith.truncf %387 : vector<4x8x16xf32> to vector<4x8x16xbf16>
    "tpu.trace_start"() <{level = 10 : i32, message = "hqk,hkd->hqd"}> : () -> ()
    %cst_118 = arith.constant dense<0.000000e+00> : vector<4x8x16xf32>
    %391 = tpu.matmul %390, %375, %cst_118 {dimension_numbers = #tpu.dot_dimension_numbers<[2], [1], [1], [2], [0, 0, 0, 1, 1, 2], [0], [0]>} : vector<4x8x16xbf16>, vector<4x16x16xbf16>, vector<4x8x16xf32> -> vector<4x8x16xf32>
    "tpu.trace_stop"() : () -> ()
    %392 = tpu.reciprocal %389 {approx = true} : vector<4x8x1xf32> -> vector<4x8x1xf32>
    %393 = vector.broadcast %392 : vector<4x8x1xf32> to vector<4x8x16xf32>
    %394 = arith.mulf %391, %393 : vector<4x8x16xf32>
    %395 = vector.extract_strided_slice %394 {offsets = [0, 0, 0], sizes = [1, 8, 16], strides = [1, 1, 1]} : vector<4x8x16xf32> to vector<1x8x16xf32>
    %396 = vector.shape_cast %395 : vector<1x8x16xf32> to vector<8x16xf32>
    %397 = vector.extract_strided_slice %394 {offsets = [1, 0, 0], sizes = [1, 8, 16], strides = [1, 1, 1]} : vector<4x8x16xf32> to vector<1x8x16xf32>
    %398 = vector.shape_cast %397 : vector<1x8x16xf32> to vector<8x16xf32>
    %399 = vector.extract_strided_slice %394 {offsets = [2, 0, 0], sizes = [1, 8, 16], strides = [1, 1, 1]} : vector<4x8x16xf32> to vector<1x8x16xf32>
    %400 = vector.shape_cast %399 : vector<1x8x16xf32> to vector<8x16xf32>
    %401 = vector.extract_strided_slice %394 {offsets = [3, 0, 0], sizes = [1, 8, 16], strides = [1, 1, 1]} : vector<4x8x16xf32> to vector<1x8x16xf32>
    %402 = vector.shape_cast %401 : vector<1x8x16xf32> to vector<8x16xf32>
    %403 = tpu.concatenate %396, %398, %400, %402 in 1 : vector<8x16xf32>, vector<8x16xf32>, vector<8x16xf32>, vector<8x16xf32> -> vector<8x64xf32>
    %404 = arith.truncf %403 : vector<8x64xf32> to vector<8x64xbf16>
    %c1_119 = arith.constant 1 : index
    %c0_120 = arith.constant 0 : index
    %c0_121 = arith.constant 0 : index
    %405 = vector.load %arg4[%c1_119, %c0_120, %c0_121] : memref<2x64x64xbf16, #tpu.memory_space<vmem>>, vector<1x64x64xbf16>
    %406 = vector.shape_cast %405 : vector<1x64x64xbf16> to vector<64x64xbf16>
    %cst_122 = arith.constant dense<0.000000e+00> : vector<8x64xf32>
    %407 = tpu.matmul %404, %406, %cst_122 {dimension_numbers = #tpu.dot_dimension_numbers<[1], [0], [0], [1], [0, 0, 1, 1], [], []>} : vector<8x64xbf16>, vector<64x64xbf16>, vector<8x64xf32> -> vector<8x64xf32>
    %408 = arith.addf %334, %407 : vector<8x64xf32>
    %409 = vector.extract_strided_slice %224 {offsets = [2, 0], sizes = [1, 64], strides = [1, 1]} : vector<3x64xf32> to vector<1x64xf32>
    %410 = arith.mulf %408, %408 : vector<8x64xf32>
    %cst_123 = arith.constant dense<0.000000e+00> : vector<8xf32>
    %411 = vector.multi_reduction <add>, %410, %cst_123 [1] : vector<8x64xf32> to vector<8xf32>
    %412 = vector.shape_cast %411 : vector<8xf32> to vector<8x1xf32>
    %cst_124 = arith.constant 6.400000e+01 : f32
    %413 = vector.broadcast %cst_124 : f32 to vector<8x1xf32>
    %414 = arith.divf %412, %413 : vector<8x1xf32>
    %cst_125 = arith.constant 9.99999974E-6 : f32
    %415 = vector.broadcast %cst_125 : f32 to vector<8x1xf32>
    %416 = arith.addf %414, %415 : vector<8x1xf32>
    %417 = math.rsqrt %416 : vector<8x1xf32>
    %418 = vector.broadcast %417 : vector<8x1xf32> to vector<8x64xf32>
    %419 = arith.mulf %408, %418 : vector<8x64xf32>
    %420 = vector.broadcast %409 : vector<1x64xf32> to vector<8x64xf32>
    %421 = arith.mulf %419, %420 : vector<8x64xf32>
    %422 = arith.truncf %421 : vector<8x64xf32> to vector<8x64xbf16>
    %c1_126 = arith.constant 1 : index
    %c0_127 = arith.constant 0 : index
    %c0_128 = arith.constant 0 : index
    %423 = vector.load %arg5[%c1_126, %c0_127, %c0_128] : memref<2x64x256xbf16, #tpu.memory_space<vmem>>, vector<1x64x256xbf16>
    %424 = vector.shape_cast %423 : vector<1x64x256xbf16> to vector<64x256xbf16>
    %cst_129 = arith.constant dense<0.000000e+00> : vector<8x256xf32>
    %425 = tpu.matmul %422, %424, %cst_129 {dimension_numbers = #tpu.dot_dimension_numbers<[1], [0], [0], [1], [0, 0, 1, 1], [], []>} : vector<8x64xbf16>, vector<64x256xbf16>, vector<8x256xf32> -> vector<8x256xf32>
    %426 = vector.extract_strided_slice %425 {offsets = [0, 0], sizes = [8, 128], strides = [1, 1]} : vector<8x256xf32> to vector<8x128xf32>
    %427 = arith.negf %426 : vector<8x128xf32>
    %428 = math.exp %427 : vector<8x128xf32>
    %cst_130 = arith.constant 1.000000e+00 : f32
    %429 = vector.broadcast %cst_130 : f32 to vector<8x128xf32>
    %430 = arith.addf %429, %428 : vector<8x128xf32>
    %431 = arith.divf %429, %430 : vector<8x128xf32>
    %432 = arith.mulf %426, %431 : vector<8x128xf32>
    %433 = vector.extract_strided_slice %425 {offsets = [0, 128], sizes = [8, 128], strides = [1, 1]} : vector<8x256xf32> to vector<8x128xf32>
    %434 = arith.mulf %432, %433 : vector<8x128xf32>
    %435 = arith.truncf %434 : vector<8x128xf32> to vector<8x128xbf16>
    %c1_131 = arith.constant 1 : index
    %c0_132 = arith.constant 0 : index
    %c0_133 = arith.constant 0 : index
    %436 = vector.load %arg6[%c1_131, %c0_132, %c0_133] : memref<2x128x64xbf16, #tpu.memory_space<vmem>>, vector<1x128x64xbf16>
    %437 = vector.shape_cast %436 : vector<1x128x64xbf16> to vector<128x64xbf16>
    %cst_134 = arith.constant dense<0.000000e+00> : vector<8x64xf32>
    %438 = tpu.matmul %435, %437, %cst_134 {dimension_numbers = #tpu.dot_dimension_numbers<[1], [0], [0], [1], [0, 0, 1, 1], [], []>} : vector<8x128xbf16>, vector<128x64xbf16>, vector<8x64xf32> -> vector<8x64xf32>
    %439 = arith.addf %408, %438 : vector<8x64xf32>
    %c0_135 = arith.constant 0 : index
    %c0_136 = arith.constant 0 : index
    %440 = vector.load %arg17[%c0_135, %c0_136] : memref<1x64xf32, #tpu.memory_space<vmem>>, vector<1x64xf32>
    %441 = arith.mulf %439, %439 : vector<8x64xf32>
    %cst_137 = arith.constant dense<0.000000e+00> : vector<8xf32>
    %442 = vector.multi_reduction <add>, %441, %cst_137 [1] : vector<8x64xf32> to vector<8xf32>
    %443 = vector.shape_cast %442 : vector<8xf32> to vector<8x1xf32>
    %cst_138 = arith.constant 6.400000e+01 : f32
    %444 = vector.broadcast %cst_138 : f32 to vector<8x1xf32>
    %445 = arith.divf %443, %444 : vector<8x1xf32>
    %cst_139 = arith.constant 9.99999974E-6 : f32
    %446 = vector.broadcast %cst_139 : f32 to vector<8x1xf32>
    %447 = arith.addf %445, %446 : vector<8x1xf32>
    %448 = math.rsqrt %447 : vector<8x1xf32>
    %449 = vector.broadcast %448 : vector<8x1xf32> to vector<8x64xf32>
    %450 = arith.mulf %439, %449 : vector<8x64xf32>
    %451 = vector.broadcast %440 : vector<1x64xf32> to vector<8x64xf32>
    %452 = arith.mulf %450, %451 : vector<8x64xf32>
    %453 = arith.truncf %452 : vector<8x64xf32> to vector<8x64xbf16>
    %c0_140 = arith.constant 0 : index
    %c0_141 = arith.constant 0 : index
    %454 = vector.load %arg18[%c0_140, %c0_141] : memref<64x128xbf16, #tpu.memory_space<vmem>>, vector<64x128xbf16>
    %cst_142 = arith.constant dense<0.000000e+00> : vector<8x128xf32>
    %455 = tpu.matmul %453, %454, %cst_142 {dimension_numbers = #tpu.dot_dimension_numbers<[1], [0], [0], [1], [0, 0, 1, 1], [], []>} : vector<8x64xbf16>, vector<64x128xbf16>, vector<8x128xf32> -> vector<8x128xf32>
    %c0_143 = arith.constant 0 : index
    %c0_144 = arith.constant 0 : index
    %456 = vector.load %arg19[%c0_143, %c0_144] : memref<8x128xf32, #tpu.memory_space<vmem>>, vector<8x128xf32>
    tpu.vector_store %arg19[%c0_143, %c0_144], %455 {strides = array<i32>} : memref<8x128xf32, #tpu.memory_space<vmem>>, vector<8x128xf32>,
    return
  }
}

</mosaic_0001>

<bundles_post_ra>
// kernel: mul.8
= control target key start
LH: loop header
LB: loop body
LE: loop exit
PB: predicated region body
PF: predicated region fallthrough
CT: control target
= control target key end

     0   :  { %vm7_vm0 = vcmask 31744   ;;  %vm13_vm1 = vcmask 64544   ;;  %s39_s0 = inlined_call_operand.vmem [shape: f32[2,4], index: 0, kind: input, shape index: {}]   ;;  %s40_s1 = inlined_call_operand.vmem [shape: f32[8], index: 1, kind: output, shape index: {}]  }
   0x1   :  { %v4_v0 = vld [vmem:[%s39_s0] sm:$0x3]  ;;  %s22_s0 = smov 4  }
   0x2   :  { %5 = vst [vmem:[#allocation1] sm:$0x3] %v4_v0 }
   0x9   :  { %v10_v1 = vld [vmem:[#allocation1 + $0x1] sm:$0x1]   ;;  %v6_v2 = vld [vmem:[#allocation1] sm:$0x1]  }
   0xa   :  { %11 = vrot.lane.b32.xlu0 %v10_v1, %s22_s0  ;;  %8 = vst.msk [vmem:[#allocation0] sm:$0x1] %vm7_vm0, %v6_v2  }
  0x7c   :  { %v12_v3 = vpop.permute.xlu0 %11  }
  0x7d   :  { %14 = vst.msk [vmem:[#allocation0] sm:$0x1] %vm13_vm1, %v12_v3  }
  0x84   :  { %v18_v4 = vld [vmem:[#allocation0] sm:$0x1] }
  0x85   :  { %20 = vst [vmem:[%s40_s1] sm:$0x1] %v18_v4 }

// kernel: tile.23
= control target key start
LH: loop header
LB: loop body
LE: loop exit
PB: predicated region body
PF: predicated region fallthrough
CT: control target
= control target key end

     0   :  { %vm42_vm0 = vcmask 1047556   ;;  %vm44_vm1 = vcmask 130048   ;;  %s93_s22 = smov 16   ;;  %s94_s25 = smov 32   ;;  %vm54_vm2 = vcmask 523648   ;;  %vm64_vm3 = vcmask 392448   ;;  %s146_s0 = inlined_call_operand.vmem [shape: f32[8,4,16], index: 0, kind: input, shape index: {}]   ;;  %s147_s1 = inlined_call_operand.vmem [shape: f32[8,64], index: 1, kind: output, shape index: {}]  }
   0x1   :  { %v82_v0 = vld [vmem:[%s146_s0 + $0x1c] sm:$0xf]  ;;  %v83_v1 = vld [vmem:[%s146_s0 + $0x18] sm:$0xf]  ;;  %v84_v2 = vld [vmem:[%s146_s0 + $0x14] sm:$0xf] }
   0x2   :  { %8 = vst [vmem:[#allocation0 + $0x38] sm:$0xf] %v82_v0  ;;  %13 = vst [vmem:[#allocation0 + $0x30] sm:$0xf] %v83_v1  ;;  %v85_v3 = vld [vmem:[%s146_s0 + $0x10] sm:$0xf] }
   0x3   :  { %18 = vst [vmem:[#allocation0 + $0x28] sm:$0xf] %v84_v2  ;;  %v86_v4 = vld [vmem:[%s146_s0 + $0xc] sm:$0xf]  ;;  %v87_v5 = vld [vmem:[%s146_s0 + $0x8] sm:$0xf] }
   0x4   :  { %23 = vst [vmem:[#allocation0 + $0x20] sm:$0xf] %v85_v3  ;;  %28 = vst [vmem:[#allocation0 + $0x18] sm:$0xf] %v86_v4  ;;  %v88_v6 = vld [vmem:[%s146_s0 + $0x4] sm:$0xf] }
   0x5   :  { %33 = vst [vmem:[#allocation0 + $0x10] sm:$0xf] %v87_v5  ;;  %v38_v7 = vld [vmem:[%s146_s0] sm:$0xf]  ;;  %37 = vst [vmem:[#allocation0 + $0x8] sm:$0xf] %v88_v6 }
   0x6   :  { %39 = vst [vmem:[#allocation0] sm:$0xf] %v38_v7  ;;  %s92_s0 = smov 48   ;;  %vm74_vm4 = vcmask 261248  }
   0xb   :  { %v49_v8 = vld [vmem:[#allocation0 + $0x3] ss:$8 sm:$0xf0]   ;;  %v59_v9 = vld [vmem:[#allocation0 + $0x2] ss:$8 sm:$0xf0]  }
   0xc   :  { %v69_v14 = vld [vmem:[#allocation0 + $0x1] ss:$8 sm:$0xf0]   ;;  %v41_v17 = vld [vmem:[#allocation0] ss:$8 sm:$0xf0]  }
   0xd   :  { %v47_v10 = vld [vmem:[#allocation0 + $0x3] ss:$8 sm:$0xf]   ;;  %v57_v11 = vld [vmem:[#allocation0 + $0x2] ss:$8 sm:$0xf]  }
   0xe   :  { %v51_v12 = vsel %vm42_vm0, %v49_v8, %v47_v10  ;;  %v67_v13 = vld [vmem:[#allocation0 + $0x1] ss:$8 sm:$0xf]   ;;  %v40_v16 = vld [vmem:[#allocation0] ss:$8 sm:$0xf]   ;;  %v61_v18 = vsel %vm42_vm0, %v59_v9, %v57_v11 }
   0xf   :  { %52 = vrot.lane.b32.xlu0 %v51_v12, %s92_s0  ;;  %v71_v15 = vsel %vm42_vm0, %v69_v14, %v67_v13  ;;  %v43_v19 = vsel %vm42_vm0, %v41_v17, %v40_v16 }
  0x10   :  { %72 = vrot.lane.b32.xlu1 %v71_v15, %s93_s22  ;;  %45 = vst.msk [vmem:[%s147_s1] sm:$0xff] %vm44_vm1, %v43_v19  }
  0x13   :  { %62 = vrot.lane.b32.xlu0 %v61_v18, %s94_s25 }
  0x81   :  { %v53_v20 = vpop.permute.xlu0 %52  }
  0x82   :  { %55 = vst.msk [vmem:[%s147_s1] sm:$0xff] %vm54_vm2, %v53_v20   ;;  %v73_v21 = vpop.permute.xlu1 %72  }
  0x85   :  { %v63_v22 = vpop.permute.xlu0 %62  }
  0x86   :  { %65 = vst.msk [vmem:[%s147_s1] sm:$0xff] %vm64_vm3, %v63_v22  }
  0x87   :  { %75 = vst.msk [vmem:[%s147_s1] sm:$0xff] %vm74_vm4, %v73_v21  }

// kernel: decoder_forward.1
= control target key start
LH: loop header
LB: loop body
LE: loop exit
PB: predicated region body
PF: predicated region fallthrough
CT: control target
= control target key end

     0   :  { %vm71_vm0 = vcmask 523264   ;;  %v4283_v6 = vmov 0   ;;  %v80_v14 = vlaneseq  ;;  %v4284_v24 = vmov 0.0   ;;  %s5267_s27 = smov 56   ;;  %s5265_s28 = smov 120   ;;  %s5224_s0 = inlined_call_operand.vmem [shape: f32[8,64], index: 0, kind: input, shape index: {}]   ;;  %s5225_s1 = inlined_call_operand.vmem [shape: bf16[2,64,192], index: 1, kind: input, shape index: {}]   ;;  %s5226_s7 = inlined_call_operand.vmem [shape: f32[2,3,64], index: 7, kind: input, shape index: {}]   ;;  %s5227_s9 = inlined_call_operand.vmem [shape: f32[2,4,8,16], index: 9, kind: input, shape index: {}]   ;;  %s5228_s12 = inlined_call_operand.vmem [shape: f32[8,64], index: 12, kind: input, shape index: {}]   ;;  %s5229_s13 = inlined_call_operand.vmem [shape: f32[8,64], index: 13, kind: input, shape index: {}]   ;;  %s5230_s14 = inlined_call_operand.vmem [shape: f32[8,64], index: 14, kind: input, shape index: {}]   ;;  %s5231_s8 = inlined_call_operand.vmem [shape: f32[2,4,8,16], index: 8, kind: input, shape index: {}]   ;;  %s5232_s15 = inlined_call_operand.vmem [shape: f32[8,16], index: 15, kind: input, shape index: {}]   ;;  %s5233_s2 = inlined_call_operand.vmem [shape: bf16[2,64,64], index: 2, kind: input, shape index: {}]   ;;  %s5234_s3 = inlined_call_operand.vmem [shape: bf16[2,64,64], index: 3, kind: input, shape index: {}]   ;;  %s5235_s10 = inlined_call_operand.vmem [shape: bf16[2,4,16,16], index: 10, kind: input, shape index: {}]   ;;  %s5236_s16 = inlined_call_operand.vmem [shape: f32[8,16], index: 16, kind: input, shape index: {}]   ;;  %s5237_s11 = inlined_call_operand.vmem [shape: bf16[2,4,16,16], index: 11, kind: input, shape index: {}]   ;;  %s5238_s4 = inlined_call_operand.vmem [shape: bf16[2,64,64], index: 4, kind: input, shape index: {}]   ;;  %s5239_s5 = inlined_call_operand.vmem [shape: bf16[2,64,256], index: 5, kind: input, shape index: {}]   ;;  %s5240_s6 = inlined_call_operand.vmem [shape: bf16[2,128,64], index: 6, kind: input, shape index: {}]   ;;  %s5241_s18 = inlined_call_operand.vmem [shape: bf16[64,128], index: 18, kind: input, shape index: {}]   ;;  %s5242_s17 = inlined_call_operand.vmem [shape: f32[1,64], index: 17, kind: input, shape index: {}]   ;;  %s5243_s19 = inlined_call_operand.vmem [shape: f32[8,128], index: 19, kind: output, shape index: {}]  }
   0x1   :  { %5272 = sst [smem:[#allocation2_spill]] %s5224_s0  ;;  %169 = vmatprep.mubr.bf16.mxu0 %v4283_v6  ;;  %3748 = vmatprep.subr.bf16.mxu1 %v4284_v24  ;;  %s5261_s29 = smov 72   ;;  %v4459_v31 = vld [vmem:[%s5228_s12] sm:$0xff]  ;;  %vm185_vm1 = vcmask 457728   ;;  %vm193_vm2 = vcmask 64512   ;;  %vm4292_vm3 = vmmov 0  }
   0x2   :  { %5273 = sst [smem:[#allocation3_spill]] %s5225_s1  ;;  %s5280_s20 = sld [smem:[#allocation2_spill]]  ;;  %v4430_v16 = vshrl.u32 %v80_v14, 7  ;;  %v4466_v32 = vld [vmem:[%s5229_s13] sm:$0xff]  ;;  %3750 = vmatprep.mubr.msk.bf16.mxu1 %vm4292_vm3, %v4284_v24  ;;  %vm278_vm4 = vcmask 130048   ;;  %v247_v63 = vld [vmem:[%s5231_s8 + $0x8] sm:$0xff] }
   0x3   :  { %5274 = sst [smem:[#allocation4_spill]] %s5226_s7  ;;  %s5281_s22 = sld [smem:[#allocation3_spill]]  ;;  %v4474_v38 = vld [vmem:[%s5230_s14] sm:$0xff]  ;;  %vm704_vm5 = vcmask 261120   ;;  %vm706_vm6 = vcmask 392192  }
   0x4   :  { %5275 = sst [smem:[#allocation5_spill]] %s5227_s9  ;;  %v82_v17 = vsub.s32 0, %v4430_v16  ;;  %s5282_s24 = sld [smem:[#allocation4_spill]]  ;;  %v246_v57 = vld [vmem:[%s5231_s8] sm:$0xff] }
   0x5   :  { %5276 = sst [smem:[#allocation6_spill]] %s5238_s4  ;;  %s5283_s26 = sld [smem:[#allocation5_spill]] }
   0x6   :  { %5277 = sst [smem:[#allocation7_spill]] %s5241_s18  ;;  %s5263_s0 = smov 8  }
   0x7   :  { %5278 = sst [smem:[#allocation8_spill]] %s5242_s17  ;;  %s5247_s21 = smov 64  }
   0x8   :  { %5279 = sst [smem:[#allocation9_spill]] %s5243_s19  ;;  %v4400_v0 = vld [vmem:[%s5280_s20] sm:$0xff]  ;;  %s5257_s9 = smov 96  }
   0x9   :  { %v70_v1 = vmul.f32 %v4400_v0, %v4400_v0  ;;  %v4083_v3 = vld [vmem:[%s5281_s22 + $0x4] ss:$8 sps:$4 sm:$0xff]   ;;  %v4085_v4 = vld [vmem:[%s5281_s22] ss:$8 sps:$4 sm:$0xff]   ;;  %v4086_v5 = vld [vmem:[%s5281_s22 + $0x14] ss:$8 sps:$4 sm:$0xff]  }
   0xa   :  { %137 = vmatprep.subr.bf16.mxu0 %v4083_v3  ;;  %v4088_v7 = vld [vmem:[%s5281_s22 + $0x10] ss:$8 sps:$4 sm:$0xff]   ;;  %v4089_v8 = vld [vmem:[%s5281_s22 + $0x24] ss:$8 sps:$4 sm:$0xff]   ;;  %v4091_v9 = vld [vmem:[%s5281_s22 + $0x20] ss:$8 sps:$4 sm:$0xff]  }
   0xb   :  { %v72_v2 = vsel %vm71_vm0, %v70_v1, 0.0  ;;  %138 = vmatpush1.bf16.msra.mxu0 %v4085_v4  ;;  %v4092_v10 = vld [vmem:[%s5281_s22 + $0x34] ss:$8 sps:$4 sm:$0xff]   ;;  %v4094_v11 = vld [vmem:[%s5281_s22 + $0x30] ss:$8 sps:$4 sm:$0xff]   ;;  %v266_v25 = vld [vmem:[%s5283_s26] sm:$0xff] }
   0xc   :  { %73 = vadd.xlane.f32.xlu0 %v72_v2  ;;  %139 = vmatprep.subr.bf16.mxu0 %v4086_v5  ;;  %v4436_v18 = vld [vmem:[%s5282_s24] sm:$0x7]  ;;  %s5259_s30 = smov 112   ;;  %s5249_s20 = smov 80   ;;  %v248_v4 = vld [vmem:[%s5231_s8 + $0x10] sm:$0xff] }
   0xd   :  { %v83_v19 = vrot.slane %v4436_v18, %v82_v17  ;;  %s5255_s1 = smov 16   ;;  %s5284_s7 = smov 112  }
   0xe   :  { %s5285_s23 = smov 96   ;;  %s5287_s25 = smov 16  }
   0xf   :  { %140 = vmatpush1.bf16.msra.mxu0 %v4088_v7  ;;  %s5294_s18 = smov 64  }
  0x10   :  { %141 = vmatprep.subr.bf16.mxu0 %v4089_v8 }
  0x13   :  { %142 = vmatpush1.bf16.msra.mxu0 %v4091_v9 }
  0x14   :  { %143 = vmatprep.subr.bf16.mxu0 %v4092_v10 }
  0x17   :  { %144 = vmatpush1.bf16.msra.mxu0 %v4094_v11  ;;  %v249_v11 = vld [vmem:[%s5231_s8 + $0x18] sm:$0xff] }
  0x18   :  { %3772 = vmatprep.subr.bf16.mxu0 %v4284_v24 }
  0x99   :  { %v74_v12 = vpop.xlane.xlu0 %73 }
  0x9a   :  { %v76_v13 = vmul.f32 0.015625, %v74_v12 }
  0x9c   :  { %v77_v15 = vadd.f32 1e-05, %v76_v13 }
  0x9e   :  { %4191 = vrsqrt.f32 %v77_v15 }
  0xa8   :  { %v4192_v20 = vpop.eup %4191 }
  0xa9   :  { %v79_v21 = vmul.f32 %v4192_v20, %v4400_v0 }
  0xab   :  { %v84_v22 = vmul.f32 %v83_v19, %v79_v21 }
  0xad   :  { %v85_v23 = vpack.c.bf16 %v84_v22, %v84_v22 }
  0xaf   :  { %3420 = vmatmul.mubr.msk.bf16.vlgmr.msra.gmra.mrb[0].mxu0 %vm71_vm0, %v85_v23  ;;  %v67_v23 = vld [vmem:[%s5232_s15] sm:$0xff] }
  0xb0   :  { %3774 = vmatprep.mubr.msk.bf16.mxu0 %vm4292_vm3, %v4284_v24 }
 0x182   :  { %v171_v26 = vpop.f32.mrb[0].mxu0 }
 0x183   :  { %182 = vrot.lane.b32.xlu1 %v171_v26, %s5267_s27  ;;  %179 = vrot.lane.b32.xlu0 %v171_v26, %s5265_s28  ;;  %v4450_v27 = vpop.f32.mrb[1].mxu0  ;;  %v195_v51 = vmul.f32 %v171_v26, %v4459_v31 }
 0x184   :  { %v270_v28 = vpack.c.bf16 %v4450_v27, %v266_v25  ;;  %v175_v29 = vpop.f32.mrb[2].mxu0 }
 0x185   :  { %v176_v30 = vpop.f32.mrb[3].mxu0 }
 0x186   :  { %3773 = vmatpush3.bf16.msra.mxu0 %v270_v28 }
 0x187   :  { %187 = vrot.lane.b32.xlu1 %v171_v26, %s5261_s29  ;;  %3784 = vmatprep.subr.bf16.mxu0 %v4284_v24 }
 0x18b   :  { %190 = vrot.lane.b32.xlu1 %v171_v26, %s5263_s0 }
 0x18f   :  { %213 = vrot.lane.b32.xlu1 %v4459_v31, %s5247_s21 }
 0x1f5   :  { %v183_v33 = vpop.permute.xlu1 %182  ;;  %v180_v34 = vpop.permute.xlu0 %179 }
 0x1f6   :  { %v210_v35 = vsel %vm185_vm1, %v183_v33, %v180_v34  ;;  %v186_v46 = vsel %vm185_vm1, %v180_v34, %v183_v33 }
 0x1f7   :  { %v217_v36 = vmul.f32 %v210_v35, %v4466_v32  ;;  %v196_v50 = vmul.f32 %v186_v46, %v4466_v32 }
 0x1f9   :  { %v188_v37 = vpop.permute.xlu1 %187  ;;  %219 = vrot.lane.b32.xlu1 %v217_v36, %s5247_s21  ;;  %v197_v53 = vadd.f32 %v196_v50, %v195_v51 }
 0x1fd   :  { %v191_v39 = vpop.permute.xlu1 %190 }
 0x1fe   :  { %v211_v40 = vsel %vm193_vm2, %v191_v39, %v188_v37  ;;  %v194_v49 = vsel %vm193_vm2, %v188_v37, %v191_v39 }
 0x1ff   :  { %v223_v41 = vmul.f32 %v211_v40, %v4474_v38  ;;  %v198_v52 = vmul.f32 %v194_v49, %v4474_v38 }
 0x201   :  { %225 = vrot.lane.b32.xlu1 %v223_v41, %s5247_s21  ;;  %v4479_v42 = vpop.permute.xlu1 %213  ;;  %v199_v54 = vadd.f32 %v198_v52, %v197_v53 }
 0x202   :  { %v216_v44 = vmul.f32 %v4479_v42, %v171_v26 }
 0x203   :  { %v274_v62 = vpack.c.bf16 %v199_v54, %v199_v54 }
 0x26b   :  { %v220_v43 = vpop.permute.xlu1 %219 }
 0x26c   :  { %v222_v45 = vadd.f32 %v220_v43, %v216_v44 }
 0x273   :  { %v226_v47 = vpop.permute.xlu1 %225 }
 0x274   :  { %v228_v48 = vadd.f32 %v226_v47, %v222_v45 }
 0x276   :  { %232 = vrot.lane.b32.xlu0 %v228_v48, %s5257_s9  ;;  %230 = vrot.lane.b32.xlu1 %v228_v48, %s5259_s30 }
 0x27a   :  { %250 = vrot.lane.b32.xlu0 %v228_v48, %s5247_s21  ;;  %234 = vrot.lane.b32.xlu1 %v228_v48, %s5249_s20 }
 0x27e   :  { %201 = vrot.lane.b32.xlu0 %v199_v54, %s5259_s30 }
 0x282   :  { %204 = vrot.lane.b32.xlu0 %v199_v54, %s5257_s9 }
 0x286   :  { %207 = vrot.lane.b32.xlu0 %v199_v54, %s5249_s20 }
 0x2e8   :  { %v233_v55 = vpop.permute.xlu0 %232  ;;  %v231_v56 = vpop.permute.xlu1 %230 }
 0x2e9   :  { %252 = vrot.lane.b32.xlu1 %v231_v56, %s5247_s21 }
 0x2ec   :  { %v251_v58 = vpop.permute.xlu0 %250  ;;  %v235_v61 = vpop.permute.xlu1 %234 }
 0x2ed   :  { %v262_v59 = vpack.c.bf16 %v251_v58, %v246_v57  ;;  %254 = vrot.lane.b32.xlu1 %v233_v55, %s5247_s21 }
 0x2ef   :  { %v283_v60 = vsel %vm278_vm4, %v262_v59, 0 }
 0x2f0   :  { %3749 = vmatpush3.bf16.xpose.msra.mxu1 %v283_v60  ;;  %v202_v7 = vpop.permute.xlu0 %201  ;;  %v268_v60 = vld [vmem:[%s5283_s26 + $0x10] sm:$0xff] }
 0x2f1   :  { %256 = vrot.lane.b32.xlu1 %v235_v61, %s5247_s21  ;;  %3754 = vmatprep.subr.bf16.mxu1 %v4284_v24  ;;  %v275_v9 = vpack.c.bf16 %v202_v7, %v202_v7  ;;  %v267_v7 = vld [vmem:[%s5283_s26 + $0x8] sm:$0xff]  ;;  %s5253_s21 = smov 32  }
 0x2f4   :  { %v205_v13 = vpop.permute.xlu0 %204 }
 0x2f5   :  { %v276_v15 = vpack.c.bf16 %v205_v13, %v205_v13 }
 0x2f7   :  { %3751 = vmatmul.mubr.msk.bf16.vlgmr.msra.gmra.mrb[0].mxu1 %vm278_vm4, %v274_v62 }
 0x2f8   :  { %3756 = vmatprep.mubr.msk.bf16.mxu1 %vm4292_vm3, %v4284_v24  ;;  %v208_v20 = vpop.permute.xlu0 %207 }
 0x2f9   :  { %v277_v21 = vpack.c.bf16 %v208_v20, %v208_v20 }
 0x35b   :  { %v253_v1 = vpop.permute.xlu1 %252 }
 0x35c   :  { %v263_v2 = vpack.c.bf16 %v253_v1, %v247_v63 }
 0x35e   :  { %v329_v3 = vsel %vm278_vm4, %v263_v2, 0 }
 0x35f   :  { %v255_v5 = vpop.permute.xlu1 %254  ;;  %3755 = vmatpush3.bf16.xpose.msra.mxu1 %v329_v3 }
 0x360   :  { %3760 = vmatprep.subr.bf16.mxu1 %v4284_v24  ;;  %v264_v8 = vpack.c.bf16 %v255_v5, %v248_v4 }
 0x362   :  { %v375_v10 = vsel %vm278_vm4, %v264_v8, 0 }
 0x363   :  { %v257_v12 = vpop.permute.xlu1 %256 }
 0x364   :  { %v265_v14 = vpack.c.bf16 %v257_v12, %v249_v11 }
 0x366   :  { %3757 = vmatmul.mubr.msk.bf16.vlgmr.msra.gmra.mrb[4].mxu1 %vm278_vm4, %v275_v9  ;;  %v421_v19 = vsel %vm278_vm4, %v265_v14, 0 }
 0x367   :  { %3761 = vmatpush3.bf16.xpose.msra.mxu1 %v375_v10  ;;  %3762 = vmatprep.mubr.msk.bf16.mxu1 %vm4292_vm3, %v4284_v24 }
 0x368   :  { %3766 = vmatprep.subr.bf16.mxu1 %v4284_v24 }
 0x36e   :  { %3763 = vmatmul.mubr.msk.bf16.vlgmr.msra.gmra.mrb[8].mxu1 %vm278_vm4, %v276_v15 }
 0x36f   :  { %3767 = vmatpush3.bf16.xpose.msra.mxu1 %v421_v19  ;;  %3768 = vmatprep.mubr.msk.bf16.mxu1 %vm4292_vm3, %v4284_v24  ;;  %v269_v19 = vld [vmem:[%s5283_s26 + $0x18] sm:$0xff] }
 0x370   :  { %3778 = vmatprep.subr.bf16.mxu1 %v4284_v24 }
 0x376   :  { %3769 = vmatmul.mubr.msk.bf16.vlgmr.msra.gmra.mrb[12].mxu1 %vm278_vm4, %v277_v21 }
 0x377   :  { %3780 = vmatprep.mubr.msk.bf16.mxu1 %vm4292_vm3, %v4284_v24 }
 0x3ca   :  { %v319_v22 = vpop.f32.mrb[0].mxu1 }
 0x3cb   :  { %v463_v25 = vmul.f32 0.25, %v319_v22  ;;  %v3752_v26 = vpop.f32.mrb[1].mxu1 }
 0x3cc   :  { %v322_v28 = vpop.f32.mrb[2].mxu1 }
 0x3cd   :  { %v3753_v29 = vpop.f32.mrb[3].mxu1  ;;  %v467_v30 = vadd.f32 %v463_v25, %v67_v23 }
 0x3cf   :  { %v471_v33 = vsel %vm278_vm4, %v467_v30, -inf }
 0x3d0   :  { %472 = vmax.xlane.f32.xlu1 %v471_v33 }
 0x3e1   :  { %240 = vrot.lane.b32.xlu1 %v4450_v27, %s5257_s9  ;;  %s5286_s9 = smov 80  }
 0x439   :  { %v365_v34 = vpop.f32.mrb[4].mxu1 }
 0x43a   :  { %v464_v35 = vmul.f32 0.25, %v365_v34  ;;  %v3758_v36 = vpop.f32.mrb[5].mxu1 }
 0x43b   :  { %v368_v37 = vpop.f32.mrb[6].mxu1 }
 0x43c   :  { %v3759_v39 = vpop.f32.mrb[7].mxu1  ;;  %v468_v40 = vadd.f32 %v464_v35, %v67_v23 }
 0x43e   :  { %v474_v41 = vsel %vm278_vm4, %v468_v40, -inf }
 0x43f   :  { %475 = vmax.xlane.f32.xlu0 %v474_v41 }
 0x441   :  { %v411_v43 = vpop.f32.mrb[8].mxu1 }
 0x442   :  { %v465_v44 = vmul.f32 0.25, %v411_v43  ;;  %v3764_v45 = vpop.f32.mrb[9].mxu1  ;;  %v4096_v43 = vld [vmem:[%s5233_s2 + $0x8] sm:$0xff]  }
 0x443   :  { %v414_v46 = vpop.f32.mrb[10].mxu1 }
 0x444   :  { %v3765_v47 = vpop.f32.mrb[11].mxu1  ;;  %v469_v48 = vadd.f32 %v465_v44, %v67_v23  ;;  %v4097_v44 = vld [vmem:[%s5233_s2 + $0x10] sm:$0xff]  }
 0x446   :  { %v477_v49 = vsel %vm278_vm4, %v469_v48, -inf }
 0x447   :  { %478 = vmax.xlane.f32.xlu0 %v477_v49 }
 0x449   :  { %v457_v50 = vpop.f32.mrb[12].mxu1 }
 0x44a   :  { %v466_v51 = vmul.f32 0.25, %v457_v50  ;;  %v3770_v52 = vpop.f32.mrb[13].mxu1 }
 0x44b   :  { %v460_v53 = vpop.f32.mrb[14].mxu1  ;;  %v4098_v52 = vld [vmem:[%s5233_s2 + $0x18] sm:$0xff]  }
 0x44c   :  { %v3771_v54 = vpop.f32.mrb[15].mxu1  ;;  %v470_v55 = vadd.f32 %v466_v51, %v67_v23 }
 0x44e   :  { %v480_v56 = vsel %vm278_vm4, %v470_v55, -inf }
 0x44f   :  { %481 = vmax.xlane.f32.xlu1 %v480_v56 }
 0x45d   :  { %v473_v57 = vpop.xlane.xlu1 %472  ;;  %237 = vrot.lane.b32.xlu0 %v4450_v27, %s5259_s30  ;;  %s5288_s30 = smov 32  }
 0x45e   :  { %v483_v58 = vsub.f32 %v467_v30, %v473_v57 }
 0x460   :  { %v487_v59 = vmul.f32 1.442695, %v483_v58  ;;  %243 = vrot.lane.b32.xlu1 %v4450_v27, %s5249_s20  ;;  %s5251_s20 = smov 48  }
 0x461   :  { %v241_v61 = vpop.permute.xlu1 %240 }
 0x462   :  { %4193 = vpow2.f32 %v487_v59  ;;  %v272_v1 = vpack.c.bf16 %v241_v61, %v268_v60 }
 0x46c   :  { %v4194_v62 = vpop.eup %4193 }
 0x46d   :  { %v507_v63 = vpack.c.bf16 %v4194_v62, %v4194_v62  ;;  %v495_v33 = vsel %vm278_vm4, %v4194_v62, 0.0 }
 0x46f   :  { %3775 = vmatmul.mubr.msk.bf16.vlgmr.msra.gmra.mrb[4].mxu0 %vm278_vm4, %v507_v63 }
 0x470   :  { %3785 = vmatpush3.bf16.msra.mxu0 %v272_v1  ;;  %3786 = vmatprep.mubr.msk.bf16.mxu0 %vm4292_vm3, %v4284_v24 }
 0x471   :  { %3796 = vmatprep.subr.bf16.mxu0 %v4284_v24 }
 0x4cc   :  { %v476_v2 = vpop.xlane.xlu0 %475 }
 0x4cd   :  { %v484_v3 = vsub.f32 %v468_v40, %v476_v2  ;;  %v4095_v40 = vld [vmem:[%s5233_s2] sm:$0xff]  }
 0x4cf   :  { %v489_v27 = vmul.f32 1.442695, %v484_v3 }
 0x4d1   :  { %4195 = vpow2.f32 %v489_v27 }
 0x4d4   :  { %v479_v4 = vpop.xlane.xlu0 %478 }
 0x4d5   :  { %v485_v5 = vsub.f32 %v469_v48, %v479_v4 }
 0x4d7   :  { %v491_v8 = vmul.f32 1.442695, %v485_v5 }
 0x4d8   :  { %v238_v9 = vpop.permute.xlu0 %237 }
 0x4d9   :  { %4197 = vpow2.f32 %v491_v8  ;;  %v271_v10 = vpack.c.bf16 %v238_v9, %v267_v7 }
 0x4db   :  { %v4196_v11 = vpop.eup %4195  ;;  %3779 = vmatpush3.bf16.msra.mxu1 %v271_v10 }
 0x4dc   :  { %v482_v12 = vpop.xlane.xlu1 %481  ;;  %v498_v13 = vsel %vm278_vm4, %v4196_v11, 0.0  ;;  %v508_v14 = vpack.c.bf16 %v4196_v11, %v4196_v11  ;;  %3790 = vmatprep.subr.bf16.mxu1 %v4284_v24 }
 0x4dd   :  { %v486_v15 = vsub.f32 %v470_v55, %v482_v12  ;;  %499 = vadd.xlane.f32.xlu0 %v498_v13 }
 0x4de   :  { %3781 = vmatmul.mubr.msk.bf16.vlgmr.msra.gmra.mrb[16].mxu1 %vm278_vm4, %v508_v14 }
 0x4df   :  { %v493_v20 = vmul.f32 1.442695, %v486_v15  ;;  %3792 = vmatprep.mubr.msk.bf16.mxu1 %vm4292_vm3, %v4284_v24 }
 0x4e0   :  { %v244_v21 = vpop.permute.xlu1 %243 }
 0x4e1   :  { %4199 = vpow2.f32 %v493_v20  ;;  %v273_v22 = vpack.c.bf16 %v244_v21, %v269_v19 }
 0x4e3   :  { %v4198_v23 = vpop.eup %4197  ;;  %3791 = vmatpush3.bf16.msra.mxu1 %v273_v22  ;;  %v4099_v22 = vld [vmem:[%s5234_s3] sm:$0xff]  }
 0x4e4   :  { %v501_v25 = vsel %vm278_vm4, %v4198_v23, 0.0  ;;  %v509_v26 = vpack.c.bf16 %v4198_v23, %v4198_v23  ;;  %3808 = vmatprep.subr.bf16.mxu1 %v4284_v24  ;;  %v4101_v23 = vld [vmem:[%s5234_s3 + $0x10] sm:$0xff]  }
 0x4e5   :  { %502 = vadd.xlane.f32.xlu1 %v501_v25  ;;  %v4102_v25 = vld [vmem:[%s5234_s3 + $0x18] sm:$0xff]  }
 0x4e6   :  { %3787 = vmatmul.mubr.msk.bf16.vlgmr.msra.gmra.mrb[8].mxu0 %vm278_vm4, %v509_v26 }
 0x4e7   :  { %3804 = vmatprep.mubr.msk.bf16.mxu0 %vm4292_vm3, %v4284_v24  ;;  %3797 = vmatpush3.bf16.msra.mxu0 %v4095_v40 }
 0x4e8   :  { %3798 = vmatprep.subr.bf16.mxu0 %v4284_v24 }
 0x4eb   :  { %v4200_v28 = vpop.eup %4199  ;;  %3799 = vmatpush3.bf16.msra.mxu0 %v4096_v43 }
 0x4ec   :  { %v504_v29 = vsel %vm278_vm4, %v4200_v28, 0.0  ;;  %v510_v30 = vpack.c.bf16 %v4200_v28, %v4200_v28  ;;  %3800 = vmatprep.subr.bf16.mxu0 %v4284_v24 }
 0x4ed   :  { %505 = vadd.xlane.f32.xlu0 %v504_v29 }
 0x4ee   :  { %3793 = vmatmul.mubr.msk.bf16.vlgmr.msra.gmra.mrb[20].mxu1 %vm278_vm4, %v510_v30  ;;  %v795_v30 = vsub.s32 1, %v4430_v16 }
 0x4ef   :  { %3816 = vmatprep.mubr.msk.bf16.mxu1 %vm4292_vm3, %v4284_v24  ;;  %3801 = vmatpush3.bf16.msra.mxu0 %v4097_v44 }
 0x4f0   :  { %3802 = vmatprep.subr.bf16.mxu0 %v4284_v24  ;;  %3809 = vmatpush3.bf16.msra.mxu1 %v4099_v22 }
 0x4f1   :  { %496 = vadd.xlane.f32.xlu0 %v495_v33  ;;  %3810 = vmatprep.subr.bf16.mxu1 %v4284_v24  ;;  %v796_v33 = vrot.slane %v4436_v18, %v795_v30 }
 0x4f3   :  { %3803 = vmatpush3.bf16.msra.mxu0 %v4098_v52 }
 0x4f4   :  { %3820 = vmatprep.subr.bf16.mxu0 %v4284_v24 }
 0x542   :  { %v548_v34 = vpop.f32.mrb[4].mxu0 }
 0x543   :  { %v3776_v35 = vpop.f32.mrb[5].mxu0 }
 0x544   :  { %v551_v36 = vpop.f32.mrb[6].mxu0 }
 0x545   :  { %v3777_v37 = vpop.f32.mrb[7].mxu0 }
 0x56a   :  { %v500_v39 = vpop.xlane.xlu0 %499 }
 0x56b   :  { %4201 = vrcp.f32 %v500_v39  ;;  %v4103_v39 = vld [vmem:[%s5235_s10] sm:$0xff]  }
 0x572   :  { %v503_v41 = vpop.xlane.xlu1 %502 }
 0x573   :  { %4203 = vrcp.f32 %v503_v41  ;;  %v933_v41 = vsel %vm278_vm4, %v4103_v39, 0 }
 0x575   :  { %v4202_v45 = vpop.eup %4201 }
 0x57a   :  { %v506_v50 = vpop.xlane.xlu0 %505 }
 0x57b   :  { %4205 = vrcp.f32 %v506_v50 }
 0x57d   :  { %v4204_v53 = vpop.eup %4203 }
 0x57e   :  { %v497_v2 = vpop.xlane.xlu0 %496 }
 0x57f   :  { %4207 = vrcp.f32 %v497_v2 }
 0x585   :  { %v4206_v59 = vpop.eup %4205 }
 0x589   :  { %v4208_v3 = vpop.eup %4207 }
 0x58a   :  { %v687_v4 = vmul.f32 %v4208_v3, %v548_v34 }
 0x5b1   :  { %v591_v46 = vpop.f32.mrb[16].mxu1 }
 0x5b2   :  { %v688_v47 = vmul.f32 %v4202_v45, %v591_v46  ;;  %v3782_v48 = vpop.f32.mrb[17].mxu1  ;;  %v4104_v45 = vld [vmem:[%s5235_s10 + $0x8] sm:$0xff]  }
 0x5b3   :  { %v594_v49 = vpop.f32.mrb[18].mxu1  ;;  %v984_v46 = vsel %vm278_vm4, %v4104_v45, 0 }
 0x5b4   :  { %v3783_v51 = vpop.f32.mrb[19].mxu1  ;;  %692 = vrot.lane.b32.xlu1 %v688_v47, %s5255_s1 }
 0x5b9   :  { %v634_v54 = vpop.f32.mrb[8].mxu0 }
 0x5ba   :  { %v689_v55 = vmul.f32 %v4204_v53, %v634_v54  ;;  %v3788_v56 = vpop.f32.mrb[9].mxu0 }
 0x5bb   :  { %v637_v57 = vpop.f32.mrb[10].mxu0 }
 0x5bc   :  { %696 = vrot.lane.b32.xlu0 %v689_v55, %s5253_s21  ;;  %v3789_v58 = vpop.f32.mrb[11].mxu0  ;;  %v4105_v57 = vld [vmem:[%s5235_s10 + $0x10] sm:$0xff]  }
 0x5c1   :  { %v677_v60 = vpop.f32.mrb[20].mxu1 }
 0x5c2   :  { %v690_v61 = vmul.f32 %v4206_v59, %v677_v60  ;;  %v3794_v62 = vpop.f32.mrb[21].mxu1  ;;  %v1035_v60 = vsel %vm278_vm4, %v4105_v57, 0 }
 0x5c3   :  { %v680_v63 = vpop.f32.mrb[22].mxu1 }
 0x5c4   :  { %v3795_v1 = vpop.f32.mrb[23].mxu1  ;;  %700 = vrot.lane.b32.xlu1 %v690_v61, %s5251_s20  ;;  %s5293_s20 = smov 72  }
 0x626   :  { %v693_v27 = vpop.permute.xlu1 %692 }
 0x627   :  { %v703_v7 = vsel %vm278_vm4, %v687_v4, %v693_v27  ;;  %v68_v27 = vld [vmem:[%s5236_s16] sm:$0xff] }
 0x62e   :  { %v697_v5 = vpop.permute.xlu0 %696 }
 0x62f   :  { %v705_v8 = vsel %vm704_vm5, %v703_v7, %v697_v5 }
 0x636   :  { %v701_v9 = vpop.permute.xlu1 %700 }
 0x637   :  { %v707_v10 = vsel %vm706_vm6, %v705_v8, %v701_v9 }
 0x638   :  { %v708_v11 = vpack.c.bf16 %v707_v10, %v707_v10 }
 0x63a   :  { %3805 = vmatmul.mubr.msk.bf16.vlgmr.msra.gmra.mrb[12].mxu0 %vm71_vm0, %v708_v11  ;;  %v4107_v11 = vld [vmem:[%s5237_s11] sm:$0xff]  }
 0x63b   :  { %3822 = vmatprep.mubr.msk.bf16.mxu0 %vm4292_vm3, %v4284_v24  ;;  %3821 = vmatpush3.bf16.xpose.msra.mxu0 %v933_v41 }
 0x63c   :  { %3832 = vmatprep.subr.bf16.mxu0 %v4284_v24 }
 0x70d   :  { %v778_v12 = vpop.f32.mrb[12].mxu0 }
 0x70e   :  { %v4600_v13 = vadd.f32 %v778_v12, %v4400_v0  ;;  %v3806_v14 = vpop.f32.mrb[13].mxu0  ;;  %v4100_v0 = vld [vmem:[%s5234_s3 + $0x8] sm:$0xff]  }
 0x70f   :  { %v781_v15 = vpop.f32.mrb[14].mxu0  ;;  %3811 = vmatpush3.bf16.msra.mxu1 %v4100_v0 }
 0x710   :  { %v3807_v19 = vpop.f32.mrb[15].mxu0  ;;  %v785_v20 = vmul.f32 %v4600_v13, %v4600_v13  ;;  %3812 = vmatprep.subr.bf16.mxu1 %v4284_v24 }
 0x712   :  { %v786_v21 = vsel %vm71_vm0, %v785_v20, 0.0 }
 0x713   :  { %787 = vadd.xlane.f32.xlu1 %v786_v21  ;;  %3813 = vmatpush3.bf16.msra.mxu1 %v4101_v23 }
 0x714   :  { %3814 = vmatprep.subr.bf16.mxu1 %v4284_v24 }
 0x717   :  { %3815 = vmatpush3.bf16.msra.mxu1 %v4102_v25 }
 0x718   :  { %3826 = vmatprep.subr.bf16.mxu1 %v4284_v24 }
 0x7a0   :  { %v788_v26 = vpop.xlane.xlu1 %787 }
 0x7a1   :  { %v789_v28 = vmul.f32 0.015625, %v788_v26 }
 0x7a3   :  { %v790_v29 = vadd.f32 1e-05, %v789_v28 }
 0x7a5   :  { %4209 = vrsqrt.f32 %v790_v29 }
 0x7af   :  { %v4210_v34 = vpop.eup %4209 }
 0x7b0   :  { %v792_v35 = vmul.f32 %v4210_v34, %v4600_v13 }
 0x7b2   :  { %v797_v36 = vmul.f32 %v796_v33, %v792_v35 }
 0x7b4   :  { %v798_v37 = vpack.c.bf16 %v797_v36, %v797_v36 }
 0x7b6   :  { %3817 = vmatmul.mubr.msk.bf16.vlgmr.msra.gmra.mrb[24].mxu1 %vm71_vm0, %v798_v37 }
 0x7b7   :  { %3828 = vmatprep.mubr.msk.bf16.mxu1 %vm4292_vm3, %v4284_v24  ;;  %3827 = vmatpush3.bf16.xpose.msra.mxu1 %v984_v46 }
 0x7b8   :  { %3838 = vmatprep.subr.bf16.mxu1 %v4284_v24 }
 0x889   :  { %v868_v40 = vpop.f32.mrb[24].mxu1 }
 0x88a   :  { %875 = vrot.lane.b32.xlu0 %v868_v40, %s5265_s28  ;;  %v3818_v18 = vpop.f32.mrb[25].mxu1  ;;  %v889_v52 = vmul.f32 %v868_v40, %v4459_v31  ;;  %v4106_v31 = vld [vmem:[%s5235_s10 + $0x18] sm:$0xff]   ;;  %s5296_s28 = sld [smem:[#allocation7_spill]] }
 0x88b   :  { %v871_v43 = vpop.f32.mrb[26].mxu1  ;;  %v1086_v61 = vsel %vm278_vm4, %v4106_v31, 0 }
 0x88c   :  { %v3819_v44 = vpop.f32.mrb[27].mxu1  ;;  %v4108_v43 = vld [vmem:[%s5237_s11 + $0x8] sm:$0xff]  }
 0x88e   :  { %878 = vrot.lane.b32.xlu0 %v868_v40, %s5267_s27 }
 0x892   :  { %882 = vrot.lane.b32.xlu0 %v868_v40, %s5261_s29  ;;  %s5289_s29 = smov 48  }
 0x896   :  { %885 = vrot.lane.b32.xlu0 %v868_v40, %s5263_s0  ;;  %s5291_s0 = smov 120  }
 0x8fc   :  { %v876_v47 = vpop.permute.xlu0 %875 }
 0x900   :  { %v879_v48 = vpop.permute.xlu0 %878 }
 0x901   :  { %v881_v49 = vsel %vm185_vm1, %v876_v47, %v879_v48  ;;  %v4109_v47 = vld [vmem:[%s5237_s11 + $0x10] sm:$0xff]  }
 0x902   :  { %v890_v51 = vmul.f32 %v881_v49, %v4466_v32 }
 0x904   :  { %v883_v50 = vpop.permute.xlu0 %882  ;;  %v891_v55 = vadd.f32 %v890_v51, %v889_v52 }
 0x908   :  { %v886_v53 = vpop.permute.xlu0 %885 }
 0x909   :  { %v888_v54 = vsel %vm193_vm2, %v883_v50, %v886_v53 }
 0x90a   :  { %v892_v56 = vmul.f32 %v888_v54, %v4474_v38 }
 0x90c   :  { %v893_v58 = vadd.f32 %v892_v56, %v891_v55 }
 0x90e   :  { %895 = vrot.lane.b32.xlu0 %v893_v58, %s5284_s7  ;;  %v920_v59 = vpack.c.bf16 %v893_v58, %v893_v58 }
 0x910   :  { %3823 = vmatmul.mubr.msk.bf16.vlgmr.msra.gmra.mrb[16].mxu0 %vm278_vm4, %v920_v59  ;;  %v4110_v59 = vld [vmem:[%s5237_s11 + $0x18] sm:$0xff]  }
 0x911   :  { %3833 = vmatpush3.bf16.xpose.msra.mxu0 %v1035_v60  ;;  %3834 = vmatprep.mubr.msk.bf16.mxu0 %vm4292_vm3, %v4284_v24 }
 0x912   :  { %898 = vrot.lane.b32.xlu0 %v893_v58, %s5285_s23  ;;  %3844 = vmatprep.subr.bf16.mxu0 %v4284_v24 }
 0x916   :  { %901 = vrot.lane.b32.xlu0 %v893_v58, %s5286_s9 }
 0x980   :  { %v896_v32 = vpop.permute.xlu0 %895 }
 0x981   :  { %v921_v38 = vpack.c.bf16 %v896_v32, %v896_v32 }
 0x983   :  { %3829 = vmatmul.mubr.msk.bf16.vlgmr.msra.gmra.mrb[28].mxu1 %vm278_vm4, %v921_v38 }
 0x984   :  { %3839 = vmatpush3.bf16.xpose.msra.mxu1 %v1086_v61  ;;  %v899_v62 = vpop.permute.xlu0 %898  ;;  %3840 = vmatprep.mubr.msk.bf16.mxu1 %vm4292_vm3, %v4284_v24 }
 0x985   :  { %v922_v63 = vpack.c.bf16 %v899_v62, %v899_v62  ;;  %3850 = vmatprep.subr.bf16.mxu1 %v4284_v24 }
 0x987   :  { %3835 = vmatmul.mubr.msk.bf16.vlgmr.msra.gmra.mrb[20].mxu0 %vm278_vm4, %v922_v63 }
 0x988   :  { %v902_v1 = vpop.permute.xlu0 %901  ;;  %3846 = vmatprep.mubr.msk.bf16.mxu0 %vm4292_vm3, %v4284_v24  ;;  %3845 = vmatpush3.bf16.msra.mxu0 %v4107_v11  ;;  %v4113_v11 = vld [vmem:[%s5238_s4 + $0x10] sm:$0xff]  }
 0x989   :  { %v923_v2 = vpack.c.bf16 %v902_v1, %v902_v1  ;;  %3856 = vmatprep.subr.bf16.mxu0 %v4284_v24 }
 0x98b   :  { %3841 = vmatmul.mubr.msk.bf16.vlgmr.msra.gmra.mrb[32].mxu1 %vm278_vm4, %v923_v2 }
 0x98c   :  { %3852 = vmatprep.mubr.msk.bf16.mxu1 %vm4292_vm3, %v4284_v24  ;;  %3851 = vmatpush3.bf16.msra.mxu1 %v4108_v43 }
 0x98d   :  { %3862 = vmatprep.subr.bf16.mxu1 %v4284_v24 }
 0x9e3   :  { %v969_v3 = vpop.f32.mrb[16].mxu0 }
 0x9e4   :  { %v1128_v4 = vmul.f32 0.25, %v969_v3  ;;  %v3824_v5 = vpop.f32.mrb[17].mxu0  ;;  %v4111_v3 = vld [vmem:[%s5238_s4] sm:$0xff]  }
 0x9e5   :  { %v972_v7 = vpop.f32.mrb[18].mxu0 }
 0x9e6   :  { %v3825_v8 = vpop.f32.mrb[19].mxu0  ;;  %v1132_v9 = vadd.f32 %v1128_v4, %v68_v27 }
 0x9e8   :  { %v1136_v10 = vsel %vm278_vm4, %v1132_v9, -inf }
 0x9e9   :  { %1137 = vmax.xlane.f32.xlu0 %v1136_v10  ;;  %v4112_v10 = vld [vmem:[%s5238_s4 + $0x8] sm:$0xff]  }
 0xa56   :  { %v1020_v12 = vpop.f32.mrb[28].mxu1 }
 0xa57   :  { %v1129_v14 = vmul.f32 0.25, %v1020_v12  ;;  %v3830_v15 = vpop.f32.mrb[29].mxu1 }
 0xa58   :  { %v1023_v19 = vpop.f32.mrb[30].mxu1 }
 0xa59   :  { %v3831_v20 = vpop.f32.mrb[31].mxu1  ;;  %v1133_v21 = vadd.f32 %v1129_v14, %v68_v27  ;;  %v4114_v14 = vld [vmem:[%s5238_s4 + $0x18] sm:$0xff]  }
 0xa5a   :  { %v1071_v22 = vpop.f32.mrb[20].mxu0 }
 0xa5b   :  { %v1130_v0 = vmul.f32 0.25, %v1071_v22  ;;  %v3836_v23 = vpop.f32.mrb[21].mxu0  ;;  %v1139_v25 = vsel %vm278_vm4, %v1133_v21, -inf }
 0xa5c   :  { %1140 = vmax.xlane.f32.xlu1 %v1139_v25  ;;  %v1074_v26 = vpop.f32.mrb[22].mxu0 }
 0xa5d   :  { %v3837_v28 = vpop.f32.mrb[23].mxu0  ;;  %v1134_v29 = vadd.f32 %v1130_v0, %v68_v27 }
 0xa5e   :  { %v1122_v33 = vpop.f32.mrb[32].mxu1 }
 0xa5f   :  { %v1131_v34 = vmul.f32 0.25, %v1122_v33  ;;  %v3842_v35 = vpop.f32.mrb[33].mxu1  ;;  %v1142_v36 = vsel %vm278_vm4, %v1134_v29, -inf }
 0xa60   :  { %v1125_v37 = vpop.f32.mrb[34].mxu1  ;;  %1143 = vmax.xlane.f32.xlu1 %v1142_v36 }
 0xa61   :  { %v3843_v39 = vpop.f32.mrb[35].mxu1  ;;  %v1135_v40 = vadd.f32 %v1131_v34, %v68_v27 }
 0xa63   :  { %v1145_v41 = vsel %vm278_vm4, %v1135_v40, -inf }
 0xa64   :  { %1146 = vmax.xlane.f32.xlu1 %v1145_v41 }
 0xa76   :  { %v1138_v18 = vpop.xlane.xlu0 %1137 }
 0xa77   :  { %v1148_v44 = vsub.f32 %v1132_v9, %v1138_v18 }
 0xa79   :  { %v1152_v45 = vmul.f32 1.442695, %v1148_v44 }
 0xa7b   :  { %4211 = vpow2.f32 %v1152_v45 }
 0xa85   :  { %v4212_v46 = vpop.eup %4211 }
 0xa86   :  { %v1172_v48 = vpack.c.bf16 %v4212_v46, %v4212_v46  ;;  %v1160_v2 = vsel %vm278_vm4, %v4212_v46, 0.0 }
 0xa88   :  { %3847 = vmatmul.mubr.msk.bf16.vlgmr.msra.gmra.mrb[24].mxu0 %vm278_vm4, %v1172_v48 }
 0xa89   :  { %3857 = vmatpush3.bf16.msra.mxu0 %v4109_v47  ;;  %3858 = vmatprep.mubr.msk.bf16.mxu0 %vm4292_vm3, %v4284_v24 }
 0xa8a   :  { %3868 = vmatprep.subr.bf16.mxu0 %v4284_v24 }
 0xae9   :  { %v1141_v49 = vpop.xlane.xlu1 %1140 }
 0xaea   :  { %v1149_v50 = vsub.f32 %v1133_v21, %v1141_v49 }
 0xaec   :  { %v1154_v51 = vmul.f32 1.442695, %v1149_v50 }
 0xaed   :  { %v1144_v52 = vpop.xlane.xlu1 %1143 }
 0xaee   :  { %4213 = vpow2.f32 %v1154_v51  ;;  %v1150_v53 = vsub.f32 %v1134_v29, %v1144_v52 }
 0xaf0   :  { %v1156_v54 = vmul.f32 1.442695, %v1150_v53 }
 0xaf1   :  { %v1147_v55 = vpop.xlane.xlu1 %1146 }
 0xaf2   :  { %4215 = vpow2.f32 %v1156_v54  ;;  %v1151_v56 = vsub.f32 %v1135_v40, %v1147_v55 }
 0xaf4   :  { %v1158_v57 = vmul.f32 1.442695, %v1151_v56 }
 0xaf6   :  { %4217 = vpow2.f32 %v1158_v57 }
 0xaf8   :  { %v4214_v58 = vpop.eup %4213 }
 0xaf9   :  { %v1163_v60 = vsel %vm278_vm4, %v4214_v58, 0.0  ;;  %v1173_v31 = vpack.c.bf16 %v4214_v58, %v4214_v58  ;;  %v4117_v58 = vld [vmem:[%s5239_s5 + $0x4] ss:$8 sps:$4 sm:$0xff]  }
 0xafa   :  { %1164 = vadd.xlane.f32.xlu1 %v1163_v60  ;;  %v4118_v60 = vld [vmem:[%s5239_s5 + $0x10] ss:$8 sps:$4 sm:$0xff]  }
 0xafb   :  { %3853 = vmatmul.mubr.msk.bf16.vlgmr.msra.gmra.mrb[36].mxu1 %vm278_vm4, %v1173_v31  ;;  %v4123_v31 = vld [vmem:[%s5239_s5 + $0x24] ss:$8 sps:$4 sm:$0xff]  }
 0xafc   :  { %v4216_v32 = vpop.eup %4215  ;;  %3863 = vmatpush3.bf16.msra.mxu1 %v4110_v59  ;;  %3864 = vmatprep.mubr.msk.bf16.mxu1 %vm4292_vm3, %v4284_v24  ;;  %v4115_v59 = vld [vmem:[%s5239_s5] ss:$8 sps:$4 sm:$0xff]  }
 0xafd   :  { %v1166_v38 = vsel %vm278_vm4, %v4216_v32, 0.0  ;;  %v1174_v61 = vpack.c.bf16 %v4216_v32, %v4216_v32  ;;  %1537 = vmatprep.subr.bf16.mxu1 %v4117_v58  ;;  %v4121_v32 = vld [vmem:[%s5239_s5 + $0x20] ss:$8 sps:$4 sm:$0xff]  }
 0xafe   :  { %1167 = vadd.xlane.f32.xlu1 %v1166_v38  ;;  %v4124_v38 = vld [vmem:[%s5239_s5 + $0x30] ss:$8 sps:$4 sm:$0xff]  }
 0xaff   :  { %3859 = vmatmul.mubr.msk.bf16.vlgmr.msra.gmra.mrb[28].mxu0 %vm278_vm4, %v1174_v61  ;;  %v4126_v61 = vld [vmem:[%s5239_s5 + $0x34] ss:$8 sps:$4 sm:$0xff]  }
 0xb00   :  { %v4218_v62 = vpop.eup %4217  ;;  %3876 = vmatprep.mubr.msk.bf16.mxu0 %vm4292_vm3, %v4284_v24  ;;  %3869 = vmatpush3.bf16.msra.mxu0 %v4111_v3  ;;  %v4277_v3 = vld [vmem:[%s5282_s24] sm:$0x7] }
 0xb01   :  { %v1169_v63 = vsel %vm278_vm4, %v4218_v62, 0.0  ;;  %v1175_v1 = vpack.c.bf16 %v4218_v62, %v4218_v62  ;;  %3870 = vmatprep.subr.bf16.mxu0 %v4284_v24 }
 0xb02   :  { %1170 = vadd.xlane.f32.xlu1 %v1169_v63 }
 0xb03   :  { %3865 = vmatmul.mubr.msk.bf16.vlgmr.msra.gmra.mrb[40].mxu1 %vm278_vm4, %v1175_v1 }
 0xb04   :  { %1569 = vmatprep.mubr.bf16.mxu1 %v4283_v6  ;;  %3871 = vmatpush3.bf16.msra.mxu0 %v4112_v10  ;;  %v4128_v10 = vld [vmem:[%s5240_s6 + $0x8] sm:$0xff]  }
 0xb05   :  { %3872 = vmatprep.subr.bf16.mxu0 %v4284_v24  ;;  %1538 = vmatpush1.bf16.msra.mxu1 %v4115_v59 }
 0xb06   :  { %1161 = vadd.xlane.f32.xlu1 %v1160_v2  ;;  %v1482_v2 = vsub.s32 2, %v4430_v16  ;;  %v4180_v16 = vld [vmem:[%s5240_s6 + $0x48] sm:$0xff]  }
 0xb08   :  { %3873 = vmatpush3.bf16.msra.mxu0 %v4113_v11  ;;  %v4129_v11 = vld [vmem:[%s5240_s6 + $0x10] sm:$0xff]  }
 0xb09   :  { %3874 = vmatprep.subr.bf16.mxu0 %v4284_v24 }
 0xb0c   :  { %3875 = vmatpush3.bf16.msra.mxu0 %v4114_v14  ;;  %v4131_v14 = vld [vmem:[%s5240_s6 + $0x20] sm:$0xff]  }
 0xb0d   :  { %3880 = vmatprep.subr.bf16.mxu0 %v4284_v24 }
 0xb5b   :  { %v1219_v27 = vpop.f32.mrb[24].mxu0 }
 0xb5c   :  { %v3848_v4 = vpop.f32.mrb[25].mxu0 }
 0xb5d   :  { %v1222_v5 = vpop.f32.mrb[26].mxu0 }
 0xb5e   :  { %v3849_v7 = vpop.f32.mrb[27].mxu0 }
 0xb87   :  { %v1165_v8 = vpop.xlane.xlu1 %1164 }
 0xb88   :  { %4219 = vrcp.f32 %v1165_v8 }
 0xb8b   :  { %v1168_v9 = vpop.xlane.xlu1 %1167 }
 0xb8c   :  { %4221 = vrcp.f32 %v1168_v9  ;;  %v4127_v9 = vld [vmem:[%s5240_s6] sm:$0xff]  }
 0xb8f   :  { %v1171_v12 = vpop.xlane.xlu1 %1170 }
 0xb90   :  { %4223 = vrcp.f32 %v1171_v12  ;;  %v4130_v12 = vld [vmem:[%s5240_s6 + $0x18] sm:$0xff]  }
 0xb92   :  { %v4220_v15 = vpop.eup %4219 }
 0xb93   :  { %v1162_v41 = vpop.xlane.xlu1 %1161 }
 0xb94   :  { %4225 = vrcp.f32 %v1162_v41 }
 0xb96   :  { %v4222_v23 = vpop.eup %4221 }
 0xb9a   :  { %v4224_v34 = vpop.eup %4223 }
 0xb9e   :  { %v4226_v18 = vpop.eup %4225 }
 0xb9f   :  { %v1376_v45 = vmul.f32 %v4226_v18, %v1219_v27  ;;  %v1483_v27 = vrot.slane %v4277_v3, %v1482_v2 }
 0xbce   :  { %v1268_v19 = vpop.f32.mrb[36].mxu1 }
 0xbcf   :  { %v1377_v20 = vmul.f32 %v4220_v15, %v1268_v19  ;;  %v3854_v21 = vpop.f32.mrb[37].mxu1  ;;  %v4132_v15 = vld [vmem:[%s5240_s6 + $0x28] sm:$0xff]   ;;  %v4133_v19 = vld [vmem:[%s5240_s6 + $0x30] sm:$0xff]  }
 0xbd0   :  { %v1271_v22 = vpop.f32.mrb[38].mxu1 }
 0xbd1   :  { %v3855_v0 = vpop.f32.mrb[39].mxu1  ;;  %1381 = vrot.lane.b32.xlu0 %v1377_v20, %s5287_s25  ;;  %v4134_v20 = vld [vmem:[%s5240_s6 + $0x38] sm:$0xff]  }
 0xbd2   :  { %v1317_v25 = vpop.f32.mrb[28].mxu0 }
 0xbd3   :  { %v1378_v26 = vmul.f32 %v4222_v23, %v1317_v25  ;;  %v3860_v28 = vpop.f32.mrb[29].mxu0 }
 0xbd4   :  { %v1320_v29 = vpop.f32.mrb[30].mxu0 }
 0xbd5   :  { %1385 = vrot.lane.b32.xlu1 %v1378_v26, %s5288_s30  ;;  %v3861_v33 = vpop.f32.mrb[31].mxu0 }
 0xbd6   :  { %v1366_v35 = vpop.f32.mrb[40].mxu1 }
 0xbd7   :  { %v1379_v36 = vmul.f32 %v4224_v34, %v1366_v35  ;;  %v3866_v37 = vpop.f32.mrb[41].mxu1 }
 0xbd8   :  { %v1369_v39 = vpop.f32.mrb[42].mxu1 }
 0xbd9   :  { %v3867_v40 = vpop.f32.mrb[43].mxu1  ;;  %1389 = vrot.lane.b32.xlu1 %v1379_v36, %s5289_s29 }
 0xc43   :  { %v1382_v43 = vpop.permute.xlu0 %1381 }
 0xc44   :  { %v1392_v46 = vsel %vm278_vm4, %v1376_v45, %v1382_v43  ;;  %v4135_v45 = vld [vmem:[%s5281_s22 + $0x40] ss:$8 sps:$4 sm:$0xff]  }
 0xc47   :  { %v1386_v44 = vpop.permute.xlu1 %1385 }
 0xc48   :  { %v1393_v47 = vsel %vm704_vm5, %v1392_v46, %v1386_v44  ;;  %v4137_v44 = vld [vmem:[%s5281_s22 + $0x44] ss:$8 sps:$4 sm:$0xff]   ;;  %v4140_v46 = vld [vmem:[%s5281_s22 + $0x54] ss:$8 sps:$4 sm:$0xff]  }
 0xc4b   :  { %v1390_v48 = vpop.permute.xlu1 %1389 }
 0xc4c   :  { %v1394_v49 = vsel %vm706_vm6, %v1393_v47, %v1390_v48  ;;  %v4138_v47 = vld [vmem:[%s5281_s22 + $0x50] ss:$8 sps:$4 sm:$0xff]   ;;  %v4143_v48 = vld [vmem:[%s5281_s22 + $0x64] ss:$8 sps:$4 sm:$0xff]  }
 0xc4d   :  { %v1395_v50 = vpack.c.bf16 %v1394_v49, %v1394_v49  ;;  %v4141_v49 = vld [vmem:[%s5281_s22 + $0x60] ss:$8 sps:$4 sm:$0xff]  }
 0xc4f   :  { %3877 = vmatmul.mubr.msk.bf16.vlgmr.msra.gmra.mrb[32].mxu0 %vm71_vm0, %v1395_v50  ;;  %v4144_v50 = vld [vmem:[%s5281_s22 + $0x70] ss:$8 sps:$4 sm:$0xff]  }
 0xc50   :  { %3896 = vmatprep.mubr.msk.bf16.mxu0 %vm4292_vm3, %v4284_v24  ;;  %3881 = vmatpush3.bf16.msra.mxu0 %v4127_v9 }
 0xc51   :  { %3882 = vmatprep.subr.bf16.mxu0 %v4284_v24 }
 0xc54   :  { %3883 = vmatpush3.bf16.msra.mxu0 %v4128_v10 }
 0xc55   :  { %3884 = vmatprep.subr.bf16.mxu0 %v4284_v24 }
 0xc58   :  { %3885 = vmatpush3.bf16.msra.mxu0 %v4129_v11  ;;  %v4877_v11 = vld [vmem:[%s5230_s14] sm:$0xff] }
 0xc59   :  { %3886 = vmatprep.subr.bf16.mxu0 %v4284_v24 }
 0xc5c   :  { %3887 = vmatpush3.bf16.msra.mxu0 %v4130_v12 }
 0xc5d   :  { %3888 = vmatprep.subr.bf16.mxu0 %v4284_v24 }
 0xc60   :  { %3889 = vmatpush3.bf16.msra.mxu0 %v4131_v14 }
 0xc61   :  { %3890 = vmatprep.subr.bf16.mxu0 %v4284_v24 }
 0xc64   :  { %3891 = vmatpush3.bf16.msra.mxu0 %v4132_v15 }
 0xc65   :  { %3892 = vmatprep.subr.bf16.mxu0 %v4284_v24 }
 0xc68   :  { %3893 = vmatpush3.bf16.msra.mxu0 %v4133_v19 }
 0xc69   :  { %3894 = vmatprep.subr.bf16.mxu0 %v4284_v24 }
 0xc6c   :  { %3895 = vmatpush3.bf16.msra.mxu0 %v4134_v20 }
 0xc6d   :  { %3912 = vmatprep.subr.bf16.mxu0 %v4284_v24 }
 0xd22   :  { %v1465_v51 = vpop.f32.mrb[32].mxu0 }
 0xd23   :  { %v4736_v52 = vadd.f32 %v1465_v51, %v4600_v13  ;;  %v3878_v53 = vpop.f32.mrb[33].mxu0  ;;  %v4120_v13 = vld [vmem:[%s5239_s5 + $0x14] ss:$8 sps:$4 sm:$0xff]  }
 0xd24   :  { %v1468_v54 = vpop.f32.mrb[34].mxu0  ;;  %1539 = vmatprep.subr.bf16.mxu1 %v4120_v13  ;;  %v4146_v51 = vld [vmem:[%s5281_s22 + $0x74] ss:$8 sps:$4 sm:$0xff]   ;;  %s5290_s22 = smov 56  }
 0xd25   :  { %v3879_v55 = vpop.f32.mrb[35].mxu0  ;;  %v1472_v56 = vmul.f32 %v4736_v52, %v4736_v52  ;;  %1540 = vmatpush1.bf16.msra.mxu1 %v4118_v60 }
 0xd26   :  { %1541 = vmatprep.subr.bf16.mxu1 %v4123_v31  ;;  %v4842_v55 = vld [vmem:[%s5282_s24 + $0x4] sm:$0x7]  ;;  %s5292_s24 = smov 8  }
 0xd27   :  { %v1473_v57 = vsel %vm71_vm0, %v1472_v56, 0.0  ;;  %v1705_v56 = vrot.slane %v4842_v55, %v82_v17 }
 0xd28   :  { %1474 = vadd.xlane.f32.xlu0 %v1473_v57 }
 0xd29   :  { %1542 = vmatpush1.bf16.msra.mxu1 %v4121_v32 }
 0xd2a   :  { %1543 = vmatprep.subr.bf16.mxu1 %v4126_v61 }
 0xd2d   :  { %1544 = vmatpush1.bf16.msra.mxu1 %v4124_v38 }
 0xd2e   :  { %1760 = vmatprep.subr.bf16.mxu1 %v4137_v44  ;;  %v3498_v44 = vld [vmem:[%s5231_s8 + $0x30] sm:$0xff] }
 0xdb5   :  { %v1475_v62 = vpop.xlane.xlu0 %1474 }
 0xdb6   :  { %v1476_v63 = vmul.f32 0.015625, %v1475_v62 }
 0xdb8   :  { %v1477_v1 = vadd.f32 1e-05, %v1476_v63 }
 0xdba   :  { %4227 = vrsqrt.f32 %v1477_v1  ;;  %v4862_v1 = vld [vmem:[%s5228_s12] sm:$0xff] }
 0xdc4   :  { %v4228_v4 = vpop.eup %4227 }
 0xdc5   :  { %v1479_v5 = vmul.f32 %v4228_v4, %v4736_v52 }
 0xdc7   :  { %v1484_v7 = vmul.f32 %v1483_v27, %v1479_v5  ;;  %v4868_v27 = vld [vmem:[%s5229_s13] sm:$0xff]  ;;  %s5295_s13 = sld [smem:[#allocation6_spill]] }
 0xdc9   :  { %v1485_v8 = vpack.c.bf16 %v1484_v7, %v1484_v7 }
 0xdcb   :  { %3468 = vmatmul.mubr.msk.bf16.vlgmr.msra.gmra.mrb[44].mxu1 %vm71_vm0, %v1485_v8 }
 0xdcc   :  { %1792 = vmatprep.mubr.bf16.mxu1 %v4283_v6  ;;  %1761 = vmatpush1.bf16.msra.mxu1 %v4135_v45  ;;  %v3499_v45 = vld [vmem:[%s5231_s8 + $0x38] sm:$0xff] }
 0xdcd   :  { %1762 = vmatprep.subr.bf16.mxu1 %v4140_v46 }
 0xdd0   :  { %1763 = vmatpush1.bf16.msra.mxu1 %v4138_v47 }
 0xdd1   :  { %1764 = vmatprep.subr.bf16.mxu1 %v4143_v48 }
 0xdd4   :  { %1765 = vmatpush1.bf16.msra.mxu1 %v4141_v49 }
 0xdd5   :  { %1766 = vmatprep.subr.bf16.mxu1 %v4146_v51 }
 0xdd8   :  { %1767 = vmatpush1.bf16.msra.mxu1 %v4144_v50 }
 0xdd9   :  { %3900 = vmatprep.subr.bf16.mxu1 %v4284_v24 }
 0xe9e   :  { %v1571_v21 = vpop.f32.mrb[44].mxu1 }
 0xe9f   :  { %v3469_v22 = vmul.f32 -1.442695, %v1571_v21  ;;  %v1573_v0 = vpop.f32.mrb[45].mxu1 }
 0xea0   :  { %v1575_v23 = vpop.f32.mrb[46].mxu1 }
 0xea1   :  { %4229 = vpow2.f32 %v3469_v22  ;;  %v1576_v25 = vpop.f32.mrb[47].mxu1 }
 0xeab   :  { %v4230_v26 = vpop.eup %4229 }
 0xeac   :  { %v1581_v28 = vadd.f32 1.0, %v4230_v26 }
 0xeae   :  { %4231 = vrcp.f32 %v1581_v28 }
 0xeb8   :  { %v4232_v29 = vpop.eup %4231 }
 0xeb9   :  { %v1584_v33 = vmul.f32 %v4232_v29, %v1571_v21 }
 0xebb   :  { %v1585_v34 = vmul.f32 %v1584_v33, %v1573_v0 }
 0xebd   :  { %v1586_v35 = vpack.c.bf16 %v1585_v34, %v1585_v34 }
 0xebf   :  { %3897 = vmatmul.mubr.bf16.vlgmr.msra.gmra.mrb[36].mxu0 %v1586_v35 }
 0xec0   :  { %3914 = vmatprep.mubr.msk.bf16.mxu0 %vm4292_vm3, %v4284_v24 }
 0xf92   :  { %v1685_v36 = vpop.f32.mrb[36].mxu0 }
 0xf93   :  { %v4809_v37 = vadd.f32 %v1685_v36, %v4736_v52  ;;  %v3898_v39 = vpop.f32.mrb[37].mxu0 }
 0xf94   :  { %v1688_v40 = vpop.f32.mrb[38].mxu0  ;;  %v3497_v39 = vld [vmem:[%s5231_s8 + $0x28] sm:$0xff] }
 0xf95   :  { %v3899_v41 = vpop.f32.mrb[39].mxu0  ;;  %v1694_v18 = vmul.f32 %v4809_v37, %v4809_v37 }
 0xf97   :  { %v1695_v43 = vsel %vm71_vm0, %v1694_v18, 0.0 }
 0xf98   :  { %1696 = vadd.xlane.f32.xlu1 %v1695_v43 }
0x1025   :  { %v1697_v52 = vpop.xlane.xlu1 %1696 }
0x1026   :  { %v1698_v53 = vmul.f32 0.015625, %v1697_v52 }
0x1028   :  { %v1699_v54 = vadd.f32 1e-05, %v1698_v53 }
0x102a   :  { %4233 = vrsqrt.f32 %v1699_v54 }
0x1034   :  { %v4234_v57 = vpop.eup %4233 }
0x1035   :  { %v1701_v58 = vmul.f32 %v4234_v57, %v4809_v37  ;;  %v3500_v57 = vld [vmem:[%s5283_s26 + $0x20] sm:$0xff] }
0x1037   :  { %v1706_v59 = vmul.f32 %v1705_v56, %v1701_v58 }
0x1039   :  { %v1707_v13 = vpack.c.bf16 %v1706_v59, %v1706_v59 }
0x103b   :  { %3495 = vmatmul.mubr.msk.bf16.vlgmr.msra.gmra.mrb[48].mxu1 %vm71_vm0, %v1707_v13 }
0x103c   :  { %3902 = vmatprep.mubr.msk.bf16.mxu1 %vm4292_vm3, %v4284_v24 }
0x110e   :  { %v1794_v60 = vpop.f32.mrb[48].mxu1 }
0x110f   :  { %1805 = vrot.lane.b32.xlu1 %v1794_v60, %s5290_s22  ;;  %1802 = vrot.lane.b32.xlu0 %v1794_v60, %s5291_s0  ;;  %v4853_v31 = vpop.f32.mrb[49].mxu1  ;;  %v1816_v3 = vmul.f32 %v4862_v1, %v1794_v60  ;;  %v1833_v15 = vmul.f32 %v1794_v60, %v4479_v42  ;;  %v3496_v42 = vld [vmem:[%s5231_s8 + $0x20] sm:$0xff]  ;;  %s5298_s8 = sld [smem:[#allocation9_spill]] }
0x1110   :  { %v1798_v32 = vpop.f32.mrb[50].mxu1  ;;  %v1889_v13 = vpack.c.bf16 %v4853_v31, %v3500_v57 }
0x1111   :  { %v1799_v38 = vpop.f32.mrb[51].mxu1 }
0x1113   :  { %1812 = vrot.lane.b32.xlu1 %v1794_v60, %s5292_s24  ;;  %1809 = vrot.lane.b32.xlu0 %v1794_v60, %s5293_s20 }
0x1181   :  { %v1806_v17 = vpop.permute.xlu1 %1805  ;;  %v1803_v61 = vpop.permute.xlu0 %1802 }
0x1182   :  { %v1808_v62 = vsel %vm185_vm1, %v1803_v61, %v1806_v17  ;;  %v1831_v63 = vsel %vm185_vm1, %v1806_v17, %v1803_v61 }
0x1183   :  { %v1817_v4 = vmul.f32 %v4868_v27, %v1808_v62  ;;  %v1834_v5 = vmul.f32 %v4868_v27, %v1831_v63  ;;  %v4281_v62 = vld [vmem:[%s5232_s15] sm:$0xff] }
0x1185   :  { %v1818_v7 = vadd.f32 %v1817_v4, %v1816_v3  ;;  %v1813_v8 = vpop.permute.xlu1 %1812  ;;  %1836 = vrot.lane.b32.xlu0 %v1834_v5, %s5294_s18  ;;  %v1810_v9 = vpop.permute.xlu0 %1809 }
0x1186   :  { %v1832_v10 = vsel %vm193_vm2, %v1813_v8, %v1810_v9  ;;  %v1815_v22 = vsel %vm193_vm2, %v1810_v9, %v1813_v8 }
0x1187   :  { %v1840_v12 = vmul.f32 %v4877_v11, %v1832_v10  ;;  %v1819_v0 = vmul.f32 %v4877_v11, %v1815_v22 }
0x1189   :  { %1842 = vrot.lane.b32.xlu1 %v1840_v12, %s5294_s18  ;;  %v1820_v26 = vadd.f32 %v1819_v0, %v1818_v7 }
0x118b   :  { %v1893_v36 = vpack.c.bf16 %v1820_v26, %v1820_v26 }
0x11f7   :  { %v1837_v14 = vpop.permute.xlu0 %1836 }
0x11f8   :  { %v1839_v19 = vadd.f32 %v1837_v14, %v1833_v15 }
0x11fb   :  { %v1843_v20 = vpop.permute.xlu1 %1842 }
0x11fc   :  { %v1845_v21 = vadd.f32 %v1843_v20, %v1839_v19 }
0x11fe   :  { %1849 = vrot.lane.b32.xlu1 %v1845_v21, %s5285_s23  ;;  %1847 = vrot.lane.b32.xlu0 %v1845_v21, %s5284_s7 }
0x1202   :  { %1868 = vrot.lane.b32.xlu1 %v1845_v21, %s5294_s18  ;;  %1851 = vrot.lane.b32.xlu0 %v1845_v21, %s5286_s9 }
0x1270   :  { %v1850_v23 = vpop.permute.xlu1 %1849  ;;  %v1848_v25 = vpop.permute.xlu0 %1847 }
0x1271   :  { %1870 = vrot.lane.b32.xlu0 %v1848_v25, %s5294_s18 }
0x1274   :  { %v1869_v28 = vpop.permute.xlu1 %1868  ;;  %v1852_v29 = vpop.permute.xlu0 %1851 }
0x1275   :  { %v1880_v33 = vpack.c.bf16 %v1869_v28, %v3496_v42  ;;  %v4078_v34 = vpack.i.bf16 %v1852_v29, %v1850_v23  ;;  %1822 = vrot.lane.b32.xlu0 %v1820_v26, %s5284_s7 }
0x1277   :  { %v1901_v35 = vsel %vm278_vm4, %v1880_v33, 0  ;;  %4079 = vrot.lane.b32.xlu1 %v4078_v34, %s5294_s18 }
0x1278   :  { %3901 = vmatpush3.bf16.xpose.msra.mxu1 %v1901_v35 }
0x1279   :  { %1828 = vrot.lane.b32.xlu0 %v1820_v26, %s5286_s9  ;;  %3906 = vmatprep.subr.bf16.mxu1 %v4284_v24 }
0x127b   :  { %1825 = vrot.lane.b32.xlu1 %v1820_v26, %s5285_s23 }
0x127f   :  { %3903 = vmatmul.mubr.msk.bf16.vlgmr.msra.gmra.mrb[52].mxu1 %vm278_vm4, %v1893_v36 }
0x1280   :  { %3908 = vmatprep.mubr.msk.bf16.mxu1 %vm4292_vm3, %v4284_v24 }
0x12e3   :  { %v1871_v40 = vpop.permute.xlu0 %1870 }
0x12e4   :  { %v1881_v41 = vpack.c.bf16 %v1871_v40, %v3497_v39  ;;  %v3502_v39 = vld [vmem:[%s5283_s26 + $0x30] sm:$0xff] }
0x12e6   :  { %v1947_v18 = vsel %vm278_vm4, %v1881_v41, 0 }
0x12e7   :  { %3907 = vmatpush3.bf16.xpose.msra.mxu1 %v1947_v18  ;;  %v1823_v43 = vpop.permute.xlu0 %1822 }
0x12e8   :  { %3918 = vmatprep.subr.bf16.mxu1 %v4284_v24  ;;  %v1894_v49 = vpack.c.bf16 %v1823_v43, %v1823_v43 }
0x12e9   :  { %v4080_v46 = vpop.permute.xlu1 %4079 }
0x12ea   :  { %v4082_v47 = vunpack.i.h.bf16 %v4080_v46  ;;  %v4081_v48 = vunpack.i.l.bf16 %v4080_v46 }
0x12eb   :  { %v1829_v54 = vpop.permute.xlu0 %1828 }
0x12ec   :  { %v1883_v50 = vpack.c.bf16 %v4082_v47, %v3499_v45  ;;  %v1882_v51 = vpack.c.bf16 %v4081_v48, %v3498_v44  ;;  %v1896_v58 = vpack.c.bf16 %v1829_v54, %v1829_v54 }
0x12ed   :  { %v1826_v56 = vpop.permute.xlu1 %1825 }
0x12ee   :  { %3909 = vmatmul.mubr.msk.bf16.vlgmr.msra.gmra.mrb[56].mxu1 %vm278_vm4, %v1894_v49  ;;  %v1993_v52 = vsel %vm278_vm4, %v1882_v51, 0  ;;  %v2039_v53 = vsel %vm278_vm4, %v1883_v50, 0  ;;  %v1895_v59 = vpack.c.bf16 %v1826_v56, %v1826_v56  ;;  %v3501_v50 = vld [vmem:[%s5283_s26 + $0x28] sm:$0xff]  ;;  %v3503_v56 = vld [vmem:[%s5283_s26 + $0x38] sm:$0xff] }
0x12ef   :  { %3913 = vmatpush3.bf16.xpose.msra.mxu0 %v1993_v52  ;;  %3919 = vmatpush3.bf16.xpose.msra.mxu1 %v2039_v53 }
0x12f0   :  { %3920 = vmatprep.mubr.msk.bf16.mxu1 %vm4292_vm3, %v4284_v24  ;;  %3924 = vmatprep.subr.bf16.mxu0 %v4284_v24 }
0x12f1   :  { %3930 = vmatprep.subr.bf16.mxu1 %v4284_v24 }
0x12f6   :  { %3915 = vmatmul.mubr.msk.bf16.vlgmr.msra.gmra.mrb[40].mxu0 %vm278_vm4, %v1895_v59  ;;  %3921 = vmatmul.mubr.msk.bf16.vlgmr.msra.gmra.mrb[60].mxu1 %vm278_vm4, %v1896_v58 }
0x12f7   :  { %3925 = vmatpush3.bf16.msra.mxu0 %v1889_v13  ;;  %3926 = vmatprep.mubr.msk.bf16.mxu0 %vm4292_vm3, %v4284_v24 }
0x12f8   :  { %3936 = vmatprep.subr.bf16.mxu0 %v4284_v24  ;;  %3932 = vmatprep.mubr.msk.bf16.mxu1 %vm4292_vm3, %v4284_v24 }
0x1352   :  { %v1937_v60 = vpop.f32.mrb[52].mxu1 }
0x1353   :  { %v2081_v32 = vmul.f32 0.25, %v1937_v60  ;;  %v3904_v38 = vpop.f32.mrb[53].mxu1 }
0x1354   :  { %v1940_v17 = vpop.f32.mrb[54].mxu1 }
0x1355   :  { %v3905_v61 = vpop.f32.mrb[55].mxu1  ;;  %v2085_v63 = vadd.f32 %v4281_v62, %v2081_v32 }
0x1357   :  { %v2089_v3 = vsel %vm278_vm4, %v2085_v63, -inf }
0x1358   :  { %2090 = vmax.xlane.f32.xlu1 %v2089_v3 }
0x1369   :  { %1857 = vrot.lane.b32.xlu1 %v4853_v31, %s5285_s23 }
0x13c1   :  { %v1983_v4 = vpop.f32.mrb[56].mxu1 }
0x13c2   :  { %v2082_v5 = vmul.f32 0.25, %v1983_v4  ;;  %v3910_v7 = vpop.f32.mrb[57].mxu1  ;;  %v4147_v4 = vld [vmem:[%s5233_s2 + $0x20] sm:$0xff]  }
0x13c3   :  { %v1986_v8 = vpop.f32.mrb[58].mxu1 }
0x13c4   :  { %v3911_v9 = vpop.f32.mrb[59].mxu1  ;;  %v2086_v10 = vadd.f32 %v4281_v62, %v2082_v5 }
0x13c6   :  { %v2092_v12 = vsel %vm278_vm4, %v2086_v10, -inf }
0x13c7   :  { %2093 = vmax.xlane.f32.xlu0 %v2092_v12  ;;  %v4148_v12 = vld [vmem:[%s5233_s2 + $0x28] sm:$0xff]  }
0x13c9   :  { %v2029_v14 = vpop.f32.mrb[40].mxu0  ;;  %v2075_v15 = vpop.f32.mrb[60].mxu1 }
0x13ca   :  { %v2083_v19 = vmul.f32 0.25, %v2029_v14  ;;  %v2084_v20 = vmul.f32 0.25, %v2075_v15  ;;  %v3916_v21 = vpop.f32.mrb[41].mxu0  ;;  %v3922_v22 = vpop.f32.mrb[61].mxu1  ;;  %v4149_v14 = vld [vmem:[%s5233_s2 + $0x30] sm:$0xff]  }
0x13cb   :  { %v2032_v0 = vpop.f32.mrb[42].mxu0  ;;  %v2078_v23 = vpop.f32.mrb[62].mxu1 }
0x13cc   :  { %v3917_v25 = vpop.f32.mrb[43].mxu0  ;;  %v3923_v42 = vpop.f32.mrb[63].mxu1  ;;  %v2088_v26 = vadd.f32 %v4281_v62, %v2084_v20  ;;  %v2087_v28 = vadd.f32 %v4281_v62, %v2083_v19  ;;  %v4150_v20 = vld [vmem:[%s5233_s2 + $0x38] sm:$0xff]  }
0x13ce   :  { %v2098_v29 = vsel %vm278_vm4, %v2088_v26, -inf  ;;  %v2095_v33 = vsel %vm278_vm4, %v2087_v28, -inf }
0x13cf   :  { %2099 = vmax.xlane.f32.xlu1 %v2098_v29  ;;  %2096 = vmax.xlane.f32.xlu0 %v2095_v33 }
0x13e0   :  { %1860 = vrot.lane.b32.xlu1 %v4853_v31, %s5286_s9 }
0x13e5   :  { %v2091_v34 = vpop.xlane.xlu1 %2090  ;;  %1854 = vrot.lane.b32.xlu0 %v4853_v31, %s5284_s7 }
0x13e6   :  { %v2101_v35 = vsub.f32 %v2085_v63, %v2091_v34 }
0x13e8   :  { %v2105_v36 = vmul.f32 1.442695, %v2101_v35 }
0x13e9   :  { %v1858_v40 = vpop.permute.xlu1 %1857 }
0x13ea   :  { %4235 = vpow2.f32 %v2105_v36  ;;  %v1891_v43 = vpack.c.bf16 %v1858_v40, %v3502_v39 }
0x13f4   :  { %v4236_v41 = vpop.eup %4235 }
0x13f5   :  { %v2125_v18 = vpack.c.bf16 %v4236_v41, %v4236_v41  ;;  %v2113_v3 = vsel %vm278_vm4, %v4236_v41, 0.0 }
0x13f7   :  { %3927 = vmatmul.mubr.msk.bf16.vlgmr.msra.gmra.mrb[44].mxu0 %vm278_vm4, %v2125_v18 }
0x13f8   :  { %3937 = vmatpush3.bf16.msra.mxu0 %v1891_v43  ;;  %3938 = vmatprep.mubr.msk.bf16.mxu0 %vm4292_vm3, %v4284_v24 }
0x13f9   :  { %3948 = vmatprep.subr.bf16.mxu0 %v4284_v24 }
0x1454   :  { %v2094_v31 = vpop.xlane.xlu0 %2093 }
0x1455   :  { %v2102_v44 = vsub.f32 %v2086_v10, %v2094_v31 }
0x1457   :  { %v2107_v45 = vmul.f32 1.442695, %v2102_v44 }
0x1459   :  { %4237 = vpow2.f32 %v2107_v45 }
0x145c   :  { %v2100_v46 = vpop.xlane.xlu1 %2099  ;;  %v2097_v47 = vpop.xlane.xlu0 %2096 }
0x145d   :  { %v2104_v48 = vsub.f32 %v2088_v26, %v2100_v46  ;;  %v2103_v49 = vsub.f32 %v2087_v28, %v2097_v47 }
0x145f   :  { %v2111_v51 = vmul.f32 1.442695, %v2104_v48  ;;  %v2109_v52 = vmul.f32 1.442695, %v2103_v49 }
0x1460   :  { %v1855_v53 = vpop.permute.xlu0 %1854  ;;  %v1861_v57 = vpop.permute.xlu1 %1860 }
0x1461   :  { %4239 = vpow2.f32 %v2111_v51  ;;  %v1890_v54 = vpack.c.bf16 %v1855_v53, %v3501_v50  ;;  %v1892_v60 = vpack.c.bf16 %v1861_v57, %v3503_v56 }
0x1462   :  { %4241 = vpow2.f32 %v2109_v52 }
0x1463   :  { %v4238_v58 = vpop.eup %4237  ;;  %3931 = vmatpush3.bf16.msra.mxu1 %v1890_v54 }
0x1464   :  { %v2116_v59 = vsel %vm278_vm4, %v4238_v58, 0.0  ;;  %v2126_v13 = vpack.c.bf16 %v4238_v58, %v4238_v58  ;;  %3942 = vmatprep.subr.bf16.mxu1 %v4284_v24 }
0x1465   :  { %2117 = vadd.xlane.f32.xlu0 %v2116_v59 }
0x1466   :  { %3933 = vmatmul.mubr.msk.bf16.vlgmr.msra.gmra.mrb[64].mxu1 %vm278_vm4, %v2126_v13 }
0x1467   :  { %3943 = vmatpush3.bf16.msra.mxu1 %v1892_v60  ;;  %3944 = vmatprep.mubr.msk.bf16.mxu1 %vm4292_vm3, %v4284_v24  ;;  %v4151_v60 = vld [vmem:[%s5234_s3 + $0x20] sm:$0xff]  }
0x1468   :  { %3960 = vmatprep.subr.bf16.mxu1 %v4284_v24 }
0x146b   :  { %v4240_v32 = vpop.eup %4239 }
0x146c   :  { %v4242_v38 = vpop.eup %4241  ;;  %v2122_v17 = vsel %vm278_vm4, %v4240_v32, 0.0  ;;  %v2128_v61 = vpack.c.bf16 %v4240_v32, %v4240_v32  ;;  %v4153_v32 = vld [vmem:[%s5234_s3 + $0x30] sm:$0xff]  }
0x146d   :  { %2123 = vadd.xlane.f32.xlu0 %v2122_v17  ;;  %v2119_v62 = vsel %vm278_vm4, %v4242_v38, 0.0  ;;  %v2127_v63 = vpack.c.bf16 %v4242_v38, %v4242_v38  ;;  %v4154_v38 = vld [vmem:[%s5234_s3 + $0x38] sm:$0xff]  }
0x146e   :  { %2120 = vadd.xlane.f32.xlu1 %v2119_v62  ;;  %3945 = vmatmul.mubr.msk.bf16.vlgmr.msra.gmra.mrb[68].mxu1 %vm278_vm4, %v2128_v61 }
0x146f   :  { %3939 = vmatmul.mubr.msk.bf16.vlgmr.msra.gmra.mrb[48].mxu0 %vm278_vm4, %v2127_v63  ;;  %3968 = vmatprep.mubr.msk.bf16.mxu1 %vm4292_vm3, %v4284_v24  ;;  %v2413_v63 = vrot.slane %v4842_v55, %v795_v30 }
0x1470   :  { %3956 = vmatprep.mubr.msk.bf16.mxu0 %vm4292_vm3, %v4284_v24  ;;  %3949 = vmatpush3.bf16.msra.mxu0 %v4147_v4 }
0x1471   :  { %2114 = vadd.xlane.f32.xlu0 %v2113_v3  ;;  %3950 = vmatprep.subr.bf16.mxu0 %v4284_v24 }
0x1472   :  { %3961 = vmatpush3.bf16.msra.mxu1 %v4151_v60 }
0x1473   :  { %3962 = vmatprep.subr.bf16.mxu1 %v4284_v24 }
0x1474   :  { %3951 = vmatpush3.bf16.msra.mxu0 %v4148_v12 }
0x1475   :  { %3952 = vmatprep.subr.bf16.mxu0 %v4284_v24 }
0x1478   :  { %3953 = vmatpush3.bf16.msra.mxu0 %v4149_v14 }
0x1479   :  { %3954 = vmatprep.subr.bf16.mxu0 %v4284_v24 }
0x147c   :  { %3955 = vmatpush3.bf16.msra.mxu0 %v4150_v20 }
0x147d   :  { %3972 = vmatprep.subr.bf16.mxu0 %v4284_v24 }
0x14ca   :  { %v2166_v5 = vpop.f32.mrb[44].mxu0 }
0x14cb   :  { %v3928_v7 = vpop.f32.mrb[45].mxu0 }
0x14cc   :  { %v2169_v8 = vpop.f32.mrb[46].mxu0 }
0x14cd   :  { %v3929_v9 = vpop.f32.mrb[47].mxu0  ;;  %v4155_v8 = vld [vmem:[%s5235_s10 + $0x20] sm:$0xff]  }
0x14ce   :  { %v2553_v9 = vsel %vm278_vm4, %v4155_v8, 0 }
0x14f2   :  { %v2118_v10 = vpop.xlane.xlu0 %2117 }
0x14f3   :  { %4243 = vrcp.f32 %v2118_v10 }
0x14fa   :  { %v2124_v15 = vpop.xlane.xlu0 %2123 }
0x14fb   :  { %v2121_v19 = vpop.xlane.xlu1 %2120  ;;  %4245 = vrcp.f32 %v2124_v15  ;;  %v4156_v15 = vld [vmem:[%s5235_s10 + $0x28] sm:$0xff]  }
0x14fc   :  { %4247 = vrcp.f32 %v2121_v19  ;;  %v2604_v19 = vsel %vm278_vm4, %v4156_v15, 0 }
0x14fd   :  { %v4244_v21 = vpop.eup %4243 }
0x14fe   :  { %v2115_v31 = vpop.xlane.xlu0 %2114 }
0x14ff   :  { %4249 = vrcp.f32 %v2115_v31 }
0x1505   :  { %v4246_v26 = vpop.eup %4245 }
0x1506   :  { %v4248_v29 = vpop.eup %4247 }
0x1509   :  { %v4250_v44 = vpop.eup %4249 }
0x150a   :  { %v2305_v46 = vmul.f32 %v4250_v44, %v2166_v5 }
0x1539   :  { %v2209_v22 = vpop.f32.mrb[64].mxu1 }
0x153a   :  { %v2306_v0 = vmul.f32 %v4244_v21, %v2209_v22  ;;  %v3934_v23 = vpop.f32.mrb[65].mxu1 }
0x153b   :  { %v2212_v25 = vpop.f32.mrb[66].mxu1 }
0x153c   :  { %v3935_v42 = vpop.f32.mrb[67].mxu1  ;;  %2310 = vrot.lane.b32.xlu1 %v2306_v0, %s5287_s25 }
0x1541   :  { %v2295_v28 = vpop.f32.mrb[68].mxu1 }
0x1542   :  { %v2252_v33 = vpop.f32.mrb[48].mxu0  ;;  %v2308_v34 = vmul.f32 %v4246_v26, %v2295_v28  ;;  %v3946_v35 = vpop.f32.mrb[69].mxu1 }
0x1543   :  { %v2307_v36 = vmul.f32 %v4248_v29, %v2252_v33  ;;  %v3940_v39 = vpop.f32.mrb[49].mxu0  ;;  %v2298_v40 = vpop.f32.mrb[70].mxu1  ;;  %v4157_v33 = vld [vmem:[%s5235_s10 + $0x30] sm:$0xff]  }
0x1544   :  { %v2255_v41 = vpop.f32.mrb[50].mxu0  ;;  %v3947_v18 = vpop.f32.mrb[71].mxu1  ;;  %2318 = vrot.lane.b32.xlu1 %v2308_v34, %s5289_s29 }
0x1545   :  { %2314 = vrot.lane.b32.xlu0 %v2307_v36, %s5288_s30  ;;  %v3941_v43 = vpop.f32.mrb[51].mxu0  ;;  %v2655_v36 = vsel %vm278_vm4, %v4157_v33, 0 }
0x15ae   :  { %v2311_v45 = vpop.permute.xlu1 %2310 }
0x15af   :  { %v2321_v48 = vsel %vm278_vm4, %v2305_v46, %v2311_v45 }
0x15b6   :  { %v2319_v47 = vpop.permute.xlu1 %2318 }
0x15b7   :  { %v2315_v49 = vpop.permute.xlu0 %2314 }
0x15b8   :  { %v2322_v50 = vsel %vm704_vm5, %v2321_v48, %v2315_v49  ;;  %v4282_v48 = vld [vmem:[%s5236_s16] sm:$0xff] }
0x15b9   :  { %v2323_v51 = vsel %vm706_vm6, %v2322_v50, %v2319_v47 }
0x15ba   :  { %v2324_v52 = vpack.c.bf16 %v2323_v51, %v2323_v51  ;;  %v4159_v51 = vld [vmem:[%s5237_s11 + $0x20] sm:$0xff]  }
0x15bc   :  { %3957 = vmatmul.mubr.msk.bf16.vlgmr.msra.gmra.mrb[52].mxu0 %vm71_vm0, %v2324_v52 }
0x15bd   :  { %3974 = vmatprep.mubr.msk.bf16.mxu0 %vm4292_vm3, %v4284_v24  ;;  %3973 = vmatpush3.bf16.xpose.msra.mxu0 %v2553_v9 }
0x15be   :  { %3984 = vmatprep.subr.bf16.mxu0 %v4284_v24 }
0x168f   :  { %v2395_v53 = vpop.f32.mrb[52].mxu0 }
0x1690   :  { %v4997_v54 = vadd.f32 %v2395_v53, %v4809_v37  ;;  %v3958_v56 = vpop.f32.mrb[53].mxu0  ;;  %v4152_v37 = vld [vmem:[%s5234_s3 + $0x28] sm:$0xff]  }
0x1691   :  { %v2398_v57 = vpop.f32.mrb[54].mxu0  ;;  %3963 = vmatpush3.bf16.msra.mxu1 %v4152_v37 }
0x1692   :  { %v3959_v58 = vpop.f32.mrb[55].mxu0  ;;  %v2402_v59 = vmul.f32 %v4997_v54, %v4997_v54  ;;  %3964 = vmatprep.subr.bf16.mxu1 %v4284_v24 }
0x1694   :  { %v2403_v13 = vsel %vm71_vm0, %v2402_v59, 0.0 }
0x1695   :  { %2404 = vadd.xlane.f32.xlu1 %v2403_v13  ;;  %3965 = vmatpush3.bf16.msra.mxu1 %v4153_v32 }
0x1696   :  { %3966 = vmatprep.subr.bf16.mxu1 %v4284_v24 }
0x1699   :  { %3967 = vmatpush3.bf16.msra.mxu1 %v4154_v38 }
0x169a   :  { %3978 = vmatprep.subr.bf16.mxu1 %v4284_v24 }
0x1722   :  { %v2405_v17 = vpop.xlane.xlu1 %2404 }
0x1723   :  { %v2406_v61 = vmul.f32 0.015625, %v2405_v17 }
0x1725   :  { %v2407_v62 = vadd.f32 1e-05, %v2406_v61 }
0x1727   :  { %4251 = vrsqrt.f32 %v2407_v62 }
0x1731   :  { %v4252_v3 = vpop.eup %4251 }
0x1732   :  { %v2409_v4 = vmul.f32 %v4252_v3, %v4997_v54 }
0x1734   :  { %v2414_v5 = vmul.f32 %v2413_v63, %v2409_v4 }
0x1736   :  { %v2415_v7 = vpack.c.bf16 %v2414_v5, %v2414_v5 }
0x1738   :  { %3969 = vmatmul.mubr.msk.bf16.vlgmr.msra.gmra.mrb[72].mxu1 %vm71_vm0, %v2415_v7 }
0x1739   :  { %3980 = vmatprep.mubr.msk.bf16.mxu1 %vm4292_vm3, %v4284_v24  ;;  %3979 = vmatpush3.bf16.xpose.msra.mxu1 %v2604_v19  ;;  %v4161_v19 = vld [vmem:[%s5237_s11 + $0x30] sm:$0xff]  }
0x173a   :  { %3990 = vmatprep.subr.bf16.mxu1 %v4284_v24 }
0x180b   :  { %v2486_v10 = vpop.f32.mrb[72].mxu1 }
0x180c   :  { %2493 = vrot.lane.b32.xlu0 %v2486_v10, %s5291_s0  ;;  %v3970_v30 = vpop.f32.mrb[73].mxu1  ;;  %v2507_v25 = vmul.f32 %v4862_v1, %v2486_v10  ;;  %v4158_v1 = vld [vmem:[%s5235_s10 + $0x38] sm:$0xff]  }
0x180d   :  { %v2489_v12 = vpop.f32.mrb[74].mxu1  ;;  %v2706_v39 = vsel %vm278_vm4, %v4158_v1, 0  ;;  %v4160_v30 = vld [vmem:[%s5237_s11 + $0x28] sm:$0xff]  }
0x180e   :  { %v3971_v14 = vpop.f32.mrb[75].mxu1 }
0x1810   :  { %2496 = vrot.lane.b32.xlu0 %v2486_v10, %s5290_s22 }
0x1814   :  { %2500 = vrot.lane.b32.xlu0 %v2486_v10, %s5293_s20 }
0x1818   :  { %2503 = vrot.lane.b32.xlu0 %v2486_v10, %s5292_s24 }
0x187e   :  { %v2494_v20 = vpop.permute.xlu0 %2493 }
0x1882   :  { %v2497_v21 = vpop.permute.xlu0 %2496 }
0x1883   :  { %v2499_v22 = vsel %vm185_vm1, %v2494_v20, %v2497_v21 }
0x1884   :  { %v2508_v23 = vmul.f32 %v4868_v27, %v2499_v22 }
0x1886   :  { %v2501_v0 = vpop.permute.xlu0 %2500  ;;  %v2509_v28 = vadd.f32 %v2508_v23, %v2507_v25 }
0x188a   :  { %v2504_v42 = vpop.permute.xlu0 %2503 }
0x188b   :  { %v2506_v26 = vsel %vm193_vm2, %v2501_v0, %v2504_v42 }
0x188c   :  { %v2510_v29 = vmul.f32 %v4877_v11, %v2506_v26 }
0x188e   :  { %v2511_v34 = vadd.f32 %v2510_v29, %v2509_v28 }
0x1890   :  { %2513 = vrot.lane.b32.xlu0 %v2511_v34, %s5284_s7  ;;  %v2540_v35 = vpack.c.bf16 %v2511_v34, %v2511_v34 }
0x1892   :  { %3975 = vmatmul.mubr.msk.bf16.vlgmr.msra.gmra.mrb[56].mxu0 %vm278_vm4, %v2540_v35 }
0x1893   :  { %3985 = vmatpush3.bf16.xpose.msra.mxu0 %v2655_v36  ;;  %3986 = vmatprep.mubr.msk.bf16.mxu0 %vm4292_vm3, %v4284_v24 }
0x1894   :  { %2516 = vrot.lane.b32.xlu0 %v2511_v34, %s5285_s23  ;;  %3996 = vmatprep.subr.bf16.mxu0 %v4284_v24  ;;  %s5297_s23 = sld [smem:[#allocation8_spill]] }
0x1898   :  { %2519 = vrot.lane.b32.xlu0 %v2511_v34, %s5286_s9  ;;  %v4162_v34 = vld [vmem:[%s5237_s11 + $0x38] sm:$0xff]  }
0x1902   :  { %v2514_v27 = vpop.permute.xlu0 %2513 }
0x1903   :  { %v2541_v11 = vpack.c.bf16 %v2514_v27, %v2514_v27 }
0x1905   :  { %3981 = vmatmul.mubr.msk.bf16.vlgmr.msra.gmra.mrb[76].mxu1 %vm278_vm4, %v2541_v11 }
0x1906   :  { %3991 = vmatpush3.bf16.xpose.msra.mxu1 %v2706_v39  ;;  %v2517_v40 = vpop.permute.xlu0 %2516  ;;  %3992 = vmatprep.mubr.msk.bf16.mxu1 %vm4292_vm3, %v4284_v24 }
0x1907   :  { %v2542_v41 = vpack.c.bf16 %v2517_v40, %v2517_v40  ;;  %4002 = vmatprep.subr.bf16.mxu1 %v4284_v24 }
0x1909   :  { %3987 = vmatmul.mubr.msk.bf16.vlgmr.msra.gmra.mrb[60].mxu0 %vm278_vm4, %v2542_v41 }
0x190a   :  { %v2520_v18 = vpop.permute.xlu0 %2519  ;;  %3998 = vmatprep.mubr.msk.bf16.mxu0 %vm4292_vm3, %v4284_v24  ;;  %3997 = vmatpush3.bf16.msra.mxu0 %v4159_v51  ;;  %v4166_v51 = vld [vmem:[%s5295_s13 + $0x38] sm:$0xff]  }
0x190b   :  { %v2543_v43 = vpack.c.bf16 %v2520_v18, %v2520_v18  ;;  %4008 = vmatprep.subr.bf16.mxu0 %v4284_v24 }
0x190d   :  { %3993 = vmatmul.mubr.msk.bf16.vlgmr.msra.gmra.mrb[80].mxu1 %vm278_vm4, %v2543_v43  ;;  %v4163_v43 = vld [vmem:[%s5295_s13 + $0x20] sm:$0xff]  }
0x190e   :  { %4004 = vmatprep.mubr.msk.bf16.mxu1 %vm4292_vm3, %v4284_v24  ;;  %4003 = vmatpush3.bf16.msra.mxu1 %v4160_v30 }
0x190f   :  { %4014 = vmatprep.subr.bf16.mxu1 %v4284_v24 }
0x1965   :  { %v2589_v31 = vpop.f32.mrb[56].mxu0 }
0x1966   :  { %v2748_v44 = vmul.f32 0.25, %v2589_v31  ;;  %v3976_v45 = vpop.f32.mrb[57].mxu0 }
0x1967   :  { %v2592_v46 = vpop.f32.mrb[58].mxu0 }
0x1968   :  { %v3977_v47 = vpop.f32.mrb[59].mxu0  ;;  %v2752_v49 = vadd.f32 %v4282_v48, %v2748_v44 }
0x196a   :  { %v2756_v50 = vsel %vm278_vm4, %v2752_v49, -inf }
0x196b   :  { %2757 = vmax.xlane.f32.xlu0 %v2756_v50 }
0x19d8   :  { %v2640_v52 = vpop.f32.mrb[76].mxu1 }
0x19d9   :  { %v2749_v53 = vmul.f32 0.25, %v2640_v52  ;;  %v3982_v56 = vpop.f32.mrb[77].mxu1 }
0x19da   :  { %v2643_v57 = vpop.f32.mrb[78].mxu1 }
0x19db   :  { %v3983_v58 = vpop.f32.mrb[79].mxu1  ;;  %v2753_v59 = vadd.f32 %v4282_v48, %v2749_v53 }
0x19dc   :  { %v2691_v13 = vpop.f32.mrb[60].mxu0 }
0x19dd   :  { %v2750_v60 = vmul.f32 0.25, %v2691_v13  ;;  %v3988_v37 = vpop.f32.mrb[61].mxu0  ;;  %v2759_v32 = vsel %vm278_vm4, %v2753_v59, -inf }
0x19de   :  { %2760 = vmax.xlane.f32.xlu1 %v2759_v32  ;;  %v2694_v38 = vpop.f32.mrb[62].mxu0 }
0x19df   :  { %v3989_v17 = vpop.f32.mrb[63].mxu0  ;;  %v2754_v61 = vadd.f32 %v4282_v48, %v2750_v60 }
0x19e0   :  { %v2742_v62 = vpop.f32.mrb[80].mxu1 }
0x19e1   :  { %v2751_v63 = vmul.f32 0.25, %v2742_v62  ;;  %v3994_v3 = vpop.f32.mrb[81].mxu1  ;;  %v2762_v4 = vsel %vm278_vm4, %v2754_v61, -inf }
0x19e2   :  { %v2745_v5 = vpop.f32.mrb[82].mxu1  ;;  %2763 = vmax.xlane.f32.xlu1 %v2762_v4 }
0x19e3   :  { %v3995_v7 = vpop.f32.mrb[83].mxu1  ;;  %v2755_v8 = vadd.f32 %v4282_v48, %v2751_v63  ;;  %v4164_v48 = vld [vmem:[%s5295_s13 + $0x28] sm:$0xff]  }
0x19e5   :  { %v2765_v9 = vsel %vm278_vm4, %v2755_v8, -inf }
0x19e6   :  { %2766 = vmax.xlane.f32.xlu1 %v2765_v9 }
0x19f8   :  { %v2758_v10 = vpop.xlane.xlu0 %2757 }
0x19f9   :  { %v2768_v12 = vsub.f32 %v2752_v49, %v2758_v10  ;;  %v4165_v49 = vld [vmem:[%s5295_s13 + $0x30] sm:$0xff]  }
0x19fb   :  { %v2772_v14 = vmul.f32 1.442695, %v2768_v12 }
0x19fd   :  { %4253 = vpow2.f32 %v2772_v14 }
0x1a07   :  { %v4254_v15 = vpop.eup %4253 }
0x1a08   :  { %v2792_v20 = vpack.c.bf16 %v4254_v15, %v4254_v15  ;;  %v2780_v18 = vsel %vm278_vm4, %v4254_v15, 0.0 }
0x1a0a   :  { %3999 = vmatmul.mubr.msk.bf16.vlgmr.msra.gmra.mrb[64].mxu0 %vm278_vm4, %v2792_v20 }
0x1a0b   :  { %4009 = vmatpush3.bf16.msra.mxu0 %v4161_v19  ;;  %4010 = vmatprep.mubr.msk.bf16.mxu0 %vm4292_vm3, %v4284_v24 }
0x1a0c   :  { %4020 = vmatprep.subr.bf16.mxu0 %v4284_v24 }
0x1a6b   :  { %v2761_v21 = vpop.xlane.xlu1 %2760 }
0x1a6c   :  { %v2769_v22 = vsub.f32 %v2753_v59, %v2761_v21 }
0x1a6e   :  { %v2774_v0 = vmul.f32 1.442695, %v2769_v22 }
0x1a6f   :  { %v2764_v23 = vpop.xlane.xlu1 %2763 }
0x1a70   :  { %4255 = vpow2.f32 %v2774_v0  ;;  %v2770_v25 = vsub.f32 %v2754_v61, %v2764_v23 }
0x1a72   :  { %v2776_v42 = vmul.f32 1.442695, %v2770_v25 }
0x1a73   :  { %v2767_v26 = vpop.xlane.xlu1 %2766 }
0x1a74   :  { %4257 = vpow2.f32 %v2776_v42  ;;  %v2771_v28 = vsub.f32 %v2755_v8, %v2767_v26 }
0x1a76   :  { %v2778_v29 = vmul.f32 1.442695, %v2771_v28  ;;  %v4169_v28 = vld [vmem:[%s5239_s5 + $0x44] ss:$8 sps:$4 sm:$0xff]  }
0x1a78   :  { %4259 = vpow2.f32 %v2778_v29  ;;  %v4167_v29 = vld [vmem:[%s5239_s5 + $0x40] ss:$8 sps:$4 sm:$0xff]  }
0x1a7a   :  { %v4256_v33 = vpop.eup %4255 }
0x1a7b   :  { %v2783_v35 = vsel %vm278_vm4, %v4256_v33, 0.0  ;;  %v2793_v36 = vpack.c.bf16 %v4256_v33, %v4256_v33  ;;  %v4170_v33 = vld [vmem:[%s5239_s5 + $0x50] ss:$8 sps:$4 sm:$0xff]  }
0x1a7c   :  { %2784 = vadd.xlane.f32.xlu1 %v2783_v35  ;;  %v4173_v35 = vld [vmem:[%s5239_s5 + $0x60] ss:$8 sps:$4 sm:$0xff]  }
0x1a7d   :  { %4005 = vmatmul.mubr.msk.bf16.vlgmr.msra.gmra.mrb[84].mxu1 %vm278_vm4, %v2793_v36  ;;  %v4176_v36 = vld [vmem:[%s5239_s5 + $0x70] ss:$8 sps:$4 sm:$0xff]  }
0x1a7e   :  { %v4258_v1 = vpop.eup %4257  ;;  %4015 = vmatpush3.bf16.msra.mxu1 %v4162_v34  ;;  %4016 = vmatprep.mubr.msk.bf16.mxu1 %vm4292_vm3, %v4284_v24  ;;  %v4175_v34 = vld [vmem:[%s5239_s5 + $0x64] ss:$8 sps:$4 sm:$0xff]  }
0x1a7f   :  { %v2786_v27 = vsel %vm278_vm4, %v4258_v1, 0.0  ;;  %v2794_v11 = vpack.c.bf16 %v4258_v1, %v4258_v1  ;;  %3159 = vmatprep.subr.bf16.mxu1 %v4169_v28  ;;  %v4178_v1 = vld [vmem:[%s5239_s5 + $0x74] ss:$8 sps:$4 sm:$0xff]  }
0x1a80   :  { %2787 = vadd.xlane.f32.xlu1 %v2786_v27 }
0x1a81   :  { %4011 = vmatmul.mubr.msk.bf16.vlgmr.msra.gmra.mrb[68].mxu0 %vm278_vm4, %v2794_v11 }
0x1a82   :  { %v4260_v39 = vpop.eup %4259  ;;  %4028 = vmatprep.mubr.msk.bf16.mxu0 %vm4292_vm3, %v4284_v24  ;;  %4021 = vmatpush3.bf16.msra.mxu0 %v4163_v43 }
0x1a83   :  { %v2789_v40 = vsel %vm278_vm4, %v4260_v39, 0.0  ;;  %v2795_v41 = vpack.c.bf16 %v4260_v39, %v4260_v39  ;;  %4022 = vmatprep.subr.bf16.mxu0 %v4284_v24 }
0x1a84   :  { %2790 = vadd.xlane.f32.xlu1 %v2789_v40  ;;  %v3104_v40 = vrot.slane %v4842_v55, %v1482_v2  ;;  %v4181_v2 = vld [vmem:[%s5240_s6 + $0x50] sm:$0xff]   ;;  %v4182_v55 = vld [vmem:[%s5240_s6 + $0x58] sm:$0xff]  }
0x1a85   :  { %4017 = vmatmul.mubr.msk.bf16.vlgmr.msra.gmra.mrb[88].mxu1 %vm278_vm4, %v2795_v41 }
0x1a86   :  { %3191 = vmatprep.mubr.bf16.mxu1 %v4283_v6  ;;  %4023 = vmatpush3.bf16.msra.mxu0 %v4164_v48  ;;  %v4186_v48 = vld [vmem:[%s5240_s6 + $0x78] sm:$0xff]  }
0x1a87   :  { %4024 = vmatprep.subr.bf16.mxu0 %v4284_v24  ;;  %3160 = vmatpush1.bf16.msra.mxu1 %v4167_v29 }
0x1a88   :  { %2781 = vadd.xlane.f32.xlu1 %v2780_v18 }
0x1a8a   :  { %4025 = vmatpush3.bf16.msra.mxu0 %v4165_v49 }
0x1a8b   :  { %4026 = vmatprep.subr.bf16.mxu0 %v4284_v24 }
0x1a8e   :  { %4027 = vmatpush3.bf16.msra.mxu0 %v4166_v51 }
0x1a8f   :  { %4032 = vmatprep.subr.bf16.mxu0 %v4284_v24 }
0x1add   :  { %v2839_v31 = vpop.f32.mrb[64].mxu0 }
0x1ade   :  { %v4000_v44 = vpop.f32.mrb[65].mxu0 }
0x1adf   :  { %v2842_v45 = vpop.f32.mrb[66].mxu0  ;;  %v4179_v44 = vld [vmem:[%s5240_s6 + $0x40] sm:$0xff]  }
0x1ae0   :  { %v4001_v46 = vpop.f32.mrb[67].mxu0  ;;  %v4183_v45 = vld [vmem:[%s5240_s6 + $0x60] sm:$0xff]  }
0x1ae1   :  { %v4184_v46 = vld [vmem:[%s5240_s6 + $0x68] sm:$0xff]  }
0x1b09   :  { %v2785_v47 = vpop.xlane.xlu1 %2784 }
0x1b0a   :  { %4261 = vrcp.f32 %v2785_v47  ;;  %v4185_v47 = vld [vmem:[%s5240_s6 + $0x70] sm:$0xff]  }
0x1b0d   :  { %v2788_v6 = vpop.xlane.xlu1 %2787 }
0x1b0e   :  { %4263 = vrcp.f32 %v2788_v6 }
0x1b11   :  { %v2791_v50 = vpop.xlane.xlu1 %2790 }
0x1b12   :  { %4265 = vrcp.f32 %v2791_v50 }
0x1b14   :  { %v4262_v52 = vpop.eup %4261 }
0x1b15   :  { %v2782_v7 = vpop.xlane.xlu1 %2781 }
0x1b16   :  { %4267 = vrcp.f32 %v2782_v7 }
0x1b18   :  { %v4264_v13 = vpop.eup %4263 }
0x1b1c   :  { %v4266_v61 = vpop.eup %4265 }
0x1b20   :  { %v4268_v8 = vpop.eup %4267 }
0x1b21   :  { %v2996_v30 = vmul.f32 %v4268_v8, %v2839_v31 }
0x1b50   :  { %v2888_v53 = vpop.f32.mrb[84].mxu1 }
0x1b51   :  { %v2997_v56 = vmul.f32 %v4262_v52, %v2888_v53  ;;  %v4006_v57 = vpop.f32.mrb[85].mxu1 }
0x1b52   :  { %v2891_v58 = vpop.f32.mrb[86].mxu1 }
0x1b53   :  { %v4007_v59 = vpop.f32.mrb[87].mxu1  ;;  %3001 = vrot.lane.b32.xlu0 %v2997_v56, %s5287_s25 }
0x1b54   :  { %v2937_v60 = vpop.f32.mrb[68].mxu0 }
0x1b55   :  { %v2998_v37 = vmul.f32 %v4264_v13, %v2937_v60  ;;  %v4012_v32 = vpop.f32.mrb[69].mxu0 }
0x1b56   :  { %v2940_v38 = vpop.f32.mrb[70].mxu0 }
0x1b57   :  { %3005 = vrot.lane.b32.xlu1 %v2998_v37, %s5288_s30  ;;  %v4013_v17 = vpop.f32.mrb[71].mxu0 }
0x1b58   :  { %v2986_v62 = vpop.f32.mrb[88].mxu1 }
0x1b59   :  { %v2999_v63 = vmul.f32 %v4266_v61, %v2986_v62  ;;  %v4018_v3 = vpop.f32.mrb[89].mxu1 }
0x1b5a   :  { %v2989_v4 = vpop.f32.mrb[90].mxu1  ;;  %v4188_v3 = vld [vmem:[%s5296_s28 + $0x8] sm:$0xff]  }
0x1b5b   :  { %v4019_v5 = vpop.f32.mrb[91].mxu1  ;;  %3009 = vrot.lane.b32.xlu1 %v2999_v63, %s5289_s29  ;;  %v4187_v63 = vld [vmem:[%s5296_s28] sm:$0xff]   ;;  %v4189_v4 = vld [vmem:[%s5296_s28 + $0x10] sm:$0xff]  }
0x1b5c   :  { %v4190_v5 = vld [vmem:[%s5296_s28 + $0x18] sm:$0xff]  }
0x1bc5   :  { %v3002_v9 = vpop.permute.xlu0 %3001 }
0x1bc6   :  { %v3012_v12 = vsel %vm278_vm4, %v2996_v30, %v3002_v9  ;;  %v3625_v30 = vld [vmem:[%s5297_s23] ss:$0 sm:$0xff] }
0x1bc9   :  { %v3006_v10 = vpop.permute.xlu1 %3005 }
0x1bca   :  { %v3013_v14 = vsel %vm704_vm5, %v3012_v12, %v3006_v10 }
0x1bcd   :  { %v3010_v15 = vpop.permute.xlu1 %3009 }
0x1bce   :  { %v3014_v19 = vsel %vm706_vm6, %v3013_v14, %v3010_v15 }
0x1bcf   :  { %v3015_v20 = vpack.c.bf16 %v3014_v19, %v3014_v19 }
0x1bd1   :  { %4029 = vmatmul.mubr.msk.bf16.vlgmr.msra.gmra.mrb[72].mxu0 %vm71_vm0, %v3015_v20 }
0x1bd2   :  { %4048 = vmatprep.mubr.msk.bf16.mxu0 %vm4292_vm3, %v4284_v24  ;;  %4033 = vmatpush3.bf16.msra.mxu0 %v4179_v44 }
0x1bd3   :  { %4034 = vmatprep.subr.bf16.mxu0 %v4284_v24 }
0x1bd6   :  { %4035 = vmatpush3.bf16.msra.mxu0 %v4180_v16 }
0x1bd7   :  { %4036 = vmatprep.subr.bf16.mxu0 %v4284_v24 }
0x1bda   :  { %4037 = vmatpush3.bf16.msra.mxu0 %v4181_v2 }
0x1bdb   :  { %4038 = vmatprep.subr.bf16.mxu0 %v4284_v24 }
0x1bde   :  { %4039 = vmatpush3.bf16.msra.mxu0 %v4182_v55 }
0x1bdf   :  { %4040 = vmatprep.subr.bf16.mxu0 %v4284_v24 }
0x1be2   :  { %4041 = vmatpush3.bf16.msra.mxu0 %v4183_v45 }
0x1be3   :  { %4042 = vmatprep.subr.bf16.mxu0 %v4284_v24 }
0x1be6   :  { %4043 = vmatpush3.bf16.msra.mxu0 %v4184_v46 }
0x1be7   :  { %4044 = vmatprep.subr.bf16.mxu0 %v4284_v24 }
0x1bea   :  { %4045 = vmatpush3.bf16.msra.mxu0 %v4185_v47 }
0x1beb   :  { %4046 = vmatprep.subr.bf16.mxu0 %v4284_v24 }
0x1bee   :  { %4047 = vmatpush3.bf16.msra.mxu0 %v4186_v48 }
0x1ca4   :  { %v3086_v21 = vpop.f32.mrb[72].mxu0 }
0x1ca5   :  { %v5132_v22 = vadd.f32 %v3086_v21, %v4997_v54  ;;  %v4030_v0 = vpop.f32.mrb[73].mxu0  ;;  %v4172_v54 = vld [vmem:[%s5239_s5 + $0x54] ss:$8 sps:$4 sm:$0xff]  }
0x1ca6   :  { %v3089_v23 = vpop.f32.mrb[74].mxu0  ;;  %3161 = vmatprep.subr.bf16.mxu1 %v4172_v54 }
0x1ca7   :  { %v4031_v25 = vpop.f32.mrb[75].mxu0  ;;  %v3093_v42 = vmul.f32 %v5132_v22, %v5132_v22  ;;  %3162 = vmatpush1.bf16.msra.mxu1 %v4170_v33 }
0x1ca8   :  { %3163 = vmatprep.subr.bf16.mxu1 %v4175_v34 }
0x1ca9   :  { %v3094_v26 = vsel %vm71_vm0, %v3093_v42, 0.0 }
0x1caa   :  { %3095 = vadd.xlane.f32.xlu0 %v3094_v26 }
0x1cab   :  { %3164 = vmatpush1.bf16.msra.mxu1 %v4173_v35 }
0x1cac   :  { %3165 = vmatprep.subr.bf16.mxu1 %v4178_v1 }
0x1caf   :  { %3166 = vmatpush1.bf16.msra.mxu1 %v4176_v36 }
0x1cb0   :  { %4052 = vmatprep.subr.bf16.mxu1 %v4284_v24 }
0x1d37   :  { %v3096_v27 = vpop.xlane.xlu0 %3095 }
0x1d38   :  { %v3097_v11 = vmul.f32 0.015625, %v3096_v27 }
0x1d3a   :  { %v3098_v39 = vadd.f32 1e-05, %v3097_v11 }
0x1d3c   :  { %4269 = vrsqrt.f32 %v3098_v39 }
0x1d46   :  { %v4270_v41 = vpop.eup %4269 }
0x1d47   :  { %v3100_v18 = vmul.f32 %v4270_v41, %v5132_v22 }
0x1d49   :  { %v3105_v43 = vmul.f32 %v3104_v40, %v3100_v18 }
0x1d4b   :  { %v3106_v31 = vpack.c.bf16 %v3105_v43, %v3105_v43 }
0x1d4d   :  { %3599 = vmatmul.mubr.msk.bf16.vlgmr.msra.gmra.mrb[92].mxu1 %vm71_vm0, %v3106_v31 }
0x1d4e   :  { %4060 = vmatprep.mubr.msk.bf16.mxu1 %vm4292_vm3, %v4284_v24  ;;  %4053 = vmatpush3.bf16.msra.mxu1 %v4187_v63 }
0x1d4f   :  { %4054 = vmatprep.subr.bf16.mxu1 %v4284_v24 }
0x1d52   :  { %4055 = vmatpush3.bf16.msra.mxu1 %v4188_v3 }
0x1d53   :  { %4056 = vmatprep.subr.bf16.mxu1 %v4284_v24 }
0x1d56   :  { %4057 = vmatpush3.bf16.msra.mxu1 %v4189_v4 }
0x1d57   :  { %4058 = vmatprep.subr.bf16.mxu1 %v4284_v24 }
0x1d5a   :  { %4059 = vmatpush3.bf16.msra.mxu1 %v4190_v5 }
0x1e20   :  { %v3193_v6 = vpop.f32.mrb[92].mxu1 }
0x1e21   :  { %v3600_v49 = vmul.f32 -1.442695, %v3193_v6  ;;  %v3195_v50 = vpop.f32.mrb[93].mxu1 }
0x1e22   :  { %v3197_v51 = vpop.f32.mrb[94].mxu1 }
0x1e23   :  { %4271 = vpow2.f32 %v3600_v49  ;;  %v3198_v52 = vpop.f32.mrb[95].mxu1 }
0x1e2d   :  { %v4272_v53 = vpop.eup %4271 }
0x1e2e   :  { %v3203_v56 = vadd.f32 1.0, %v4272_v53 }
0x1e30   :  { %4273 = vrcp.f32 %v3203_v56 }
0x1e3a   :  { %v4274_v57 = vpop.eup %4273 }
0x1e3b   :  { %v3206_v58 = vmul.f32 %v4274_v57, %v3193_v6 }
0x1e3d   :  { %v3207_v59 = vmul.f32 %v3206_v58, %v3195_v50 }
0x1e3f   :  { %v3208_v13 = vpack.c.bf16 %v3207_v59, %v3207_v59 }
0x1e41   :  { %4049 = vmatmul.mubr.bf16.vlgmr.msra.gmra.mrb[76].mxu0 %v3208_v13 }
0x1f14   :  { %v3308_v60 = vpop.f32.mrb[76].mxu0 }
0x1f15   :  { %v3314_v37 = vadd.f32 %v3308_v60, %v5132_v22  ;;  %v4050_v32 = vpop.f32.mrb[77].mxu0 }
0x1f16   :  { %v3311_v38 = vpop.f32.mrb[78].mxu0 }
0x1f17   :  { %v3316_v17 = vmul.f32 %v3314_v37, %v3314_v37  ;;  %v4051_v61 = vpop.f32.mrb[79].mxu0 }
0x1f19   :  { %v3317_v62 = vsel %vm71_vm0, %v3316_v17, 0.0 }
0x1f1a   :  { %3318 = vadd.xlane.f32.xlu1 %v3317_v62 }
0x1fa7   :  { %v3319_v7 = vpop.xlane.xlu1 %3318 }
0x1fa8   :  { %v3320_v8 = vmul.f32 0.015625, %v3319_v7 }
0x1faa   :  { %v3321_v9 = vadd.f32 1e-05, %v3320_v8 }
0x1fac   :  { %4275 = vrsqrt.f32 %v3321_v9 }
0x1fb6   :  { %v4276_v10 = vpop.eup %4275 }
0x1fb7   :  { %v3323_v12 = vmul.f32 %v4276_v10, %v3314_v37 }
0x1fb9   :  { %v3330_v14 = vmul.f32 %v3625_v30, %v3323_v12 }
0x1fbb   :  { %v3331_v15 = vpack.c.bf16 %v3330_v14, %v3330_v14 }
0x1fbd   :  { %4061 = vmatmul.mubr.msk.bf16.vlgmr.msra.gmra.mrb[96].mxu1 %vm71_vm0, %v3331_v15 }
0x2090   :  { %v3401_v24 = vpop.f32.mrb[96].mxu1 }
0x2091   :  { %3407 = vst [vmem:[%s5298_s8] sm:$0xff] %v3401_v24  ;;  %v4062_v19 = vpop.f32.mrb[97].mxu1 }
0x2092   :  { %v3404_v20 = vpop.f32.mrb[98].mxu1 }
0x2093   :  { %v4063_v21 = vpop.f32.mrb[99].mxu1 }

</bundles_post_ra>
